<compile_context>
chip_gen: v6e
topology: v6e:2x2x1
jax: 0.10.0
libtpu: 0.0.40
codegen_flags: <defaults>
</compile_context>

<pallas_src>
import math

import jax
import jax.numpy as jnp
from jax.experimental import pallas as pl
from jax.experimental.pallas import tpu as pltpu

# ----------------------------- rp config --------------------------------------
MAX_UE_PER_BS = 5
BACKHAUL_NUM = 1
IAB_NUM = 10
TRAIN_FEATURE = 6
EPS = 1e-7            # rp.eps (value not shown in the snippet; kept from prior version)

UNIT_INPUT = 6
EMB_SIZE = 30
UE_FEATS_PER_IAB = TRAIN_FEATURE * MAX_UE_PER_BS          # 30
SMALL_IN = EMB_SIZE * MAX_UE_PER_BS + 1                   # 151
SMALL_HID = SMALL_IN                                      # 151
SMALL_OUT = (MAX_UE_PER_BS + BACKHAUL_NUM) * 2            # 12
BIG_IN = EMB_SIZE * IAB_NUM                               # 300
BIG_HID = BIG_IN                                          # 300
BIG_OUT = 10
IAB_FEATS = TRAIN_FEATURE * IAB_NUM                       # 60
UE_FEATS = UE_FEATS_PER_IAB * IAB_NUM                     # 300
X_FEATS = IAB_FEATS + UE_FEATS                            # 360
OUT_COLS = IAB_NUM * SMALL_OUT                            # 120


# ----------------------------- kernel helpers ----------------------------------
def _softmax_last(z):
    z = z - jnp.max(z, axis=-1, keepdims=True)
    e = jnp.exp(z)
    return e / jnp.sum(e, axis=-1, keepdims=True)


def _mm(a, w_ref):
    # Cast the activation to the weight's storage dtype (bf16 by default, f32 for exact
    # parity) at the matmul boundary only; always accumulate in f32 on the MXU.
    w = w_ref[...]
    return jnp.dot(a.astype(w.dtype), w, preferred_element_type=jnp.float32)


# ----------------------------- fused kernel ------------------------------------
def _fused_kernel(x_iab_ref, x_ue_ref, ind_ref,
                  edw10_ref, edb10_ref, edw5_ref, edb5_ref,
                  bw1_ref, bb1_ref, bw2_ref, bb2_ref, bw3_ref, bb3_ref,
                  sw1_ref, sb1_ref, sw2_ref, sb2_ref, sw3_ref, sb3_ref,
                  o_ref, stage_ref):
    relu = lambda z: jnp.maximum(z, 0.0)
    tb = x_iab_ref.shape[0]                      # batch rows in this tile
    tb_s = stage_ref.shape[0] // IAB_NUM         # row stride in the stacked stage (mult of 8)
    sdt = stage_ref.dtype

    # Only for tiny ragged batches (tb not a multiple of 8): zero the stage padding rows
    # so the stacked softmax below stays finite (padding rows are never written back).
    if tb_s != tb:
        stage_ref[...] = jnp.zeros(stage_ref.shape, sdt)

    # ---- big net: embed the 10 IAB units (block-diag Linear(6->30) x10) -> shares ------
    emb_iab = _mm(x_iab_ref[...], edw10_ref) + edb10_ref[...]            # (tb, 300)
    h = relu(_mm(emb_iab, bw1_ref) + bb1_ref[...])                       # (tb, 300)
    h = relu(_mm(h, bw2_ref) + bb2_ref[...])                             # (tb, 300)
    shares = _softmax_last(_mm(h, bw3_ref) + bb3_ref[...])               # (tb, 10)

    # ---- stage UE embeddings row-stacked over the 10 IABs -------------------------------
    # Row (i*tb_s + r) of the stage = [embed(UE feats of IAB i, batch row r) | share_{r,i}]
    # so the three small-net matmuls below run ONCE over all 10*tb rows.
    for i in range(IAB_NUM):
        r0 = i * tb_s
        ue_emb = (_mm(x_ue_ref[:, UE_FEATS_PER_IAB * i:UE_FEATS_PER_IAB * (i + 1)], edw5_ref)
                  + edb5_ref[...])                                        # (tb, 150)
        stage_ref[r0:r0 + tb, 0:SMALL_IN - 1] = ue_emb.astype(sdt)
        stage_ref[r0:r0 + tb, SMALL_IN - 1:SMALL_IN] = shares[:, i:i + 1].astype(sdt)

    # ---- small net once over the stacked rows (weights pushed into the MXU once) --------
    h = relu(_mm(stage_ref[...], sw1_ref) + sb1_ref[...])                 # (10*tb_s, 151)
    h = relu(_mm(h, sw2_ref) + sb2_ref[...])                              # (10*tb_s, 151)
    p = _softmax_last(_mm(h, sw3_ref) + sb3_ref[...])                     # (10*tb_s, 12)

    # ---- mask with the UE indicator, renormalize, scale by the IAB share, write back ----
    for i in range(IAB_NUM):
        r0 = i * tb_s
        p_i = p[r0:r0 + tb, :]                                            # (tb, 12)
        ind_i = ind_ref[:, SMALL_OUT * i:SMALL_OUT * (i + 1)]             # (tb, 12)
        masked = p_i * ind_i
        norm = jnp.sum(masked, axis=-1, keepdims=True) + EPS
        o_ref[:, SMALL_OUT * i:SMALL_OUT * (i + 1)] = masked * (shares[:, i:i + 1] / norm)


# ----------------------------- parameters --------------------------------------
def _init_linear(key, fan_in, fan_out):
    # PyTorch nn.Linear default init: U(-1/sqrt(fan_in), 1/sqrt(fan_in)); stored (in, out).
    kw, kb = jax.random.split(key)
    bound = 1.0 / math.sqrt(fan_in)
    w = jax.random.uniform(kw, (fan_in, fan_out), jnp.float32, -bound, bound)
    b = jax.random.uniform(kb, (1, fan_out), jnp.float32, -bound, bound)
    return w, b


def init_params(key):
    keys = jax.random.split(key, 7)
    return {
        "embed": [_init_linear(keys[0], UNIT_INPUT, EMB_SIZE)],   # single Linear(6,30)
        "big": [_init_linear(keys[1], BIG_IN, BIG_HID),
                _init_linear(keys[2], BIG_HID, BIG_HID),
                _init_linear(keys[3], BIG_HID, BIG_OUT)],
        "small": [_init_linear(keys[4], SMALL_IN, SMALL_HID),
                  _init_linear(keys[5], SMALL_HID, SMALL_HID),
                  _init_linear(keys[6], SMALL_HID, SMALL_OUT)],
        # smallDonor exists in the module __init__ but forward() never reaches it.
    }


def pack_params(params, matmul_dtype=jnp.bfloat16):
    """One-time weight prep (hoisted out of forward): kron-fold the shared embedding into
    block-diagonal weights and cast MXU operands to `matmul_dtype` (biases stay f32)."""
    ew, eb = params["embed"][0]                                   # (6,30), (1,30)
    edw10 = jnp.kron(jnp.eye(IAB_NUM, dtype=ew.dtype), ew)        # (60, 300)
    edb10 = jnp.tile(eb, (1, IAB_NUM))                            # (1, 300)
    edw5 = jnp.kron(jnp.eye(MAX_UE_PER_BS, dtype=ew.dtype), ew)   # (30, 150)
    edb5 = jnp.tile(eb, (1, MAX_UE_PER_BS))                       # (1, 150)

    (bw1, bb1), (bw2, bb2), (bw3, bb3) = params["big"]
    (sw1, sb1), (sw2, sb2), (sw3, sb3) = params["small"]

    wcast = lambda m: m.astype(matmul_dtype)
    return [wcast(edw10), edb10, wcast(edw5), edb5,
            wcast(bw1), bb1, wcast(bw2), bb2, wcast(bw3), bb3,
            wcast(sw1), sb1, wcast(sw2), sb2, wcast(sw3), sb3]


# ----------------------------- forward (Pallas) ---------------------------------
def _choose_tb(batch, row_block):
    """Batch-tile rows: big tiles to amortize per-step overhead / weight pushes, but at
    least two tiles when possible so both v7x TensorCores get work."""
    row_block = max(8, (row_block // 8) * 8)
    if batch <= 16:
        return batch                                   # single tile; block dim == array dim
    if batch <= 2 * row_block:
        return min(row_block, ((pl.cdiv(batch, 2) + 7) // 8) * 8)
    return row_block


def forward(weights, x, ue_idx, *, row_block=512):
    """weights: pack_params(...) output; x: (B, 360); ue_idx: (B, 10, 10) -> y: (B, 10, 12)."""
    B = x.shape[0]
    x = x.astype(jnp.float32)

    x_iab = x[:, :IAB_FEATS]                                      # (B, 60)
    x_ue = x[:, IAB_FEATS:]                                       # (B, 300)
    indicator = jnp.concatenate(
        [ue_idx.astype(jnp.float32).reshape(B, IAB_NUM, MAX_UE_PER_BS * 2),
         jnp.ones((B, IAB_NUM, 2), jnp.float32)], axis=2).reshape(B, OUT_COLS)   # (B, 120)

    tb = _choose_tb(B, row_block)
    tb_s = ((tb + 7) // 8) * 8                                    # stage row stride (mult of 8)
    grid = (pl.cdiv(B, tb),)

    row_spec = lambda cols: pl.BlockSpec((tb, cols), lambda i: (i, 0))
    w_spec = lambda w: pl.BlockSpec(w.shape, lambda i: (0, 0))    # constant -> stays resident

    in_specs = [row_spec(IAB_FEATS), row_spec(UE_FEATS), row_spec(OUT_COLS)]
    in_specs += [w_spec(w) for w in weights]
    stage_dtype = weights[0].dtype                                # matmul operand dtype

    out = pl.pallas_call(
        _fused_kernel,
        out_shape=jax.ShapeDtypeStruct((B, OUT_COLS), jnp.float32),
        grid=grid,
        in_specs=in_specs,
        out_specs=pl.BlockSpec((tb, OUT_COLS), lambda i: (i, 0)),
        scratch_shapes=[pltpu.VMEM((IAB_NUM * tb_s, SMALL_IN), stage_dtype)],
        compiler_params=pltpu.CompilerParams(
            dimension_semantics=("parallel",),        # shard batch tiles over v7x's 2 TCs
            vmem_limit_bytes=48 * 1024 * 1024,
        ),
    )(x_iab, x_ue, indicator, *weights)

    return out.reshape(B, IAB_NUM, SMALL_OUT)                     # (B, 10, 12)


# ----------------------------- pure-JAX reference --------------------------------
def reference_forward(params, x, ue_idx):
    """Direct transcription of the PyTorch forward (structural self-check)."""
    B = x.shape[0]
    ew, eb = params["embed"][0]
    embed = lambda u: u @ ew + eb[0]

    emb_iab = embed(x[:, :IAB_FEATS].reshape(B, IAB_NUM, TRAIN_FEATURE)).reshape(B, BIG_IN)
    (bw1, bb1), (bw2, bb2), (bw3, bb3) = params["big"]
    h = jax.nn.relu(emb_iab @ bw1 + bb1[0])
    h = jax.nn.relu(h @ bw2 + bb2[0])
    shares = jax.nn.softmax(h @ bw3 + bb3[0], axis=-1)            # (B, 10)

    (sw1, sb1), (sw2, sb2), (sw3, sb3) = params["small"]
    x_ues = x[:, IAB_FEATS:].reshape(B, IAB_NUM, MAX_UE_PER_BS, TRAIN_FEATURE)
    outs = []
    for i in range(IAB_NUM):
        ue_emb = embed(x_ues[:, i]).reshape(B, EMB_SIZE * MAX_UE_PER_BS)
        si = jnp.concatenate([ue_emb, shares[:, i:i + 1]], axis=1)
        h = jax.nn.relu(si @ sw1 + sb1[0])
        h = jax.nn.relu(h @ sw2 + sb2[0])
        p = jax.nn.softmax(h @ sw3 + sb3[0], axis=-1)
        ind = jnp.concatenate([ue_idx[:, i].astype(jnp.float32),
                               jnp.ones((B, 2), jnp.float32)], axis=1)
        norm = jnp.sum(p * ind, axis=1, keepdims=True) + EPS
        outs.append(p * ind / norm * shares[:, i:i + 1])
    return jnp.stack(outs, axis=1)                                # (B, 10, 12)


# ----------------------------- main ----------------------------------------------
if __name__ == "__main__":
    key = jax.random.PRNGKey(0)
    k_params, k_x, k_idx, k_x2, k_idx2 = jax.random.split(key, 5)
    params = init_params(k_params)

    # --- exact-parity path (f32 MXU operands), batch=2, single tile -----------------
    batch = 2
    x = jax.random.normal(k_x, (batch, X_FEATS), jnp.float32)                         # (2, 360)
    ue_idx = jax.random.bernoulli(
        k_idx, 0.5, (batch, IAB_NUM, MAX_UE_PER_BS * 2)).astype(jnp.float32)          # (2, 10, 10)

    packed_f32 = pack_params(params, matmul_dtype=jnp.float32)    # weight folding done once
    y = jax.jit(forward)(packed_f32, x, ue_idx)
    jax.block_until_ready(y)
    assert y.shape == (batch, IAB_NUM, SMALL_OUT)
    assert bool(jnp.all(jnp.isfinite(y)))
    with jax.default_matmul_precision("highest"):
        y_ref = reference_forward(params, x, ue_idx)
    assert bool(jnp.allclose(y, y_ref, rtol=1e-2, atol=1e-5)), "f32 path mismatch vs reference"

    # --- default bf16-weight path, multi-tile batch (exercises tiling + padded tail) ---
    batch2 = 24                                                    # tb=16 -> 2 tiles, padded tail
    x2 = jax.random.normal(k_x2, (batch2, X_FEATS), jnp.float32)
    ue_idx2 = jax.random.bernoulli(
        k_idx2, 0.5, (batch2, IAB_NUM, MAX_UE_PER_BS * 2)).astype(jnp.float32)
    packed_bf16 = pack_params(params)                              # bf16 MXU operands (default)
    y2 = jax.jit(forward)(packed_bf16, x2, ue_idx2)
    jax.block_until_ready(y2)
    assert y2.shape == (batch2, IAB_NUM, SMALL_OUT)
    assert bool(jnp.all(jnp.isfinite(y2)))
    with jax.default_matmul_precision("highest"):
        y2_ref = reference_forward(params, x2, ue_idx2)
    assert float(jnp.max(jnp.abs(y2 - y2_ref))) < 0.05, "bf16 path drifted beyond tolerance"

    print("KERNEL_OK")
</pallas_src>

<mosaic_0001>
module attributes {stable_mosaic.version = 11 : i64} {
  func.func @_fused_kernel(%arg0: i32, %arg1: memref<2x60xf32, #tpu.memory_space<vmem>>, %arg2: memref<2x300xf32, #tpu.memory_space<vmem>>, %arg3: memref<2x120xf32, #tpu.memory_space<vmem>>, %arg4: memref<60x300xf32, #tpu.memory_space<vmem>>, %arg5: memref<1x300xf32, #tpu.memory_space<vmem>>, %arg6: memref<30x150xf32, #tpu.memory_space<vmem>>, %arg7: memref<1x150xf32, #tpu.memory_space<vmem>>, %arg8: memref<300x300xf32, #tpu.memory_space<vmem>>, %arg9: memref<1x300xf32, #tpu.memory_space<vmem>>, %arg10: memref<300x300xf32, #tpu.memory_space<vmem>>, %arg11: memref<1x300xf32, #tpu.memory_space<vmem>>, %arg12: memref<300x10xf32, #tpu.memory_space<vmem>>, %arg13: memref<1x10xf32, #tpu.memory_space<vmem>>, %arg14: memref<151x151xf32, #tpu.memory_space<vmem>>, %arg15: memref<1x151xf32, #tpu.memory_space<vmem>>, %arg16: memref<151x151xf32, #tpu.memory_space<vmem>>, %arg17: memref<1x151xf32, #tpu.memory_space<vmem>>, %arg18: memref<151x12xf32, #tpu.memory_space<vmem>>, %arg19: memref<1x12xf32, #tpu.memory_space<vmem>>, %arg20: memref<2x120xf32, #tpu.memory_space<vmem>>, %arg21: memref<80x151xf32, #tpu.memory_space<vmem>>) attributes {dimension_semantics = [#tpu.dimension_semantics<parallel>], iteration_bounds = array<i64: 1>, scalar_prefetch = 0 : i64, scratch_operands = 1 : i64, tpu.core_type = #tpu.core_type<tc>, window_params = [{transform_indices = @transform_0, window_bounds = array<i64: 2, 60>}, {transform_indices = @transform_1, window_bounds = array<i64: 2, 300>}, {transform_indices = @transform_2, window_bounds = array<i64: 2, 120>}, {pipeline_mode = #tpu.pipeline_mode<synchronous>, transform_indices = @transform_3, window_bounds = array<i64: 60, 300>}, {pipeline_mode = #tpu.pipeline_mode<synchronous>, transform_indices = @transform_4, window_bounds = array<i64: 1, 300>}, {pipeline_mode = #tpu.pipeline_mode<synchronous>, transform_indices = @transform_5, window_bounds = array<i64: 30, 150>}, {pipeline_mode = #tpu.pipeline_mode<synchronous>, transform_indices = @transform_6, window_bounds = array<i64: 1, 150>}, {pipeline_mode = #tpu.pipeline_mode<synchronous>, transform_indices = @transform_7, window_bounds = array<i64: 300, 300>}, {pipeline_mode = #tpu.pipeline_mode<synchronous>, transform_indices = @transform_8, window_bounds = array<i64: 1, 300>}, {pipeline_mode = #tpu.pipeline_mode<synchronous>, transform_indices = @transform_9, window_bounds = array<i64: 300, 300>}, {pipeline_mode = #tpu.pipeline_mode<synchronous>, transform_indices = @transform_10, window_bounds = array<i64: 1, 300>}, {pipeline_mode = #tpu.pipeline_mode<synchronous>, transform_indices = @transform_11, window_bounds = array<i64: 300, 10>}, {pipeline_mode = #tpu.pipeline_mode<synchronous>, transform_indices = @transform_12, window_bounds = array<i64: 1, 10>}, {pipeline_mode = #tpu.pipeline_mode<synchronous>, transform_indices = @transform_13, window_bounds = array<i64: 151, 151>}, {pipeline_mode = #tpu.pipeline_mode<synchronous>, transform_indices = @transform_14, window_bounds = array<i64: 1, 151>}, {pipeline_mode = #tpu.pipeline_mode<synchronous>, transform_indices = @transform_15, window_bounds = array<i64: 151, 151>}, {pipeline_mode = #tpu.pipeline_mode<synchronous>, transform_indices = @transform_16, window_bounds = array<i64: 1, 151>}, {pipeline_mode = #tpu.pipeline_mode<synchronous>, transform_indices = @transform_17, window_bounds = array<i64: 151, 12>}, {pipeline_mode = #tpu.pipeline_mode<synchronous>, transform_indices = @transform_18, window_bounds = array<i64: 1, 12>}, {transform_indices = @transform_19, window_bounds = array<i64: 2, 120>}]} {
    %cst = arith.constant 0.000000e+00 : f32
    %0 = vector.broadcast %cst : f32 to vector<80x151xf32>
    %c0 = arith.constant 0 : index
    %c0_0 = arith.constant 0 : index
    %1 = vector.load %arg21[%c0, %c0_0] : memref<80x151xf32, #tpu.memory_space<vmem>>, vector<80x151xf32>
    tpu.vector_store %arg21[%c0, %c0_0], %0 {strides = array<i32>} : memref<80x151xf32, #tpu.memory_space<vmem>>, vector<80x151xf32>,
    %c0_1 = arith.constant 0 : index
    %c0_2 = arith.constant 0 : index
    %2 = vector.load %arg1[%c0_1, %c0_2] : memref<2x60xf32, #tpu.memory_space<vmem>>, vector<2x60xf32>
    %c0_3 = arith.constant 0 : index
    %c0_4 = arith.constant 0 : index
    %3 = vector.load %arg4[%c0_3, %c0_4] : memref<60x300xf32, #tpu.memory_space<vmem>>, vector<60x300xf32>
    %cst_5 = arith.constant dense<0.000000e+00> : vector<2x300xf32>
    %4 = tpu.matmul %2, %3, %cst_5 {dimension_numbers = #tpu.dot_dimension_numbers<[1], [0], [0], [1], [0, 0, 1, 1], [], []>} : vector<2x60xf32>, vector<60x300xf32>, vector<2x300xf32> -> vector<2x300xf32>
    %c0_6 = arith.constant 0 : index
    %c0_7 = arith.constant 0 : index
    %5 = vector.load %arg5[%c0_6, %c0_7] : memref<1x300xf32, #tpu.memory_space<vmem>>, vector<1x300xf32>
    %6 = vector.broadcast %5 : vector<1x300xf32> to vector<2x300xf32>
    %7 = arith.addf %4, %6 : vector<2x300xf32>
    %c0_8 = arith.constant 0 : index
    %c0_9 = arith.constant 0 : index
    %8 = vector.load %arg8[%c0_8, %c0_9] : memref<300x300xf32, #tpu.memory_space<vmem>>, vector<300x300xf32>
    %cst_10 = arith.constant dense<0.000000e+00> : vector<2x300xf32>
    %9 = tpu.matmul %7, %8, %cst_10 {dimension_numbers = #tpu.dot_dimension_numbers<[1], [0], [0], [1], [0, 0, 1, 1], [], []>} : vector<2x300xf32>, vector<300x300xf32>, vector<2x300xf32> -> vector<2x300xf32>
    %c0_11 = arith.constant 0 : index
    %c0_12 = arith.constant 0 : index
    %10 = vector.load %arg9[%c0_11, %c0_12] : memref<1x300xf32, #tpu.memory_space<vmem>>, vector<1x300xf32>
    %11 = vector.broadcast %10 : vector<1x300xf32> to vector<2x300xf32>
    %12 = arith.addf %9, %11 : vector<2x300xf32>
    %cst_13 = arith.constant 0.000000e+00 : f32
    %13 = vector.broadcast %cst_13 : f32 to vector<2x300xf32>
    %14 = arith.maximumf %12, %13 : vector<2x300xf32>
    %c0_14 = arith.constant 0 : index
    %c0_15 = arith.constant 0 : index
    %15 = vector.load %arg10[%c0_14, %c0_15] : memref<300x300xf32, #tpu.memory_space<vmem>>, vector<300x300xf32>
    %cst_16 = arith.constant dense<0.000000e+00> : vector<2x300xf32>
    %16 = tpu.matmul %14, %15, %cst_16 {dimension_numbers = #tpu.dot_dimension_numbers<[1], [0], [0], [1], [0, 0, 1, 1], [], []>} : vector<2x300xf32>, vector<300x300xf32>, vector<2x300xf32> -> vector<2x300xf32>
    %c0_17 = arith.constant 0 : index
    %c0_18 = arith.constant 0 : index
    %17 = vector.load %arg11[%c0_17, %c0_18] : memref<1x300xf32, #tpu.memory_space<vmem>>, vector<1x300xf32>
    %18 = vector.broadcast %17 : vector<1x300xf32> to vector<2x300xf32>
    %19 = arith.addf %16, %18 : vector<2x300xf32>
    %cst_19 = arith.constant 0.000000e+00 : f32
    %20 = vector.broadcast %cst_19 : f32 to vector<2x300xf32>
    %21 = arith.maximumf %19, %20 : vector<2x300xf32>
    %c0_20 = arith.constant 0 : index
    %c0_21 = arith.constant 0 : index
    %22 = vector.load %arg12[%c0_20, %c0_21] : memref<300x10xf32, #tpu.memory_space<vmem>>, vector<300x10xf32>
    %cst_22 = arith.constant dense<0.000000e+00> : vector<2x10xf32>
    %23 = tpu.matmul %21, %22, %cst_22 {dimension_numbers = #tpu.dot_dimension_numbers<[1], [0], [0], [1], [0, 0, 1, 1], [], []>} : vector<2x300xf32>, vector<300x10xf32>, vector<2x10xf32> -> vector<2x10xf32>
    %c0_23 = arith.constant 0 : index
    %c0_24 = arith.constant 0 : index
    %24 = vector.load %arg13[%c0_23, %c0_24] : memref<1x10xf32, #tpu.memory_space<vmem>>, vector<1x10xf32>
    %25 = vector.broadcast %24 : vector<1x10xf32> to vector<2x10xf32>
    %26 = arith.addf %23, %25 : vector<2x10xf32>
    %cst_25 = arith.constant dense<0xFF800000> : vector<2xf32>
    %27 = vector.multi_reduction <maximumf>, %26, %cst_25 [1] : vector<2x10xf32> to vector<2xf32>
    %28 = vector.shape_cast %27 : vector<2xf32> to vector<2x1xf32>
    %29 = vector.broadcast %28 : vector<2x1xf32> to vector<2x10xf32>
    %30 = arith.subf %26, %29 : vector<2x10xf32>
    %31 = math.exp %30 : vector<2x10xf32>
    %cst_26 = arith.constant dense<0.000000e+00> : vector<2xf32>
    %32 = vector.multi_reduction <add>, %31, %cst_26 [1] : vector<2x10xf32> to vector<2xf32>
    %33 = vector.shape_cast %32 : vector<2xf32> to vector<2x1xf32>
    %34 = vector.broadcast %33 : vector<2x1xf32> to vector<2x10xf32>
    %35 = arith.divf %31, %34 : vector<2x10xf32>
    %c0_27 = arith.constant 0 : index
    %c0_28 = arith.constant 0 : index
    %36 = vector.load %arg2[%c0_27, %c0_28] : memref<2x300xf32, #tpu.memory_space<vmem>>, vector<2x30xf32>
    %c0_29 = arith.constant 0 : index
    %c0_30 = arith.constant 0 : index
    %37 = vector.load %arg6[%c0_29, %c0_30] : memref<30x150xf32, #tpu.memory_space<vmem>>, vector<30x150xf32>
    %cst_31 = arith.constant dense<0.000000e+00> : vector<2x150xf32>
    %38 = tpu.matmul %36, %37, %cst_31 {dimension_numbers = #tpu.dot_dimension_numbers<[1], [0], [0], [1], [0, 0, 1, 1], [], []>} : vector<2x30xf32>, vector<30x150xf32>, vector<2x150xf32> -> vector<2x150xf32>
    %c0_32 = arith.constant 0 : index
    %c0_33 = arith.constant 0 : index
    %39 = vector.load %arg7[%c0_32, %c0_33] : memref<1x150xf32, #tpu.memory_space<vmem>>, vector<1x150xf32>
    %40 = vector.broadcast %39 : vector<1x150xf32> to vector<2x150xf32>
    %41 = arith.addf %38, %40 : vector<2x150xf32>
    %c0_34 = arith.constant 0 : index
    %c0_35 = arith.constant 0 : index
    %42 = vector.load %arg21[%c0_34, %c0_35] : memref<80x151xf32, #tpu.memory_space<vmem>>, vector<2x150xf32>
    tpu.vector_store %arg21[%c0_34, %c0_35], %41 {strides = array<i32>} : memref<80x151xf32, #tpu.memory_space<vmem>>, vector<2x150xf32>,
    %43 = vector.extract_strided_slice %35 {offsets = [0, 0], sizes = [2, 1], strides = [1, 1]} : vector<2x10xf32> to vector<2x1xf32>
    %c0_36 = arith.constant 0 : index
    %c150 = arith.constant 150 : index
    %44 = vector.load %arg21[%c0_36, %c150] : memref<80x151xf32, #tpu.memory_space<vmem>>, vector<2x1xf32>
    tpu.vector_store %arg21[%c0_36, %c150], %43 {strides = array<i32>} : memref<80x151xf32, #tpu.memory_space<vmem>>, vector<2x1xf32>,
    %c0_37 = arith.constant 0 : index
    %c30 = arith.constant 30 : index
    %45 = vector.load %arg2[%c0_37, %c30] : memref<2x300xf32, #tpu.memory_space<vmem>>, vector<2x30xf32>
    %c0_38 = arith.constant 0 : index
    %c0_39 = arith.constant 0 : index
    %46 = vector.load %arg6[%c0_38, %c0_39] : memref<30x150xf32, #tpu.memory_space<vmem>>, vector<30x150xf32>
    %cst_40 = arith.constant dense<0.000000e+00> : vector<2x150xf32>
    %47 = tpu.matmul %45, %46, %cst_40 {dimension_numbers = #tpu.dot_dimension_numbers<[1], [0], [0], [1], [0, 0, 1, 1], [], []>} : vector<2x30xf32>, vector<30x150xf32>, vector<2x150xf32> -> vector<2x150xf32>
    %c0_41 = arith.constant 0 : index
    %c0_42 = arith.constant 0 : index
    %48 = vector.load %arg7[%c0_41, %c0_42] : memref<1x150xf32, #tpu.memory_space<vmem>>, vector<1x150xf32>
    %49 = vector.broadcast %48 : vector<1x150xf32> to vector<2x150xf32>
    %50 = arith.addf %47, %49 : vector<2x150xf32>
    %c8 = arith.constant 8 : index
    %c0_43 = arith.constant 0 : index
    %51 = vector.load %arg21[%c8, %c0_43] : memref<80x151xf32, #tpu.memory_space<vmem>>, vector<2x150xf32>
    tpu.vector_store %arg21[%c8, %c0_43], %50 {strides = array<i32>} : memref<80x151xf32, #tpu.memory_space<vmem>>, vector<2x150xf32>,
    %52 = vector.extract_strided_slice %35 {offsets = [0, 1], sizes = [2, 1], strides = [1, 1]} : vector<2x10xf32> to vector<2x1xf32>
    %c8_44 = arith.constant 8 : index
    %c150_45 = arith.constant 150 : index
    %53 = vector.load %arg21[%c8_44, %c150_45] : memref<80x151xf32, #tpu.memory_space<vmem>>, vector<2x1xf32>
    tpu.vector_store %arg21[%c8_44, %c150_45], %52 {strides = array<i32>} : memref<80x151xf32, #tpu.memory_space<vmem>>, vector<2x1xf32>,
    %c0_46 = arith.constant 0 : index
    %c60 = arith.constant 60 : index
    %54 = vector.load %arg2[%c0_46, %c60] : memref<2x300xf32, #tpu.memory_space<vmem>>, vector<2x30xf32>
    %c0_47 = arith.constant 0 : index
    %c0_48 = arith.constant 0 : index
    %55 = vector.load %arg6[%c0_47, %c0_48] : memref<30x150xf32, #tpu.memory_space<vmem>>, vector<30x150xf32>
    %cst_49 = arith.constant dense<0.000000e+00> : vector<2x150xf32>
    %56 = tpu.matmul %54, %55, %cst_49 {dimension_numbers = #tpu.dot_dimension_numbers<[1], [0], [0], [1], [0, 0, 1, 1], [], []>} : vector<2x30xf32>, vector<30x150xf32>, vector<2x150xf32> -> vector<2x150xf32>
    %c0_50 = arith.constant 0 : index
    %c0_51 = arith.constant 0 : index
    %57 = vector.load %arg7[%c0_50, %c0_51] : memref<1x150xf32, #tpu.memory_space<vmem>>, vector<1x150xf32>
    %58 = vector.broadcast %57 : vector<1x150xf32> to vector<2x150xf32>
    %59 = arith.addf %56, %58 : vector<2x150xf32>
    %c16 = arith.constant 16 : index
    %c0_52 = arith.constant 0 : index
    %60 = vector.load %arg21[%c16, %c0_52] : memref<80x151xf32, #tpu.memory_space<vmem>>, vector<2x150xf32>
    tpu.vector_store %arg21[%c16, %c0_52], %59 {strides = array<i32>} : memref<80x151xf32, #tpu.memory_space<vmem>>, vector<2x150xf32>,
    %61 = vector.extract_strided_slice %35 {offsets = [0, 2], sizes = [2, 1], strides = [1, 1]} : vector<2x10xf32> to vector<2x1xf32>
    %c16_53 = arith.constant 16 : index
    %c150_54 = arith.constant 150 : index
    %62 = vector.load %arg21[%c16_53, %c150_54] : memref<80x151xf32, #tpu.memory_space<vmem>>, vector<2x1xf32>
    tpu.vector_store %arg21[%c16_53, %c150_54], %61 {strides = array<i32>} : memref<80x151xf32, #tpu.memory_space<vmem>>, vector<2x1xf32>,
    %c0_55 = arith.constant 0 : index
    %c90 = arith.constant 90 : index
    %63 = vector.load %arg2[%c0_55, %c90] : memref<2x300xf32, #tpu.memory_space<vmem>>, vector<2x30xf32>
    %c0_56 = arith.constant 0 : index
    %c0_57 = arith.constant 0 : index
    %64 = vector.load %arg6[%c0_56, %c0_57] : memref<30x150xf32, #tpu.memory_space<vmem>>, vector<30x150xf32>
    %cst_58 = arith.constant dense<0.000000e+00> : vector<2x150xf32>
    %65 = tpu.matmul %63, %64, %cst_58 {dimension_numbers = #tpu.dot_dimension_numbers<[1], [0], [0], [1], [0, 0, 1, 1], [], []>} : vector<2x30xf32>, vector<30x150xf32>, vector<2x150xf32> -> vector<2x150xf32>
    %c0_59 = arith.constant 0 : index
    %c0_60 = arith.constant 0 : index
    %66 = vector.load %arg7[%c0_59, %c0_60] : memref<1x150xf32, #tpu.memory_space<vmem>>, vector<1x150xf32>
    %67 = vector.broadcast %66 : vector<1x150xf32> to vector<2x150xf32>
    %68 = arith.addf %65, %67 : vector<2x150xf32>
    %c24 = arith.constant 24 : index
    %c0_61 = arith.constant 0 : index
    %69 = vector.load %arg21[%c24, %c0_61] : memref<80x151xf32, #tpu.memory_space<vmem>>, vector<2x150xf32>
    tpu.vector_store %arg21[%c24, %c0_61], %68 {strides = array<i32>} : memref<80x151xf32, #tpu.memory_space<vmem>>, vector<2x150xf32>,
    %70 = vector.extract_strided_slice %35 {offsets = [0, 3], sizes = [2, 1], strides = [1, 1]} : vector<2x10xf32> to vector<2x1xf32>
    %c24_62 = arith.constant 24 : index
    %c150_63 = arith.constant 150 : index
    %71 = vector.load %arg21[%c24_62, %c150_63] : memref<80x151xf32, #tpu.memory_space<vmem>>, vector<2x1xf32>
    tpu.vector_store %arg21[%c24_62, %c150_63], %70 {strides = array<i32>} : memref<80x151xf32, #tpu.memory_space<vmem>>, vector<2x1xf32>,
    %c0_64 = arith.constant 0 : index
    %c120 = arith.constant 120 : index
    %72 = vector.load %arg2[%c0_64, %c120] : memref<2x300xf32, #tpu.memory_space<vmem>>, vector<2x30xf32>
    %c0_65 = arith.constant 0 : index
    %c0_66 = arith.constant 0 : index
    %73 = vector.load %arg6[%c0_65, %c0_66] : memref<30x150xf32, #tpu.memory_space<vmem>>, vector<30x150xf32>
    %cst_67 = arith.constant dense<0.000000e+00> : vector<2x150xf32>
    %74 = tpu.matmul %72, %73, %cst_67 {dimension_numbers = #tpu.dot_dimension_numbers<[1], [0], [0], [1], [0, 0, 1, 1], [], []>} : vector<2x30xf32>, vector<30x150xf32>, vector<2x150xf32> -> vector<2x150xf32>
    %c0_68 = arith.constant 0 : index
    %c0_69 = arith.constant 0 : index
    %75 = vector.load %arg7[%c0_68, %c0_69] : memref<1x150xf32, #tpu.memory_space<vmem>>, vector<1x150xf32>
    %76 = vector.broadcast %75 : vector<1x150xf32> to vector<2x150xf32>
    %77 = arith.addf %74, %76 : vector<2x150xf32>
    %c32 = arith.constant 32 : index
    %c0_70 = arith.constant 0 : index
    %78 = vector.load %arg21[%c32, %c0_70] : memref<80x151xf32, #tpu.memory_space<vmem>>, vector<2x150xf32>
    tpu.vector_store %arg21[%c32, %c0_70], %77 {strides = array<i32>} : memref<80x151xf32, #tpu.memory_space<vmem>>, vector<2x150xf32>,
    %79 = vector.extract_strided_slice %35 {offsets = [0, 4], sizes = [2, 1], strides = [1, 1]} : vector<2x10xf32> to vector<2x1xf32>
    %c32_71 = arith.constant 32 : index
    %c150_72 = arith.constant 150 : index
    %80 = vector.load %arg21[%c32_71, %c150_72] : memref<80x151xf32, #tpu.memory_space<vmem>>, vector<2x1xf32>
    tpu.vector_store %arg21[%c32_71, %c150_72], %79 {strides = array<i32>} : memref<80x151xf32, #tpu.memory_space<vmem>>, vector<2x1xf32>,
    %c0_73 = arith.constant 0 : index
    %c150_74 = arith.constant 150 : index
    %81 = vector.load %arg2[%c0_73, %c150_74] : memref<2x300xf32, #tpu.memory_space<vmem>>, vector<2x30xf32>
    %c0_75 = arith.constant 0 : index
    %c0_76 = arith.constant 0 : index
    %82 = vector.load %arg6[%c0_75, %c0_76] : memref<30x150xf32, #tpu.memory_space<vmem>>, vector<30x150xf32>
    %cst_77 = arith.constant dense<0.000000e+00> : vector<2x150xf32>
    %83 = tpu.matmul %81, %82, %cst_77 {dimension_numbers = #tpu.dot_dimension_numbers<[1], [0], [0], [1], [0, 0, 1, 1], [], []>} : vector<2x30xf32>, vector<30x150xf32>, vector<2x150xf32> -> vector<2x150xf32>
    %c0_78 = arith.constant 0 : index
    %c0_79 = arith.constant 0 : index
    %84 = vector.load %arg7[%c0_78, %c0_79] : memref<1x150xf32, #tpu.memory_space<vmem>>, vector<1x150xf32>
    %85 = vector.broadcast %84 : vector<1x150xf32> to vector<2x150xf32>
    %86 = arith.addf %83, %85 : vector<2x150xf32>
    %c40 = arith.constant 40 : index
    %c0_80 = arith.constant 0 : index
    %87 = vector.load %arg21[%c40, %c0_80] : memref<80x151xf32, #tpu.memory_space<vmem>>, vector<2x150xf32>
    tpu.vector_store %arg21[%c40, %c0_80], %86 {strides = array<i32>} : memref<80x151xf32, #tpu.memory_space<vmem>>, vector<2x150xf32>,
    %88 = vector.extract_strided_slice %35 {offsets = [0, 5], sizes = [2, 1], strides = [1, 1]} : vector<2x10xf32> to vector<2x1xf32>
    %c40_81 = arith.constant 40 : index
    %c150_82 = arith.constant 150 : index
    %89 = vector.load %arg21[%c40_81, %c150_82] : memref<80x151xf32, #tpu.memory_space<vmem>>, vector<2x1xf32>
    tpu.vector_store %arg21[%c40_81, %c150_82], %88 {strides = array<i32>} : memref<80x151xf32, #tpu.memory_space<vmem>>, vector<2x1xf32>,
    %c0_83 = arith.constant 0 : index
    %c180 = arith.constant 180 : index
    %90 = vector.load %arg2[%c0_83, %c180] : memref<2x300xf32, #tpu.memory_space<vmem>>, vector<2x30xf32>
    %c0_84 = arith.constant 0 : index
    %c0_85 = arith.constant 0 : index
    %91 = vector.load %arg6[%c0_84, %c0_85] : memref<30x150xf32, #tpu.memory_space<vmem>>, vector<30x150xf32>
    %cst_86 = arith.constant dense<0.000000e+00> : vector<2x150xf32>
    %92 = tpu.matmul %90, %91, %cst_86 {dimension_numbers = #tpu.dot_dimension_numbers<[1], [0], [0], [1], [0, 0, 1, 1], [], []>} : vector<2x30xf32>, vector<30x150xf32>, vector<2x150xf32> -> vector<2x150xf32>
    %c0_87 = arith.constant 0 : index
    %c0_88 = arith.constant 0 : index
    %93 = vector.load %arg7[%c0_87, %c0_88] : memref<1x150xf32, #tpu.memory_space<vmem>>, vector<1x150xf32>
    %94 = vector.broadcast %93 : vector<1x150xf32> to vector<2x150xf32>
    %95 = arith.addf %92, %94 : vector<2x150xf32>
    %c48 = arith.constant 48 : index
    %c0_89 = arith.constant 0 : index
    %96 = vector.load %arg21[%c48, %c0_89] : memref<80x151xf32, #tpu.memory_space<vmem>>, vector<2x150xf32>
    tpu.vector_store %arg21[%c48, %c0_89], %95 {strides = array<i32>} : memref<80x151xf32, #tpu.memory_space<vmem>>, vector<2x150xf32>,
    %97 = vector.extract_strided_slice %35 {offsets = [0, 6], sizes = [2, 1], strides = [1, 1]} : vector<2x10xf32> to vector<2x1xf32>
    %c48_90 = arith.constant 48 : index
    %c150_91 = arith.constant 150 : index
    %98 = vector.load %arg21[%c48_90, %c150_91] : memref<80x151xf32, #tpu.memory_space<vmem>>, vector<2x1xf32>
    tpu.vector_store %arg21[%c48_90, %c150_91], %97 {strides = array<i32>} : memref<80x151xf32, #tpu.memory_space<vmem>>, vector<2x1xf32>,
    %c0_92 = arith.constant 0 : index
    %c210 = arith.constant 210 : index
    %99 = vector.load %arg2[%c0_92, %c210] : memref<2x300xf32, #tpu.memory_space<vmem>>, vector<2x30xf32>
    %c0_93 = arith.constant 0 : index
    %c0_94 = arith.constant 0 : index
    %100 = vector.load %arg6[%c0_93, %c0_94] : memref<30x150xf32, #tpu.memory_space<vmem>>, vector<30x150xf32>
    %cst_95 = arith.constant dense<0.000000e+00> : vector<2x150xf32>
    %101 = tpu.matmul %99, %100, %cst_95 {dimension_numbers = #tpu.dot_dimension_numbers<[1], [0], [0], [1], [0, 0, 1, 1], [], []>} : vector<2x30xf32>, vector<30x150xf32>, vector<2x150xf32> -> vector<2x150xf32>
    %c0_96 = arith.constant 0 : index
    %c0_97 = arith.constant 0 : index
    %102 = vector.load %arg7[%c0_96, %c0_97] : memref<1x150xf32, #tpu.memory_space<vmem>>, vector<1x150xf32>
    %103 = vector.broadcast %102 : vector<1x150xf32> to vector<2x150xf32>
    %104 = arith.addf %101, %103 : vector<2x150xf32>
    %c56 = arith.constant 56 : index
    %c0_98 = arith.constant 0 : index
    %105 = vector.load %arg21[%c56, %c0_98] : memref<80x151xf32, #tpu.memory_space<vmem>>, vector<2x150xf32>
    tpu.vector_store %arg21[%c56, %c0_98], %104 {strides = array<i32>} : memref<80x151xf32, #tpu.memory_space<vmem>>, vector<2x150xf32>,
    %106 = vector.extract_strided_slice %35 {offsets = [0, 7], sizes = [2, 1], strides = [1, 1]} : vector<2x10xf32> to vector<2x1xf32>
    %c56_99 = arith.constant 56 : index
    %c150_100 = arith.constant 150 : index
    %107 = vector.load %arg21[%c56_99, %c150_100] : memref<80x151xf32, #tpu.memory_space<vmem>>, vector<2x1xf32>
    tpu.vector_store %arg21[%c56_99, %c150_100], %106 {strides = array<i32>} : memref<80x151xf32, #tpu.memory_space<vmem>>, vector<2x1xf32>,
    %c0_101 = arith.constant 0 : index
    %c240 = arith.constant 240 : index
    %108 = vector.load %arg2[%c0_101, %c240] : memref<2x300xf32, #tpu.memory_space<vmem>>, vector<2x30xf32>
    %c0_102 = arith.constant 0 : index
    %c0_103 = arith.constant 0 : index
    %109 = vector.load %arg6[%c0_102, %c0_103] : memref<30x150xf32, #tpu.memory_space<vmem>>, vector<30x150xf32>
    %cst_104 = arith.constant dense<0.000000e+00> : vector<2x150xf32>
    %110 = tpu.matmul %108, %109, %cst_104 {dimension_numbers = #tpu.dot_dimension_numbers<[1], [0], [0], [1], [0, 0, 1, 1], [], []>} : vector<2x30xf32>, vector<30x150xf32>, vector<2x150xf32> -> vector<2x150xf32>
    %c0_105 = arith.constant 0 : index
    %c0_106 = arith.constant 0 : index
    %111 = vector.load %arg7[%c0_105, %c0_106] : memref<1x150xf32, #tpu.memory_space<vmem>>, vector<1x150xf32>
    %112 = vector.broadcast %111 : vector<1x150xf32> to vector<2x150xf32>
    %113 = arith.addf %110, %112 : vector<2x150xf32>
    %c64 = arith.constant 64 : index
    %c0_107 = arith.constant 0 : index
    %114 = vector.load %arg21[%c64, %c0_107] : memref<80x151xf32, #tpu.memory_space<vmem>>, vector<2x150xf32>
    tpu.vector_store %arg21[%c64, %c0_107], %113 {strides = array<i32>} : memref<80x151xf32, #tpu.memory_space<vmem>>, vector<2x150xf32>,
    %115 = vector.extract_strided_slice %35 {offsets = [0, 8], sizes = [2, 1], strides = [1, 1]} : vector<2x10xf32> to vector<2x1xf32>
    %c64_108 = arith.constant 64 : index
    %c150_109 = arith.constant 150 : index
    %116 = vector.load %arg21[%c64_108, %c150_109] : memref<80x151xf32, #tpu.memory_space<vmem>>, vector<2x1xf32>
    tpu.vector_store %arg21[%c64_108, %c150_109], %115 {strides = array<i32>} : memref<80x151xf32, #tpu.memory_space<vmem>>, vector<2x1xf32>,
    %c0_110 = arith.constant 0 : index
    %c270 = arith.constant 270 : index
    %117 = vector.load %arg2[%c0_110, %c270] : memref<2x300xf32, #tpu.memory_space<vmem>>, vector<2x30xf32>
    %c0_111 = arith.constant 0 : index
    %c0_112 = arith.constant 0 : index
    %118 = vector.load %arg6[%c0_111, %c0_112] : memref<30x150xf32, #tpu.memory_space<vmem>>, vector<30x150xf32>
    %cst_113 = arith.constant dense<0.000000e+00> : vector<2x150xf32>
    %119 = tpu.matmul %117, %118, %cst_113 {dimension_numbers = #tpu.dot_dimension_numbers<[1], [0], [0], [1], [0, 0, 1, 1], [], []>} : vector<2x30xf32>, vector<30x150xf32>, vector<2x150xf32> -> vector<2x150xf32>
    %c0_114 = arith.constant 0 : index
    %c0_115 = arith.constant 0 : index
    %120 = vector.load %arg7[%c0_114, %c0_115] : memref<1x150xf32, #tpu.memory_space<vmem>>, vector<1x150xf32>
    %121 = vector.broadcast %120 : vector<1x150xf32> to vector<2x150xf32>
    %122 = arith.addf %119, %121 : vector<2x150xf32>
    %c72 = arith.constant 72 : index
    %c0_116 = arith.constant 0 : index
    %123 = vector.load %arg21[%c72, %c0_116] : memref<80x151xf32, #tpu.memory_space<vmem>>, vector<2x150xf32>
    tpu.vector_store %arg21[%c72, %c0_116], %122 {strides = array<i32>} : memref<80x151xf32, #tpu.memory_space<vmem>>, vector<2x150xf32>,
    %124 = vector.extract_strided_slice %35 {offsets = [0, 9], sizes = [2, 1], strides = [1, 1]} : vector<2x10xf32> to vector<2x1xf32>
    %c72_117 = arith.constant 72 : index
    %c150_118 = arith.constant 150 : index
    %125 = vector.load %arg21[%c72_117, %c150_118] : memref<80x151xf32, #tpu.memory_space<vmem>>, vector<2x1xf32>
    tpu.vector_store %arg21[%c72_117, %c150_118], %124 {strides = array<i32>} : memref<80x151xf32, #tpu.memory_space<vmem>>, vector<2x1xf32>,
    %c0_119 = arith.constant 0 : index
    %c0_120 = arith.constant 0 : index
    %126 = vector.load %arg21[%c0_119, %c0_120] : memref<80x151xf32, #tpu.memory_space<vmem>>, vector<80x151xf32>
    %c0_121 = arith.constant 0 : index
    %c0_122 = arith.constant 0 : index
    %127 = vector.load %arg14[%c0_121, %c0_122] : memref<151x151xf32, #tpu.memory_space<vmem>>, vector<151x151xf32>
    %cst_123 = arith.constant dense<0.000000e+00> : vector<80x151xf32>
    %128 = tpu.matmul %126, %127, %cst_123 {dimension_numbers = #tpu.dot_dimension_numbers<[1], [0], [0], [1], [0, 0, 1, 1], [], []>} : vector<80x151xf32>, vector<151x151xf32>, vector<80x151xf32> -> vector<80x151xf32>
    %c0_124 = arith.constant 0 : index
    %c0_125 = arith.constant 0 : index
    %129 = vector.load %arg15[%c0_124, %c0_125] : memref<1x151xf32, #tpu.memory_space<vmem>>, vector<1x151xf32>
    %130 = vector.broadcast %129 : vector<1x151xf32> to vector<80x151xf32>
    %131 = arith.addf %128, %130 : vector<80x151xf32>
    %cst_126 = arith.constant 0.000000e+00 : f32
    %132 = vector.broadcast %cst_126 : f32 to vector<80x151xf32>
    %133 = arith.maximumf %131, %132 : vector<80x151xf32>
    %c0_127 = arith.constant 0 : index
    %c0_128 = arith.constant 0 : index
    %134 = vector.load %arg16[%c0_127, %c0_128] : memref<151x151xf32, #tpu.memory_space<vmem>>, vector<151x151xf32>
    %cst_129 = arith.constant dense<0.000000e+00> : vector<80x151xf32>
    %135 = tpu.matmul %133, %134, %cst_129 {dimension_numbers = #tpu.dot_dimension_numbers<[1], [0], [0], [1], [0, 0, 1, 1], [], []>} : vector<80x151xf32>, vector<151x151xf32>, vector<80x151xf32> -> vector<80x151xf32>
    %c0_130 = arith.constant 0 : index
    %c0_131 = arith.constant 0 : index
    %136 = vector.load %arg17[%c0_130, %c0_131] : memref<1x151xf32, #tpu.memory_space<vmem>>, vector<1x151xf32>
    %137 = vector.broadcast %136 : vector<1x151xf32> to vector<80x151xf32>
    %138 = arith.addf %135, %137 : vector<80x151xf32>
    %cst_132 = arith.constant 0.000000e+00 : f32
    %139 = vector.broadcast %cst_132 : f32 to vector<80x151xf32>
    %140 = arith.maximumf %138, %139 : vector<80x151xf32>
    %c0_133 = arith.constant 0 : index
    %c0_134 = arith.constant 0 : index
    %141 = vector.load %arg18[%c0_133, %c0_134] : memref<151x12xf32, #tpu.memory_space<vmem>>, vector<151x12xf32>
    %cst_135 = arith.constant dense<0.000000e+00> : vector<80x12xf32>
    %142 = tpu.matmul %140, %141, %cst_135 {dimension_numbers = #tpu.dot_dimension_numbers<[1], [0], [0], [1], [0, 0, 1, 1], [], []>} : vector<80x151xf32>, vector<151x12xf32>, vector<80x12xf32> -> vector<80x12xf32>
    %c0_136 = arith.constant 0 : index
    %c0_137 = arith.constant 0 : index
    %143 = vector.load %arg19[%c0_136, %c0_137] : memref<1x12xf32, #tpu.memory_space<vmem>>, vector<1x12xf32>
    %144 = vector.broadcast %143 : vector<1x12xf32> to vector<80x12xf32>
    %145 = arith.addf %142, %144 : vector<80x12xf32>
    %cst_138 = arith.constant dense<0xFF800000> : vector<80xf32>
    %146 = vector.multi_reduction <maximumf>, %145, %cst_138 [1] : vector<80x12xf32> to vector<80xf32>
    %147 = vector.shape_cast %146 : vector<80xf32> to vector<80x1xf32>
    %148 = vector.broadcast %147 : vector<80x1xf32> to vector<80x12xf32>
    %149 = arith.subf %145, %148 : vector<80x12xf32>
    %150 = math.exp %149 : vector<80x12xf32>
    %cst_139 = arith.constant dense<0.000000e+00> : vector<80xf32>
    %151 = vector.multi_reduction <add>, %150, %cst_139 [1] : vector<80x12xf32> to vector<80xf32>
    %152 = vector.shape_cast %151 : vector<80xf32> to vector<80x1xf32>
    %153 = vector.broadcast %152 : vector<80x1xf32> to vector<80x12xf32>
    %154 = arith.divf %150, %153 : vector<80x12xf32>
    %155 = vector.extract_strided_slice %154 {offsets = [0, 0], sizes = [2, 12], strides = [1, 1]} : vector<80x12xf32> to vector<2x12xf32>
    %c0_140 = arith.constant 0 : index
    %c0_141 = arith.constant 0 : index
    %156 = vector.load %arg3[%c0_140, %c0_141] : memref<2x120xf32, #tpu.memory_space<vmem>>, vector<2x12xf32>
    %157 = arith.mulf %155, %156 : vector<2x12xf32>
    %cst_142 = arith.constant dense<0.000000e+00> : vector<2xf32>
    %158 = vector.multi_reduction <add>, %157, %cst_142 [1] : vector<2x12xf32> to vector<2xf32>
    %159 = vector.shape_cast %158 : vector<2xf32> to vector<2x1xf32>
    %cst_143 = arith.constant 1.000000e-07 : f32
    %160 = vector.broadcast %cst_143 : f32 to vector<2x1xf32>
    %161 = arith.addf %159, %160 : vector<2x1xf32>
    %162 = vector.extract_strided_slice %35 {offsets = [0, 0], sizes = [2, 1], strides = [1, 1]} : vector<2x10xf32> to vector<2x1xf32>
    %163 = arith.divf %162, %161 : vector<2x1xf32>
    %164 = vector.broadcast %163 : vector<2x1xf32> to vector<2x12xf32>
    %165 = arith.mulf %157, %164 : vector<2x12xf32>
    %c0_144 = arith.constant 0 : index
    %c0_145 = arith.constant 0 : index
    %166 = vector.load %arg20[%c0_144, %c0_145] : memref<2x120xf32, #tpu.memory_space<vmem>>, vector<2x12xf32>
    tpu.vector_store %arg20[%c0_144, %c0_145], %165 {strides = array<i32>} : memref<2x120xf32, #tpu.memory_space<vmem>>, vector<2x12xf32>,
    %167 = vector.extract_strided_slice %154 {offsets = [8, 0], sizes = [2, 12], strides = [1, 1]} : vector<80x12xf32> to vector<2x12xf32>
    %c0_146 = arith.constant 0 : index
    %c12 = arith.constant 12 : index
    %168 = vector.load %arg3[%c0_146, %c12] : memref<2x120xf32, #tpu.memory_space<vmem>>, vector<2x12xf32>
    %169 = arith.mulf %167, %168 : vector<2x12xf32>
    %cst_147 = arith.constant dense<0.000000e+00> : vector<2xf32>
    %170 = vector.multi_reduction <add>, %169, %cst_147 [1] : vector<2x12xf32> to vector<2xf32>
    %171 = vector.shape_cast %170 : vector<2xf32> to vector<2x1xf32>
    %cst_148 = arith.constant 1.000000e-07 : f32
    %172 = vector.broadcast %cst_148 : f32 to vector<2x1xf32>
    %173 = arith.addf %171, %172 : vector<2x1xf32>
    %174 = vector.extract_strided_slice %35 {offsets = [0, 1], sizes = [2, 1], strides = [1, 1]} : vector<2x10xf32> to vector<2x1xf32>
    %175 = arith.divf %174, %173 : vector<2x1xf32>
    %176 = vector.broadcast %175 : vector<2x1xf32> to vector<2x12xf32>
    %177 = arith.mulf %169, %176 : vector<2x12xf32>
    %c0_149 = arith.constant 0 : index
    %c12_150 = arith.constant 12 : index
    %178 = vector.load %arg20[%c0_149, %c12_150] : memref<2x120xf32, #tpu.memory_space<vmem>>, vector<2x12xf32>
    tpu.vector_store %arg20[%c0_149, %c12_150], %177 {strides = array<i32>} : memref<2x120xf32, #tpu.memory_space<vmem>>, vector<2x12xf32>,
    %179 = vector.extract_strided_slice %154 {offsets = [16, 0], sizes = [2, 12], strides = [1, 1]} : vector<80x12xf32> to vector<2x12xf32>
    %c0_151 = arith.constant 0 : index
    %c24_152 = arith.constant 24 : index
    %180 = vector.load %arg3[%c0_151, %c24_152] : memref<2x120xf32, #tpu.memory_space<vmem>>, vector<2x12xf32>
    %181 = arith.mulf %179, %180 : vector<2x12xf32>
    %cst_153 = arith.constant dense<0.000000e+00> : vector<2xf32>
    %182 = vector.multi_reduction <add>, %181, %cst_153 [1] : vector<2x12xf32> to vector<2xf32>
    %183 = vector.shape_cast %182 : vector<2xf32> to vector<2x1xf32>
    %cst_154 = arith.constant 1.000000e-07 : f32
    %184 = vector.broadcast %cst_154 : f32 to vector<2x1xf32>
    %185 = arith.addf %183, %184 : vector<2x1xf32>
    %186 = vector.extract_strided_slice %35 {offsets = [0, 2], sizes = [2, 1], strides = [1, 1]} : vector<2x10xf32> to vector<2x1xf32>
    %187 = arith.divf %186, %185 : vector<2x1xf32>
    %188 = vector.broadcast %187 : vector<2x1xf32> to vector<2x12xf32>
    %189 = arith.mulf %181, %188 : vector<2x12xf32>
    %c0_155 = arith.constant 0 : index
    %c24_156 = arith.constant 24 : index
    %190 = vector.load %arg20[%c0_155, %c24_156] : memref<2x120xf32, #tpu.memory_space<vmem>>, vector<2x12xf32>
    tpu.vector_store %arg20[%c0_155, %c24_156], %189 {strides = array<i32>} : memref<2x120xf32, #tpu.memory_space<vmem>>, vector<2x12xf32>,
    %191 = vector.extract_strided_slice %154 {offsets = [24, 0], sizes = [2, 12], strides = [1, 1]} : vector<80x12xf32> to vector<2x12xf32>
    %c0_157 = arith.constant 0 : index
    %c36 = arith.constant 36 : index
    %192 = vector.load %arg3[%c0_157, %c36] : memref<2x120xf32, #tpu.memory_space<vmem>>, vector<2x12xf32>
    %193 = arith.mulf %191, %192 : vector<2x12xf32>
    %cst_158 = arith.constant dense<0.000000e+00> : vector<2xf32>
    %194 = vector.multi_reduction <add>, %193, %cst_158 [1] : vector<2x12xf32> to vector<2xf32>
    %195 = vector.shape_cast %194 : vector<2xf32> to vector<2x1xf32>
    %cst_159 = arith.constant 1.000000e-07 : f32
    %196 = vector.broadcast %cst_159 : f32 to vector<2x1xf32>
    %197 = arith.addf %195, %196 : vector<2x1xf32>
    %198 = vector.extract_strided_slice %35 {offsets = [0, 3], sizes = [2, 1], strides = [1, 1]} : vector<2x10xf32> to vector<2x1xf32>
    %199 = arith.divf %198, %197 : vector<2x1xf32>
    %200 = vector.broadcast %199 : vector<2x1xf32> to vector<2x12xf32>
    %201 = arith.mulf %193, %200 : vector<2x12xf32>
    %c0_160 = arith.constant 0 : index
    %c36_161 = arith.constant 36 : index
    %202 = vector.load %arg20[%c0_160, %c36_161] : memref<2x120xf32, #tpu.memory_space<vmem>>, vector<2x12xf32>
    tpu.vector_store %arg20[%c0_160, %c36_161], %201 {strides = array<i32>} : memref<2x120xf32, #tpu.memory_space<vmem>>, vector<2x12xf32>,
    %203 = vector.extract_strided_slice %154 {offsets = [32, 0], sizes = [2, 12], strides = [1, 1]} : vector<80x12xf32> to vector<2x12xf32>
    %c0_162 = arith.constant 0 : index
    %c48_163 = arith.constant 48 : index
    %204 = vector.load %arg3[%c0_162, %c48_163] : memref<2x120xf32, #tpu.memory_space<vmem>>, vector<2x12xf32>
    %205 = arith.mulf %203, %204 : vector<2x12xf32>
    %cst_164 = arith.constant dense<0.000000e+00> : vector<2xf32>
    %206 = vector.multi_reduction <add>, %205, %cst_164 [1] : vector<2x12xf32> to vector<2xf32>
    %207 = vector.shape_cast %206 : vector<2xf32> to vector<2x1xf32>
    %cst_165 = arith.constant 1.000000e-07 : f32
    %208 = vector.broadcast %cst_165 : f32 to vector<2x1xf32>
    %209 = arith.addf %207, %208 : vector<2x1xf32>
    %210 = vector.extract_strided_slice %35 {offsets = [0, 4], sizes = [2, 1], strides = [1, 1]} : vector<2x10xf32> to vector<2x1xf32>
    %211 = arith.divf %210, %209 : vector<2x1xf32>
    %212 = vector.broadcast %211 : vector<2x1xf32> to vector<2x12xf32>
    %213 = arith.mulf %205, %212 : vector<2x12xf32>
    %c0_166 = arith.constant 0 : index
    %c48_167 = arith.constant 48 : index
    %214 = vector.load %arg20[%c0_166, %c48_167] : memref<2x120xf32, #tpu.memory_space<vmem>>, vector<2x12xf32>
    tpu.vector_store %arg20[%c0_166, %c48_167], %213 {strides = array<i32>} : memref<2x120xf32, #tpu.memory_space<vmem>>, vector<2x12xf32>,
    %215 = vector.extract_strided_slice %154 {offsets = [40, 0], sizes = [2, 12], strides = [1, 1]} : vector<80x12xf32> to vector<2x12xf32>
    %c0_168 = arith.constant 0 : index
    %c60_169 = arith.constant 60 : index
    %216 = vector.load %arg3[%c0_168, %c60_169] : memref<2x120xf32, #tpu.memory_space<vmem>>, vector<2x12xf32>
    %217 = arith.mulf %215, %216 : vector<2x12xf32>
    %cst_170 = arith.constant dense<0.000000e+00> : vector<2xf32>
    %218 = vector.multi_reduction <add>, %217, %cst_170 [1] : vector<2x12xf32> to vector<2xf32>
    %219 = vector.shape_cast %218 : vector<2xf32> to vector<2x1xf32>
    %cst_171 = arith.constant 1.000000e-07 : f32
    %220 = vector.broadcast %cst_171 : f32 to vector<2x1xf32>
    %221 = arith.addf %219, %220 : vector<2x1xf32>
    %222 = vector.extract_strided_slice %35 {offsets = [0, 5], sizes = [2, 1], strides = [1, 1]} : vector<2x10xf32> to vector<2x1xf32>
    %223 = arith.divf %222, %221 : vector<2x1xf32>
    %224 = vector.broadcast %223 : vector<2x1xf32> to vector<2x12xf32>
    %225 = arith.mulf %217, %224 : vector<2x12xf32>
    %c0_172 = arith.constant 0 : index
    %c60_173 = arith.constant 60 : index
    %226 = vector.load %arg20[%c0_172, %c60_173] : memref<2x120xf32, #tpu.memory_space<vmem>>, vector<2x12xf32>
    tpu.vector_store %arg20[%c0_172, %c60_173], %225 {strides = array<i32>} : memref<2x120xf32, #tpu.memory_space<vmem>>, vector<2x12xf32>,
    %227 = vector.extract_strided_slice %154 {offsets = [48, 0], sizes = [2, 12], strides = [1, 1]} : vector<80x12xf32> to vector<2x12xf32>
    %c0_174 = arith.constant 0 : index
    %c72_175 = arith.constant 72 : index
    %228 = vector.load %arg3[%c0_174, %c72_175] : memref<2x120xf32, #tpu.memory_space<vmem>>, vector<2x12xf32>
    %229 = arith.mulf %227, %228 : vector<2x12xf32>
    %cst_176 = arith.constant dense<0.000000e+00> : vector<2xf32>
    %230 = vector.multi_reduction <add>, %229, %cst_176 [1] : vector<2x12xf32> to vector<2xf32>
    %231 = vector.shape_cast %230 : vector<2xf32> to vector<2x1xf32>
    %cst_177 = arith.constant 1.000000e-07 : f32
    %232 = vector.broadcast %cst_177 : f32 to vector<2x1xf32>
    %233 = arith.addf %231, %232 : vector<2x1xf32>
    %234 = vector.extract_strided_slice %35 {offsets = [0, 6], sizes = [2, 1], strides = [1, 1]} : vector<2x10xf32> to vector<2x1xf32>
    %235 = arith.divf %234, %233 : vector<2x1xf32>
    %236 = vector.broadcast %235 : vector<2x1xf32> to vector<2x12xf32>
    %237 = arith.mulf %229, %236 : vector<2x12xf32>
    %c0_178 = arith.constant 0 : index
    %c72_179 = arith.constant 72 : index
    %238 = vector.load %arg20[%c0_178, %c72_179] : memref<2x120xf32, #tpu.memory_space<vmem>>, vector<2x12xf32>
    tpu.vector_store %arg20[%c0_178, %c72_179], %237 {strides = array<i32>} : memref<2x120xf32, #tpu.memory_space<vmem>>, vector<2x12xf32>,
    %239 = vector.extract_strided_slice %154 {offsets = [56, 0], sizes = [2, 12], strides = [1, 1]} : vector<80x12xf32> to vector<2x12xf32>
    %c0_180 = arith.constant 0 : index
    %c84 = arith.constant 84 : index
    %240 = vector.load %arg3[%c0_180, %c84] : memref<2x120xf32, #tpu.memory_space<vmem>>, vector<2x12xf32>
    %241 = arith.mulf %239, %240 : vector<2x12xf32>
    %cst_181 = arith.constant dense<0.000000e+00> : vector<2xf32>
    %242 = vector.multi_reduction <add>, %241, %cst_181 [1] : vector<2x12xf32> to vector<2xf32>
    %243 = vector.shape_cast %242 : vector<2xf32> to vector<2x1xf32>
    %cst_182 = arith.constant 1.000000e-07 : f32
    %244 = vector.broadcast %cst_182 : f32 to vector<2x1xf32>
    %245 = arith.addf %243, %244 : vector<2x1xf32>
    %246 = vector.extract_strided_slice %35 {offsets = [0, 7], sizes = [2, 1], strides = [1, 1]} : vector<2x10xf32> to vector<2x1xf32>
    %247 = arith.divf %246, %245 : vector<2x1xf32>
    %248 = vector.broadcast %247 : vector<2x1xf32> to vector<2x12xf32>
    %249 = arith.mulf %241, %248 : vector<2x12xf32>
    %c0_183 = arith.constant 0 : index
    %c84_184 = arith.constant 84 : index
    %250 = vector.load %arg20[%c0_183, %c84_184] : memref<2x120xf32, #tpu.memory_space<vmem>>, vector<2x12xf32>
    tpu.vector_store %arg20[%c0_183, %c84_184], %249 {strides = array<i32>} : memref<2x120xf32, #tpu.memory_space<vmem>>, vector<2x12xf32>,
    %251 = vector.extract_strided_slice %154 {offsets = [64, 0], sizes = [2, 12], strides = [1, 1]} : vector<80x12xf32> to vector<2x12xf32>
    %c0_185 = arith.constant 0 : index
    %c96 = arith.constant 96 : index
    %252 = vector.load %arg3[%c0_185, %c96] : memref<2x120xf32, #tpu.memory_space<vmem>>, vector<2x12xf32>
    %253 = arith.mulf %251, %252 : vector<2x12xf32>
    %cst_186 = arith.constant dense<0.000000e+00> : vector<2xf32>
    %254 = vector.multi_reduction <add>, %253, %cst_186 [1] : vector<2x12xf32> to vector<2xf32>
    %255 = vector.shape_cast %254 : vector<2xf32> to vector<2x1xf32>
    %cst_187 = arith.constant 1.000000e-07 : f32
    %256 = vector.broadcast %cst_187 : f32 to vector<2x1xf32>
    %257 = arith.addf %255, %256 : vector<2x1xf32>
    %258 = vector.extract_strided_slice %35 {offsets = [0, 8], sizes = [2, 1], strides = [1, 1]} : vector<2x10xf32> to vector<2x1xf32>
    %259 = arith.divf %258, %257 : vector<2x1xf32>
    %260 = vector.broadcast %259 : vector<2x1xf32> to vector<2x12xf32>
    %261 = arith.mulf %253, %260 : vector<2x12xf32>
    %c0_188 = arith.constant 0 : index
    %c96_189 = arith.constant 96 : index
    %262 = vector.load %arg20[%c0_188, %c96_189] : memref<2x120xf32, #tpu.memory_space<vmem>>, vector<2x12xf32>
    tpu.vector_store %arg20[%c0_188, %c96_189], %261 {strides = array<i32>} : memref<2x120xf32, #tpu.memory_space<vmem>>, vector<2x12xf32>,
    %263 = vector.extract_strided_slice %154 {offsets = [72, 0], sizes = [2, 12], strides = [1, 1]} : vector<80x12xf32> to vector<2x12xf32>
    %c0_190 = arith.constant 0 : index
    %c108 = arith.constant 108 : index
    %264 = vector.load %arg3[%c0_190, %c108] : memref<2x120xf32, #tpu.memory_space<vmem>>, vector<2x12xf32>
    %265 = arith.mulf %263, %264 : vector<2x12xf32>
    %cst_191 = arith.constant dense<0.000000e+00> : vector<2xf32>
    %266 = vector.multi_reduction <add>, %265, %cst_191 [1] : vector<2x12xf32> to vector<2xf32>
    %267 = vector.shape_cast %266 : vector<2xf32> to vector<2x1xf32>
    %cst_192 = arith.constant 1.000000e-07 : f32
    %268 = vector.broadcast %cst_192 : f32 to vector<2x1xf32>
    %269 = arith.addf %267, %268 : vector<2x1xf32>
    %270 = vector.extract_strided_slice %35 {offsets = [0, 9], sizes = [2, 1], strides = [1, 1]} : vector<2x10xf32> to vector<2x1xf32>
    %271 = arith.divf %270, %269 : vector<2x1xf32>
    %272 = vector.broadcast %271 : vector<2x1xf32> to vector<2x12xf32>
    %273 = arith.mulf %265, %272 : vector<2x12xf32>
    %c0_193 = arith.constant 0 : index
    %c108_194 = arith.constant 108 : index
    %274 = vector.load %arg20[%c0_193, %c108_194] : memref<2x120xf32, #tpu.memory_space<vmem>>, vector<2x12xf32>
    tpu.vector_store %arg20[%c0_193, %c108_194], %273 {strides = array<i32>} : memref<2x120xf32, #tpu.memory_space<vmem>>, vector<2x12xf32>,
    return
  }
  func.func @transform_0(%arg0: i32) -> (i32, i32) {
    %c0_i32 = arith.constant 0 : i32
    %c0_i32_0 = arith.constant 0 : i32
    return %arg0, %c0_i32 : i32, i32
  }
  func.func @transform_1(%arg0: i32) -> (i32, i32) {
    %c0_i32 = arith.constant 0 : i32
    %c0_i32_0 = arith.constant 0 : i32
    return %arg0, %c0_i32 : i32, i32
  }
  func.func @transform_2(%arg0: i32) -> (i32, i32) {
    %c0_i32 = arith.constant 0 : i32
    %c0_i32_0 = arith.constant 0 : i32
    return %arg0, %c0_i32 : i32, i32
  }
  func.func @transform_3(%arg0: i32) -> (i32, i32) {
    %c0_i32 = arith.constant 0 : i32
    %c0_i32_0 = arith.constant 0 : i32
    %c0_i32_1 = arith.constant 0 : i32
    return %c0_i32, %c0_i32_0 : i32, i32
  }
  func.func @transform_4(%arg0: i32) -> (i32, i32) {
    %c0_i32 = arith.constant 0 : i32
    %c0_i32_0 = arith.constant 0 : i32
    %c0_i32_1 = arith.constant 0 : i32
    return %c0_i32, %c0_i32_0 : i32, i32
  }
  func.func @transform_5(%arg0: i32) -> (i32, i32) {
    %c0_i32 = arith.constant 0 : i32
    %c0_i32_0 = arith.constant 0 : i32
    %c0_i32_1 = arith.constant 0 : i32
    return %c0_i32, %c0_i32_0 : i32, i32
  }
  func.func @transform_6(%arg0: i32) -> (i32, i32) {
    %c0_i32 = arith.constant 0 : i32
    %c0_i32_0 = arith.constant 0 : i32
    %c0_i32_1 = arith.constant 0 : i32
    return %c0_i32, %c0_i32_0 : i32, i32
  }
  func.func @transform_7(%arg0: i32) -> (i32, i32) {
    %c0_i32 = arith.constant 0 : i32
    %c0_i32_0 = arith.constant 0 : i32
    %c0_i32_1 = arith.constant 0 : i32
    return %c0_i32, %c0_i32_0 : i32, i32
  }
  func.func @transform_8(%arg0: i32) -> (i32, i32) {
    %c0_i32 = arith.constant 0 : i32
    %c0_i32_0 = arith.constant 0 : i32
    %c0_i32_1 = arith.constant 0 : i32
    return %c0_i32, %c0_i32_0 : i32, i32
  }
  func.func @transform_9(%arg0: i32) -> (i32, i32) {
    %c0_i32 = arith.constant 0 : i32
    %c0_i32_0 = arith.constant 0 : i32
    %c0_i32_1 = arith.constant 0 : i32
    return %c0_i32, %c0_i32_0 : i32, i32
  }
  func.func @transform_10(%arg0: i32) -> (i32, i32) {
    %c0_i32 = arith.constant 0 : i32
    %c0_i32_0 = arith.constant 0 : i32
    %c0_i32_1 = arith.constant 0 : i32
    return %c0_i32, %c0_i32_0 : i32, i32
  }
  func.func @transform_11(%arg0: i32) -> (i32, i32) {
    %c0_i32 = arith.constant 0 : i32
    %c0_i32_0 = arith.constant 0 : i32
    %c0_i32_1 = arith.constant 0 : i32
    return %c0_i32, %c0_i32_0 : i32, i32
  }
  func.func @transform_12(%arg0: i32) -> (i32, i32) {
    %c0_i32 = arith.constant 0 : i32
    %c0_i32_0 = arith.constant 0 : i32
    %c0_i32_1 = arith.constant 0 : i32
    return %c0_i32, %c0_i32_0 : i32, i32
  }
  func.func @transform_13(%arg0: i32) -> (i32, i32) {
    %c0_i32 = arith.constant 0 : i32
    %c0_i32_0 = arith.constant 0 : i32
    %c0_i32_1 = arith.constant 0 : i32
    return %c0_i32, %c0_i32_0 : i32, i32
  }
  func.func @transform_14(%arg0: i32) -> (i32, i32) {
    %c0_i32 = arith.constant 0 : i32
    %c0_i32_0 = arith.constant 0 : i32
    %c0_i32_1 = arith.constant 0 : i32
    return %c0_i32, %c0_i32_0 : i32, i32
  }
  func.func @transform_15(%arg0: i32) -> (i32, i32) {
    %c0_i32 = arith.constant 0 : i32
    %c0_i32_0 = arith.constant 0 : i32
    %c0_i32_1 = arith.constant 0 : i32
    return %c0_i32, %c0_i32_0 : i32, i32
  }
  func.func @transform_16(%arg0: i32) -> (i32, i32) {
    %c0_i32 = arith.constant 0 : i32
    %c0_i32_0 = arith.constant 0 : i32
    %c0_i32_1 = arith.constant 0 : i32
    return %c0_i32, %c0_i32_0 : i32, i32
  }
  func.func @transform_17(%arg0: i32) -> (i32, i32) {
    %c0_i32 = arith.constant 0 : i32
    %c0_i32_0 = arith.constant 0 : i32
    %c0_i32_1 = arith.constant 0 : i32
    return %c0_i32, %c0_i32_0 : i32, i32
  }
  func.func @transform_18(%arg0: i32) -> (i32, i32) {
    %c0_i32 = arith.constant 0 : i32
    %c0_i32_0 = arith.constant 0 : i32
    %c0_i32_1 = arith.constant 0 : i32
    return %c0_i32, %c0_i32_0 : i32, i32
  }
  func.func @transform_19(%arg0: i32) -> (i32, i32) {
    %c0_i32 = arith.constant 0 : i32
    %c0_i32_0 = arith.constant 0 : i32
    return %arg0, %c0_i32 : i32, i32
  }
}

</mosaic_0001>

<bundles_post_ra>
// kernel: forward.1
= control target key start
LH: loop header
LB: loop body
LE: loop exit
PB: predicated region body
PF: predicated region fallthrough
CT: control target
= control target key end

     0   :  { %s5609_s0 = inlined_call_operand.vmem [shape: f32[2,60], index: 0, kind: input, shape index: {}]   ;;  %s5610_s1 = inlined_call_operand.vmem [shape: f32[2,300], index: 1, kind: input, shape index: {}]   ;;  %s5611_s2 = inlined_call_operand.vmem [shape: f32[2,120], index: 2, kind: input, shape index: {}]   ;;  %s5612_s3 = inlined_call_operand.hbm [shape: f32[60,300], index: 3, kind: input, shape index: {}]   ;;  %s5613_s4 = inlined_call_operand.hbm [shape: f32[1,300], index: 4, kind: input, shape index: {}]   ;;  %s5614_s5 = inlined_call_operand.vmem [shape: f32[30,150], index: 5, kind: input, shape index: {}]   ;;  %s5615_s6 = inlined_call_operand.hbm [shape: f32[1,150], index: 6, kind: input, shape index: {}]   ;;  %s5616_s7 = inlined_call_operand.hbm [shape: f32[300,300], index: 7, kind: input, shape index: {}]   ;;  %s5617_s8 = inlined_call_operand.hbm [shape: f32[1,300], index: 8, kind: input, shape index: {}]   ;;  %s5618_s9 = inlined_call_operand.hbm [shape: f32[300,300], index: 9, kind: input, shape index: {}]   ;;  %s5619_s10 = inlined_call_operand.hbm [shape: f32[1,300], index: 10, kind: input, shape index: {}]   ;;  %s5620_s11 = inlined_call_operand.vmem [shape: f32[300,10], index: 11, kind: input, shape index: {}]   ;;  %s5621_s12 = inlined_call_operand.hbm [shape: f32[1,10], index: 12, kind: input, shape index: {}]   ;;  %s5622_s13 = inlined_call_operand.vmem [shape: f32[151,151], index: 13, kind: input, shape index: {}]   ;;  %s5623_s14 = inlined_call_operand.hbm [shape: f32[1,151], index: 14, kind: input, shape index: {}]   ;;  %s5624_s15 = inlined_call_operand.vmem [shape: f32[151,151], index: 15, kind: input, shape index: {}]   ;;  %s5625_s16 = inlined_call_operand.hbm [shape: f32[1,151], index: 16, kind: input, shape index: {}]   ;;  %s5626_s17 = inlined_call_operand.vmem [shape: f32[151,12], index: 17, kind: input, shape index: {}]   ;;  %s5627_s18 = inlined_call_operand.hbm [shape: f32[1,12], index: 18, kind: input, shape index: {}]   ;;  %s5628_s19 = inlined_call_operand.vmem [shape: f32[2,120], index: 19, kind: output, shape index: {}]  }
   0x1   :  { %5631 = sst [smem:[#allocation26_spill]] %s5609_s0 }
   0x2   :  { %5632 = sst [smem:[#allocation27_spill]] %s5610_s1 }
   0x3   :  { %5633 = sst [smem:[#allocation28_spill]] %s5611_s2 }
   0x4   :  { %5634 = sst [smem:[#allocation29_spill]] %s5612_s3 }
   0x5   :  { %24 = vsyncpa [#allocation4], 0 }
   0x6   :  { %25 = vsyncpa [#allocation6], 0 }
   0x7   :  { %26 = vsyncpa [#allocation9], 0 }
   0x8   :  { %27 = vsyncpa [#allocation12], 0 }
   0x9   :  { %28 = vsyncpa [#allocation15], 0 }
   0xa   :  { %29 = vsyncpa [#allocation18], 0  ;;  %s4307_s0 = smov [#allocation5]  }
   0xb   :  { %s54_s30 = sshll.u32 %s4307_s0, 4  ;;  %s55_s30 = int_to_ptr.vmem [resolvable:$true] %s54_s30 }
   0xc   :  { %s4083_s20 = scalar_lea.vmem %s55_s30, 48  ;;  %s4087_s21 = scalar_lea.vmem %s55_s30, 64 }
   0xd   :  { %p4084_p0 = scmp.ne.s32.totalorder %s55_s30, %s4083_s20  ;;  %p4088_p1 = scmp.lt.s32.totalorder %s55_s30, %s55_s30 }
   0xe   :  { %p4089_p2 = scmp.lt.s32.totalorder %s4087_s21, %s4083_s20 }
  0x10   :  { %p4090_p3 = por %p4089_p2, %p4088_p1 }
  0x12   :  { %p4091_p4 = pnand %p4090_p3, %p4084_p0 }
  0x14   :  { %4094 = shalt.err (!%p4091_p4)
}
  0x15   :  { %57 = dma.hbm_to_vmem [thread:$0]  %s5613_s4, 48, %s55_s30, [#allocation6]  }
  0x16   :  { %s4308_s2 = smov [#allocation8]   ;;  %s4309_s24 = smov [#allocation11]  }
  0x17   :  { %s75_s23 = sshll.u32 %s4308_s2, 4  ;;  %s97_s25 = sshll.u32 %s4309_s24, 4  ;;  %s76_s23 = int_to_ptr.vmem [resolvable:$true] %s75_s23  ;;  %s98_s25 = int_to_ptr.vmem [resolvable:$true] %s97_s25 }
  0x18   :  { %s4103_s3 = scalar_lea.vmem %s76_s23, 14592  ;;  %p4108_p6 = scmp.lt.s32.totalorder %s76_s23, %s76_s23 }
  0x19   :  { %p4104_p5 = scmp.ne.s32.totalorder %s76_s23, %s4103_s3  ;;  %p4109_p7 = scmp.lt.s32.totalorder %s4103_s3, %s4103_s3 }
  0x1b   :  { %p4110_p8 = por %p4109_p7, %p4108_p6 }
  0x1d   :  { %p4111_p9 = pnand %p4110_p8, %p4104_p5 }
  0x1f   :  { %4114 = shalt.err (!%p4111_p9)
}
  0x20   :  { %s4310_s26 = smov 384   ;;  %s4311_s27 = smov 24  }
  0x21   :  { %81 = dma.hbm_to_vmem [thread:$0]  %s5616_s7, 14592, %s76_s23, [#allocation9], %s4310_s26, %s4310_s26, %s4311_s27  }
  0x22   :  { %s4123_s4 = scalar_lea.vmem %s98_s25, 14592  ;;  %p4128_p11 = scmp.lt.s32.totalorder %s98_s25, %s98_s25 }
  0x23   :  { %p4124_p10 = scmp.ne.s32.totalorder %s98_s25, %s4123_s4  ;;  %p4129_p12 = scmp.lt.s32.totalorder %s4123_s4, %s4123_s4 }
  0x25   :  { %p4130_p13 = por %p4129_p12, %p4128_p11 }
  0x27   :  { %p4131_p0 = pnand %p4130_p13, %p4124_p10 }
  0x29   :  { %4134 = shalt.err (!%p4131_p0)
}
  0x2a   :  { %103 = dma.hbm_to_vmem [thread:$0]  %s5618_s9, 14592, %s98_s25, [#allocation12], %s4310_s26, %s4310_s26, %s4311_s27  }
  0x2b   :  { %s4312_s20 = smov [#allocation14]   ;;  %s4313_s1 = smov [#allocation17]  }
  0x2c   :  { %s122_s21 = sshll.u32 %s4312_s20, 4  ;;  %s146_s7 = sshll.u32 %s4313_s1, 4  ;;  %s123_s21 = int_to_ptr.vmem [resolvable:$true] %s122_s21  ;;  %s147_s7 = int_to_ptr.vmem [resolvable:$true] %s146_s7 }
  0x2d   :  { %s4143_s22 = scalar_lea.vmem %s123_s21, 16  ;;  %s4147_s2 = scalar_lea.vmem %s123_s21, 32 }
  0x2e   :  { %p4144_p1 = scmp.ne.s32.totalorder %s123_s21, %s4143_s22  ;;  %p4148_p2 = scmp.lt.s32.totalorder %s123_s21, %s123_s21 }
  0x2f   :  { %p4149_p3 = scmp.lt.s32.totalorder %s4147_s2, %s4143_s22 }
  0x31   :  { %p4150_p4 = por %p4149_p3, %p4148_p2 }
  0x33   :  { %p4151_p5 = pnand %p4150_p4, %p4144_p1 }
  0x35   :  { %4154 = shalt.err (!%p4151_p5)
}
  0x36   :  { %125 = dma.hbm_to_vmem [thread:$0]  %s5621_s12, 16, %s123_s21, [#allocation15]  }
  0x37   :  { %s4163_s3 = scalar_lea.vmem %s147_s7, 32  ;;  %p4168_p7 = scmp.lt.s32.totalorder %s147_s7, %s147_s7 }
  0x38   :  { %p4164_p6 = scmp.ne.s32.totalorder %s147_s7, %s4163_s3  ;;  %p4169_p8 = scmp.lt.s32.totalorder %s4163_s3, %s4163_s3 }
  0x3a   :  { %p4170_p9 = por %p4169_p8, %p4168_p7 }
  0x3c   :  { %p4171_p10 = pnand %p4170_p9, %p4164_p6 }
  0x3e   :  { %4174 = shalt.err (!%p4171_p10)
}
  0x3f   :  { %149 = dma.hbm_to_vmem [thread:$0]  %s5625_s16, 32, %s147_s7, [#allocation18]  }
  0x40   :  { %s4314_s28 = smov [#allocation3]   ;;  %s4315_s4 = smov [#allocation7]  }
  0x41   :  { %s41_s29 = sshll.u32 %s4314_s28, 4  ;;  %s66_s0 = sshll.u32 %s4315_s4, 4  ;;  %s42_s29 = int_to_ptr.vmem [resolvable:$true] %s41_s29  ;;  %s67_s0 = int_to_ptr.vmem [resolvable:$true] %s66_s0 }
  0x42   :  { %s4183_s30 = scalar_lea.vmem %s42_s29, 3072  ;;  %p4188_p12 = scmp.lt.s32.totalorder %s42_s29, %s42_s29 }
  0x43   :  { %p4184_p11 = scmp.ne.s32.totalorder %s42_s29, %s4183_s30  ;;  %p4189_p13 = scmp.lt.s32.totalorder %s4183_s30, %s4183_s30 }
  0x45   :  { %p4190_p0 = por %p4189_p13, %p4188_p12 }
  0x47   :  { %p4191_p1 = pnand %p4190_p0, %p4184_p11 }
  0x49   :  { %4194 = shalt.err (!%p4191_p1)
}
  0x4a   :  { %s5635_s21 = sld [smem:[#allocation29_spill]]  ;;  %s4203_s16 = scalar_lea.vmem %s67_s0, 32 }
  0x4b   :  { %p4204_p2 = scmp.ne.s32.totalorder %s67_s0, %s4203_s16  ;;  %p4208_p3 = scmp.lt.s32.totalorder %s67_s0, %s67_s0 }
  0x4c   :  { %p4209_p4 = scmp.lt.s32.totalorder %s4203_s16, %s4203_s16 }
  0x4e   :  { %p4210_p5 = por %p4209_p4, %p4208_p3 }
  0x50   :  { %47 = dma.hbm_to_vmem [thread:$0]  %s5635_s21, 3072, %s42_s29, [#allocation4], %s4310_s26, %s4310_s26, %s4311_s27  }
  0x51   :  { %p4211_p6 = pnand %p4210_p5, %p4204_p2 }
  0x53   :  { %4214 = shalt.err (!%p4211_p6)
}
  0x54   :  { %69 = dma.hbm_to_vmem [thread:$0]  %s5615_s6, 32, %s67_s0, [#allocation6]  }
  0x55   :  { %s4316_s22 = smov [#allocation10]   ;;  %s4317_s23 = smov [#allocation13]  }
  0x56   :  { %s88_s2 = sshll.u32 %s4316_s22, 4  ;;  %s110_s24 = sshll.u32 %s4317_s23, 4  ;;  %s89_s2 = int_to_ptr.vmem [resolvable:$true] %s88_s2  ;;  %s111_s24 = int_to_ptr.vmem [resolvable:$true] %s110_s24 }
  0x57   :  { %s4223_s3 = scalar_lea.vmem %s89_s2, 48  ;;  %s4227_s26 = scalar_lea.vmem %s89_s2, 64 }
  0x58   :  { %p4224_p7 = scmp.ne.s32.totalorder %s89_s2, %s4223_s3  ;;  %p4228_p8 = scmp.lt.s32.totalorder %s89_s2, %s89_s2 }
  0x59   :  { %p4229_p9 = scmp.lt.s32.totalorder %s4227_s26, %s4223_s3 }
  0x5b   :  { %p4230_p10 = por %p4229_p9, %p4228_p8 }
  0x5d   :  { %p4231_p11 = pnand %p4230_p10, %p4224_p7 }
  0x5f   :  { %4234 = shalt.err (!%p4231_p11)
}
  0x60   :  { %91 = dma.hbm_to_vmem [thread:$0]  %s5617_s8, 48, %s89_s2, [#allocation9]  }
  0x61   :  { %s4243_s28 = scalar_lea.vmem %s111_s24, 48  ;;  %s4247_s6 = scalar_lea.vmem %s111_s24, 64 }
  0x62   :  { %p4244_p12 = scmp.ne.s32.totalorder %s111_s24, %s4243_s28  ;;  %p4248_p13 = scmp.lt.s32.totalorder %s111_s24, %s111_s24 }
  0x63   :  { %p4249_p0 = scmp.lt.s32.totalorder %s4247_s6, %s4243_s28 }
  0x65   :  { %p4250_p1 = por %p4249_p0, %p4248_p13 }
  0x67   :  { %p4251_p2 = pnand %p4250_p1, %p4244_p12 }
  0x69   :  { %4254 = shalt.err (!%p4251_p2)
}
  0x6a   :  { %113 = dma.hbm_to_vmem [thread:$0]  %s5619_s10, 48, %s111_s24, [#allocation12]  }
  0x6b   :  { %s4318_s0 = smov [#allocation16]   ;;  %s4319_s12 = smov [#allocation19]  }
  0x6c   :  { %s134_s30 = sshll.u32 %s4318_s0, 4  ;;  %s158_s20 = sshll.u32 %s4319_s12, 4  ;;  %s135_s30 = int_to_ptr.vmem [resolvable:$true] %s134_s30  ;;  %s159_s20 = int_to_ptr.vmem [resolvable:$true] %s158_s20 }
  0x6d   :  { %s4263_s21 = scalar_lea.vmem %s135_s30, 32  ;;  %p4268_p4 = scmp.lt.s32.totalorder %s135_s30, %s135_s30 }
  0x6e   :  { %p4264_p3 = scmp.ne.s32.totalorder %s135_s30, %s4263_s21  ;;  %p4269_p5 = scmp.lt.s32.totalorder %s4263_s21, %s4263_s21 }
  0x70   :  { %p4270_p6 = por %p4269_p5, %p4268_p4 }
  0x72   :  { %p4271_p7 = pnand %p4270_p6, %p4264_p3 }
  0x74   :  { %4274 = shalt.err (!%p4271_p7)
}
  0x75   :  { %137 = dma.hbm_to_vmem [thread:$0]  %s5623_s14, 32, %s135_s30, [#allocation15]  }
  0x76   :  { %s4283_s1 = scalar_lea.vmem %s159_s20, 16  ;;  %s4287_s10 = scalar_lea.vmem %s159_s20, 32 }
  0x77   :  { %p4284_p8 = scmp.ne.s32.totalorder %s159_s20, %s4283_s1  ;;  %p4288_p9 = scmp.lt.s32.totalorder %s159_s20, %s159_s20 }
  0x78   :  { %p4289_p10 = scmp.lt.s32.totalorder %s4287_s10, %s4283_s1 }
  0x7a   :  { %p4290_p11 = por %p4289_p10, %p4288_p9 }
  0x7c   :  { %p4291_p12 = pnand %p4290_p11, %p4284_p8 }
  0x7e   :  { %4294 = shalt.err (!%p4291_p12)
}
  0x7f   :  { %161 = dma.hbm_to_vmem [thread:$0]  %s5627_s18, 16, %s159_s20, [#allocation18]  }
  0x80   :  { %4295 = dma.done.wait [#allocation4], 3072  }
  0x81   :  { %4296 = vsyncadd [#allocation4], 4294964224 }
  0x82   :  { %4297 = dma.done.wait [#allocation6], 80  }
  0x83   :  { %4298 = vsyncadd [#allocation6], 4294967216 }
  0x84   :  { %4299 = dma.done.wait [#allocation9], 14640  }
  0x85   :  { %4300 = vsyncadd [#allocation9], 4294952656 }
  0x86   :  { %4301 = dma.done.wait [#allocation12], 14640  }
  0x87   :  { %4302 = vsyncadd [#allocation12], 4294952656 }
  0x88   :  { %4303 = dma.done.wait [#allocation15], 48  }
  0x89   :  { %4304 = vsyncadd [#allocation15], 4294967248 }
  0x8a   :  { %4305 = dma.done.wait [#allocation18], 48  }
  0x8b   :  { %4306 = vsyncadd [#allocation18], 4294967248  ;;  %v4320_v0 = vmov 0.0   ;;  %vm262_vm0 = vcmask 1043456   ;;  %v239_v1 = vld [vmem:[#allocation3 + $0xb0] sm:$0xf] }
  0x8c   :  { %336 = vmatprep.mubr.f32.mxu0 %v4320_v0  ;;  %195 = vst [vmem:[#allocation2] sm:$0xff] %v4320_v0  ;;  %198 = vst [vmem:[#allocation2 + $0x10] sm:$0xff] %v4320_v0  ;;  %692 = vmatprep.mubr.f32.mxu1 %v4320_v0  ;;  %v238_v2 = vld [vmem:[#allocation3 + $0xa8] sm:$0xf]  ;;  %v236_v3 = vld [vmem:[#allocation3 + $0x98] sm:$0xff]  ;;  %s5636_s2 = sld [smem:[#allocation26_spill]] }
  0x8d   :  { %200 = vst [vmem:[#allocation2 + $0x20] sm:$0xff] %v4320_v0  ;;  %202 = vst [vmem:[#allocation2 + $0x30] sm:$0xff] %v4320_v0  ;;  %3649 = vmatprep.subr.msk.mxu0 %vm262_vm0, %v239_v1  ;;  %v235_v4 = vld [vmem:[#allocation3 + $0x90] sm:$0xff]  ;;  %v233_v5 = vld [vmem:[#allocation3 + $0x80] sm:$0xff]  ;;  %vm258_vm1 = vcmask 490496   ;;  %vm4321_vm2 = vmmov 0  }
  0x8e   :  { %204 = vst [vmem:[#allocation2 + $0x40] sm:$0xff] %v4320_v0  ;;  %206 = vst [vmem:[#allocation2 + $0x50] sm:$0xff] %v4320_v0  ;;  %3650 = vmatpush1.msk.msra.mxu0 %vm262_vm0, %v238_v2  ;;  %v232_v6 = vld [vmem:[#allocation3 + $0x78] sm:$0xff]  ;;  %v230_v7 = vld [vmem:[#allocation3 + $0x68] sm:$0xff]  ;;  %vm544_vm3 = vcmask 359424   ;;  %s5637_s28 = sld [smem:[#allocation27_spill]] }
  0x8f   :  { %208 = vst [vmem:[#allocation2 + $0x60] sm:$0xff] %v4320_v0  ;;  %210 = vst [vmem:[#allocation2 + $0x70] sm:$0xff] %v4320_v0  ;;  %290 = vmatprep.subr.mxu0 %v236_v3  ;;  %v229_v8 = vld [vmem:[#allocation3 + $0x60] sm:$0xff]  ;;  %v227_v9 = vld [vmem:[#allocation3 + $0x50] sm:$0xff]  ;;  %s4322_s6 = smov 98   ;;  %s4323_s4 = smov 68  }
  0x90   :  { %212 = vst [vmem:[#allocation2 + $0x80] sm:$0xff] %v4320_v0  ;;  %214 = vst [vmem:[#allocation2 + $0x90] sm:$0xff] %v4320_v0  ;;  %291 = vmatpush1.msra.mxu0 %v235_v4  ;;  %v226_v10 = vld [vmem:[#allocation3 + $0x48] sm:$0xff]  ;;  %v224_v11 = vld [vmem:[#allocation3 + $0x38] sm:$0xff]  ;;  %s4324_s0 = smov 38   ;;  %s4325_s30 = smov 8  }
  0x91   :  { %292 = vmatprep.subr.mxu0 %v233_v5  ;;  %v223_v12 = vld [vmem:[#allocation3 + $0x30] sm:$0xff]  ;;  %v221_v13 = vld [vmem:[#allocation3 + $0x20] sm:$0xff]  ;;  %v220_v14 = vld [vmem:[#allocation3 + $0x18] sm:$0xff]  ;;  %vm1498_vm4 = vcmask 1045504   ;;  %vm1494_vm5 = vcmask 244736   ;;  %s4327_s21 = smov 76  }
  0x92   :  { %293 = vmatpush1.msra.mxu0 %v232_v6  ;;  %v218_v15 = vld [vmem:[#allocation3 + $0x8] sm:$0xff]  ;;  %v217_v16 = vld [vmem:[#allocation3] sm:$0xff]  ;;  %v240_v18 = vld [vmem:[#allocation3 + $0xb8] sm:$0xf]  ;;  %s4328_s7 = smov 46   ;;  %s4329_s18 = smov 16  }
  0x93   :  { %294 = vmatprep.subr.mxu0 %v230_v7  ;;  %v216_v17 = vld [vmem:[%s5636_s2] sm:$0x3]  ;;  %v234_v20 = vld [vmem:[#allocation3 + $0x88] sm:$0xff]  ;;  %v231_v21 = vld [vmem:[#allocation3 + $0x70] sm:$0xff]  ;;  %s4330_s26 = smov 114   ;;  %vm1967_vm6 = vcmask 64512  }
  0x94   :  { %295 = vmatpush1.msra.mxu0 %v229_v8  ;;  %v237_v19 = vld [vmem:[#allocation3 + $0xa0] sm:$0xff]  ;;  %v228_v22 = vld [vmem:[#allocation3 + $0x58] sm:$0xff]  ;;  %v222_v24 = vld [vmem:[#allocation3 + $0x28] sm:$0xff]  ;;  %vm1461_vm7 = vcmask 74752   ;;  %vm2436_vm8 = vcmask 130048   ;;  %vm196_vm9 = vcmask 187392  }
  0x95   :  { %296 = vmatprep.subr.mxu0 %v227_v9  ;;  %v225_v23 = vld [vmem:[#allocation3 + $0x40] sm:$0xff]  ;;  %v219_v25 = vld [vmem:[#allocation3 + $0x10] sm:$0xff]  ;;  %vm1577_vm10 = vcmask 173056   ;;  %vm2739_vm11 = vcmask 1046528   ;;  %s4333_s12 = smov 14   ;;  %s4334_s20 = smov 21  }
  0x96   :  { %297 = vmatpush1.msra.mxu0 %v226_v10  ;;  %v459_v26 = vld [vmem:[#allocation8 + $0x170] sm:$0xff]  ;;  %v458_v27 = vld [vmem:[#allocation8 + $0x168] sm:$0xff]  ;;  %v456_v28 = vld [vmem:[#allocation8 + $0x158] sm:$0xff]  ;;  %s4337_s8 = smov 17   ;;  %s4338_s16 = smov 15   ;;  %vm1583_vm12 = vcmask 181424  }
  0x97   :  { %298 = vmatprep.subr.mxu0 %v224_v11  ;;  %v455_v29 = vld [vmem:[#allocation8 + $0x150] sm:$0xff]  ;;  %v453_v30 = vld [vmem:[#allocation8 + $0x140] sm:$0xff]  ;;  %v452_v31 = vld [vmem:[#allocation8 + $0x138] sm:$0xff]  ;;  %s4339_s1 = smov 13   ;;  %vm3296_vm13 = vcmask 97280   ;;  %s4343_s10 = smov 56  }
  0x98   :  { %299 = vmatpush1.msra.mxu0 %v223_v12  ;;  %v450_v32 = vld [vmem:[#allocation8 + $0x128] sm:$0xff]  ;;  %v449_v33 = vld [vmem:[#allocation8 + $0x120] sm:$0xff]  ;;  %v447_v34 = vld [vmem:[#allocation8 + $0x110] sm:$0xff]  ;;  %s4344_s23 = smov 44   ;;  %s4346_s24 = smov 32   ;;  %vm3409_vm14 = vcmask 91136  }
  0x99   :  { %300 = vmatprep.subr.mxu0 %v221_v13  ;;  %v446_v35 = vld [vmem:[#allocation8 + $0x108] sm:$0xff]  ;;  %v444_v36 = vld [vmem:[#allocation8 + $0xf8] sm:$0xff]  ;;  %v443_v37 = vld [vmem:[#allocation8 + $0xf0] sm:$0xff]  ;;  %s4362_s29 = smov 84   ;;  %vm3445_vm15 = vcmask 189536  }
  0x9a   :  { %301 = vmatpush1.msra.mxu0 %v220_v14  ;;  %v441_v38 = vld [vmem:[#allocation8 + $0xe0] sm:$0xff]  ;;  %v440_v39 = vld [vmem:[#allocation8 + $0xd8] sm:$0xff]  ;;  %v438_v40 = vld [vmem:[#allocation8 + $0xc8] sm:$0xff] }
  0x9b   :  { %302 = vmatprep.subr.mxu0 %v218_v15  ;;  %v437_v41 = vld [vmem:[#allocation8 + $0xc0] sm:$0xff]  ;;  %v435_v42 = vld [vmem:[#allocation8 + $0xb0] sm:$0xff]  ;;  %v434_v43 = vld [vmem:[#allocation8 + $0xa8] sm:$0xff] }
  0x9c   :  { %303 = vmatpush1.msra.mxu0 %v217_v16  ;;  %v432_v44 = vld [vmem:[#allocation8 + $0x98] sm:$0xff]  ;;  %v431_v45 = vld [vmem:[#allocation8 + $0x90] sm:$0xff]  ;;  %v429_v46 = vld [vmem:[#allocation8 + $0x80] sm:$0xff] }
  0x9d   :  { %3651 = vmatmul.mubr.msk.f32.vlgmr.msra.gmra.mxu0 %vm258_vm1, %v216_v17  ;;  %3877 = vmatprep.subr.mxu0 %v4320_v0  ;;  %v428_v47 = vld [vmem:[#allocation8 + $0x78] sm:$0xff]  ;;  %v426_v48 = vld [vmem:[#allocation8 + $0x68] sm:$0xff]  ;;  %v425_v49 = vld [vmem:[#allocation8 + $0x60] sm:$0xff] }
  0x9e   :  { %3878 = vmatpush3.msk.msra.mxu0 %vm262_vm0, %v240_v18  ;;  %3893 = vmatprep.mubr.msk.f32.mxu0 %vm4321_vm2, %v4320_v0  ;;  %v423_v50 = vld [vmem:[#allocation8 + $0x50] sm:$0xff]  ;;  %v422_v51 = vld [vmem:[#allocation8 + $0x48] sm:$0xff]  ;;  %v420_v52 = vld [vmem:[#allocation8 + $0x38] sm:$0xff] }
  0x9f   :  { %3879 = vmatprep.subr.mxu0 %v4320_v0  ;;  %v419_v53 = vld [vmem:[#allocation8 + $0x30] sm:$0xff]  ;;  %v417_v54 = vld [vmem:[#allocation8 + $0x20] sm:$0xff]  ;;  %v416_v55 = vld [vmem:[#allocation8 + $0x18] sm:$0xff] }
  0xa0   :  { %3880 = vmatpush3.msra.mxu0 %v237_v19  ;;  %v414_v56 = vld [vmem:[#allocation8 + $0x8] sm:$0xff]  ;;  %v413_v57 = vld [vmem:[#allocation8] sm:$0xff]  ;;  %v507_v58 = vld [vmem:[#allocation8 + $0x2f0] sm:$0xff] }
  0xa1   :  { %3881 = vmatprep.subr.mxu0 %v4320_v0  ;;  %v506_v59 = vld [vmem:[#allocation8 + $0x2e8] sm:$0xff]  ;;  %v504_v60 = vld [vmem:[#allocation8 + $0x2d8] sm:$0xff]  ;;  %v503_v61 = vld [vmem:[#allocation8 + $0x2d0] sm:$0xff] }
  0xa2   :  { %3882 = vmatpush3.msra.mxu0 %v234_v20  ;;  %v501_v62 = vld [vmem:[#allocation8 + $0x2c0] sm:$0xff]  ;;  %v500_v63 = vld [vmem:[#allocation8 + $0x2b8] sm:$0xff]  ;;  %v498_v1 = vld [vmem:[#allocation8 + $0x2a8] sm:$0xff] }
  0xa3   :  { %3883 = vmatprep.subr.mxu0 %v4320_v0  ;;  %v497_v2 = vld [vmem:[#allocation8 + $0x2a0] sm:$0xff]  ;;  %v495_v3 = vld [vmem:[#allocation8 + $0x290] sm:$0xff]  ;;  %v494_v4 = vld [vmem:[#allocation8 + $0x288] sm:$0xff] }
  0xa4   :  { %3884 = vmatpush3.msra.mxu0 %v231_v21  ;;  %v492_v5 = vld [vmem:[#allocation8 + $0x278] sm:$0xff]  ;;  %v491_v6 = vld [vmem:[#allocation8 + $0x270] sm:$0xff]  ;;  %v489_v7 = vld [vmem:[#allocation8 + $0x260] sm:$0xff] }
  0xa5   :  { %3885 = vmatprep.subr.mxu0 %v4320_v0  ;;  %v488_v8 = vld [vmem:[#allocation8 + $0x258] sm:$0xff]  ;;  %v486_v9 = vld [vmem:[#allocation8 + $0x248] sm:$0xff]  ;;  %v485_v10 = vld [vmem:[#allocation8 + $0x240] sm:$0xff] }
  0xa6   :  { %3886 = vmatpush3.msra.mxu0 %v228_v22  ;;  %v483_v11 = vld [vmem:[#allocation8 + $0x230] sm:$0xff]  ;;  %v482_v12 = vld [vmem:[#allocation8 + $0x228] sm:$0xff]  ;;  %v480_v13 = vld [vmem:[#allocation8 + $0x218] sm:$0xff] }
  0xa7   :  { %3887 = vmatprep.subr.mxu0 %v4320_v0  ;;  %v479_v14 = vld [vmem:[#allocation8 + $0x210] sm:$0xff]  ;;  %v477_v15 = vld [vmem:[#allocation8 + $0x200] sm:$0xff]  ;;  %v476_v16 = vld [vmem:[#allocation8 + $0x1f8] sm:$0xff] }
  0xa8   :  { %3888 = vmatpush3.msra.mxu0 %v225_v23  ;;  %v473_v18 = vld [vmem:[#allocation8 + $0x1e0] sm:$0xff]  ;;  %v471_v19 = vld [vmem:[#allocation8 + $0x1d0] sm:$0xff]  ;;  %v470_v20 = vld [vmem:[#allocation8 + $0x1c8] sm:$0xff] }
  0xa9   :  { %3889 = vmatprep.subr.mxu0 %v4320_v0  ;;  %v525_v21 = vld [vmem:[#allocation8 + $0x380] sm:$0xf]  ;;  %v524_v22 = vld [vmem:[#allocation8 + $0x378] sm:$0xf]  ;;  %v522_v23 = vld [vmem:[#allocation8 + $0x368] sm:$0xff] }
  0xaa   :  { %3890 = vmatpush3.msra.mxu0 %v222_v24  ;;  %3654 = vmatprep.subr.msk.mxu1 %vm262_vm0, %v525_v21  ;;  %v521_v24 = vld [vmem:[#allocation8 + $0x360] sm:$0xff]  ;;  %v418_v21 = vld [vmem:[#allocation8 + $0x28] sm:$0xff] }
  0xab   :  { %3891 = vmatprep.subr.mxu0 %v4320_v0  ;;  %3655 = vmatpush1.msk.msra.mxu1 %vm262_vm0, %v524_v22  ;;  %v463_v22 = vld [vmem:[#allocation8 + $0x190] sm:$0xff] }
  0xac   :  { %3892 = vmatpush3.msra.mxu0 %v219_v25  ;;  %v468_v25 = vld [vmem:[#allocation8 + $0x1b8] sm:$0xff]  ;;  %650 = vmatprep.subr.mxu1 %v522_v23  ;;  %v415_v23 = vld [vmem:[#allocation8 + $0x10] sm:$0xff] }
  0xad   :  { %3894 = vmatmul.mubr.msk.f32.vlgmr.msra.gmra.mxu0 %vm258_vm1, %v216_v17  ;;  %557 = vmatprep.subr.mxu0 %v459_v26  ;;  %v474_v17 = vld [vmem:[#allocation8 + $0x1e8] sm:$0xff]  ;;  %v519_v26 = vld [vmem:[#allocation8 + $0x350] sm:$0xff]  ;;  %vm3493_vm1 = vcmask 386336  }
  0xae   :  { %558 = vmatpush1.msra.mxu0 %v458_v27  ;;  %v467_v27 = vld [vmem:[#allocation8 + $0x1b0] sm:$0xff]  ;;  %651 = vmatpush1.msra.mxu1 %v521_v24  ;;  %v526_v24 = vld [vmem:[#allocation8 + $0x388] sm:$0xf] }
  0xaf   :  { %559 = vmatprep.subr.mxu0 %v456_v28  ;;  %v518_v28 = vld [vmem:[#allocation8 + $0x348] sm:$0xff]  ;;  %652 = vmatprep.subr.mxu1 %v519_v26  ;;  %v520_v26 = vld [vmem:[#allocation8 + $0x358] sm:$0xff] }
  0xb0   :  { %560 = vmatpush1.msra.mxu0 %v455_v29  ;;  %v465_v29 = vld [vmem:[#allocation8 + $0x1a0] sm:$0xff]  ;;  %653 = vmatpush1.msra.mxu1 %v518_v28  ;;  %v514_v28 = vld [vmem:[#allocation8 + $0x328] sm:$0xff] }
  0xb1   :  { %561 = vmatprep.subr.mxu0 %v453_v30  ;;  %v516_v30 = vld [vmem:[#allocation8 + $0x338] sm:$0xff] }
  0xb2   :  { %562 = vmatpush1.msra.mxu0 %v452_v31  ;;  %v464_v31 = vld [vmem:[#allocation8 + $0x198] sm:$0xff]  ;;  %654 = vmatprep.subr.mxu1 %v516_v30  ;;  %v888_v30 = vld [vmem:[#allocation11 + $0x170] sm:$0xff] }
  0xb3   :  { %563 = vmatprep.subr.mxu0 %v450_v32  ;;  %v515_v32 = vld [vmem:[#allocation8 + $0x330] sm:$0xff] }
  0xb4   :  { %564 = vmatpush1.msra.mxu0 %v449_v33  ;;  %v462_v33 = vld [vmem:[#allocation8 + $0x188] sm:$0xff]  ;;  %655 = vmatpush1.msra.mxu1 %v515_v32 }
  0xb5   :  { %565 = vmatprep.subr.mxu0 %v447_v34  ;;  %v513_v34 = vld [vmem:[#allocation8 + $0x320] sm:$0xff]  ;;  %v885_v32 = vld [vmem:[#allocation11 + $0x158] sm:$0xff] }
  0xb6   :  { %566 = vmatpush1.msra.mxu0 %v446_v35  ;;  %v461_v35 = vld [vmem:[#allocation8 + $0x180] sm:$0xff]  ;;  %656 = vmatprep.subr.mxu1 %v513_v34  ;;  %v882_v34 = vld [vmem:[#allocation11 + $0x140] sm:$0xff] }
  0xb7   :  { %567 = vmatprep.subr.mxu0 %v444_v36  ;;  %v512_v36 = vld [vmem:[#allocation8 + $0x318] sm:$0xff] }
  0xb8   :  { %568 = vmatpush1.msra.mxu0 %v443_v37  ;;  %657 = vmatpush1.msra.mxu1 %v512_v36  ;;  %v510_v37 = vld [vmem:[#allocation8 + $0x308] sm:$0xff]  ;;  %v879_v36 = vld [vmem:[#allocation11 + $0x128] sm:$0xff] }
  0xb9   :  { %569 = vmatprep.subr.mxu0 %v441_v38  ;;  %658 = vmatprep.subr.mxu1 %v510_v37  ;;  %v509_v38 = vld [vmem:[#allocation8 + $0x300] sm:$0xff]  ;;  %v878_v37 = vld [vmem:[#allocation11 + $0x120] sm:$0xff] }
  0xba   :  { %570 = vmatpush1.msra.mxu0 %v440_v39  ;;  %659 = vmatpush1.msra.mxu1 %v509_v38  ;;  %v508_v39 = vld [vmem:[#allocation8 + $0x2f8] sm:$0xff]  ;;  %v876_v38 = vld [vmem:[#allocation11 + $0x110] sm:$0xff] }
  0xbb   :  { %571 = vmatprep.subr.mxu0 %v438_v40  ;;  %3751 = vmatprep.subr.mxu1 %v508_v39  ;;  %v243_v40 = vlaneseq  ;;  %v875_v39 = vld [vmem:[#allocation11 + $0x108] sm:$0xff] }
  0xbc   :  { %572 = vmatpush1.msra.mxu0 %v437_v41 }
  0xbd   :  { %573 = vmatprep.subr.mxu0 %v435_v42  ;;  %v244_v41 = vshrl.u32 %v243_v40, 7  ;;  %v873_v40 = vld [vmem:[#allocation11 + $0xf8] sm:$0xff] }
  0xbe   :  { %574 = vmatpush1.msra.mxu0 %v434_v43  ;;  %v241_v43 = vld [vmem:[#allocation5] sm:$0x7] }
  0xbf   :  { %575 = vmatprep.subr.mxu0 %v432_v44  ;;  %v4539_v42 = vsub.s32 1, %v244_v41  ;;  %v4541_v44 = vsub.s32 0, %v244_v41 }
  0xc0   :  { %576 = vmatpush1.msra.mxu0 %v431_v45 }
  0xc1   :  { %577 = vmatprep.subr.mxu0 %v429_v46  ;;  %v250_v45 = vrot.slane %v241_v43, %v4539_v42  ;;  %v246_v46 = vrot.slane %v241_v43, %v4541_v44 }
  0xc2   :  { %578 = vmatpush1.msra.mxu0 %v428_v47 }
  0xc3   :  { %579 = vmatprep.subr.mxu0 %v426_v48 }
  0xc4   :  { %580 = vmatpush1.msra.mxu0 %v425_v49 }
  0xc5   :  { %581 = vmatprep.subr.mxu0 %v423_v50 }
  0xc6   :  { %582 = vmatpush1.msra.mxu0 %v422_v51  ;;  %v4549_v51 = vsub.s32 2, %v244_v41  ;;  %v872_v41 = vld [vmem:[#allocation11 + $0xf0] sm:$0xff] }
  0xc7   :  { %583 = vmatprep.subr.mxu0 %v420_v52 }
  0xc8   :  { %584 = vmatpush1.msra.mxu0 %v419_v53  ;;  %v254_v52 = vrot.slane %v241_v43, %v4549_v51  ;;  %v870_v43 = vld [vmem:[#allocation11 + $0xe0] sm:$0xff] }
  0xc9   :  { %585 = vmatprep.subr.mxu0 %v417_v54 }
  0xca   :  { %586 = vmatpush1.msra.mxu0 %v416_v55  ;;  %v460_v55 = vld [vmem:[#allocation8 + $0x178] sm:$0xff] }
  0xcb   :  { %587 = vmatprep.subr.mxu0 %v414_v56 }
  0xcc   :  { %588 = vmatpush1.msra.mxu0 %v413_v57  ;;  %v505_v57 = vld [vmem:[#allocation8 + $0x2e0] sm:$0xff] }
  0xcd   :  { %589 = vmatprep.subr.mxu0 %v507_v58  ;;  %v457_v58 = vld [vmem:[#allocation8 + $0x160] sm:$0xff] }
  0xce   :  { %590 = vmatpush2.msra.mxu0 %v506_v59  ;;  %v502_v59 = vld [vmem:[#allocation8 + $0x2c8] sm:$0xff] }
  0xcf   :  { %591 = vmatprep.subr.mxu0 %v504_v60  ;;  %v454_v60 = vld [vmem:[#allocation8 + $0x148] sm:$0xff] }
  0xd0   :  { %592 = vmatpush2.msra.mxu0 %v503_v61  ;;  %v499_v61 = vld [vmem:[#allocation8 + $0x2b0] sm:$0xff] }
  0xd1   :  { %593 = vmatprep.subr.mxu0 %v501_v62  ;;  %v451_v62 = vld [vmem:[#allocation8 + $0x130] sm:$0xff] }
  0xd2   :  { %594 = vmatpush2.msra.mxu0 %v500_v63  ;;  %v496_v63 = vld [vmem:[#allocation8 + $0x298] sm:$0xff] }
  0xd3   :  { %595 = vmatprep.subr.mxu0 %v498_v1  ;;  %v448_v1 = vld [vmem:[#allocation8 + $0x118] sm:$0xff] }
  0xd4   :  { %596 = vmatpush2.msra.mxu0 %v497_v2  ;;  %v493_v2 = vld [vmem:[#allocation8 + $0x280] sm:$0xff] }
  0xd5   :  { %597 = vmatprep.subr.mxu0 %v495_v3  ;;  %v445_v3 = vld [vmem:[#allocation8 + $0x100] sm:$0xff] }
  0xd6   :  { %598 = vmatpush2.msra.mxu0 %v494_v4  ;;  %v490_v4 = vld [vmem:[#allocation8 + $0x268] sm:$0xff] }
  0xd7   :  { %599 = vmatprep.subr.mxu0 %v492_v5  ;;  %v442_v5 = vld [vmem:[#allocation8 + $0xe8] sm:$0xff] }
  0xd8   :  { %600 = vmatpush2.msra.mxu0 %v491_v6  ;;  %v487_v6 = vld [vmem:[#allocation8 + $0x250] sm:$0xff] }
  0xd9   :  { %601 = vmatprep.subr.mxu0 %v489_v7  ;;  %v439_v7 = vld [vmem:[#allocation8 + $0xd0] sm:$0xff] }
  0xda   :  { %602 = vmatpush2.msra.mxu0 %v488_v8  ;;  %v484_v8 = vld [vmem:[#allocation8 + $0x238] sm:$0xff] }
  0xdb   :  { %603 = vmatprep.subr.mxu0 %v486_v9  ;;  %v436_v9 = vld [vmem:[#allocation8 + $0xb8] sm:$0xff] }
  0xdc   :  { %604 = vmatpush2.msra.mxu0 %v485_v10  ;;  %v481_v10 = vld [vmem:[#allocation8 + $0x220] sm:$0xff] }
  0xdd   :  { %605 = vmatprep.subr.mxu0 %v483_v11  ;;  %v433_v11 = vld [vmem:[#allocation8 + $0xa0] sm:$0xff] }
  0xde   :  { %606 = vmatpush2.msra.mxu0 %v482_v12  ;;  %v478_v12 = vld [vmem:[#allocation8 + $0x208] sm:$0xff] }
  0xdf   :  { %607 = vmatprep.subr.mxu0 %v480_v13  ;;  %v430_v13 = vld [vmem:[#allocation8 + $0x88] sm:$0xff] }
  0xe0   :  { %608 = vmatpush2.msra.mxu0 %v479_v14  ;;  %v475_v14 = vld [vmem:[#allocation8 + $0x1f0] sm:$0xff] }
  0xe1   :  { %609 = vmatprep.subr.mxu0 %v477_v15  ;;  %v427_v15 = vld [vmem:[#allocation8 + $0x70] sm:$0xff] }
  0xe2   :  { %610 = vmatpush2.msra.mxu0 %v476_v16  ;;  %v472_v16 = vld [vmem:[#allocation8 + $0x1d8] sm:$0xff] }
  0xe3   :  { %611 = vmatprep.subr.mxu0 %v474_v17  ;;  %v424_v17 = vld [vmem:[#allocation8 + $0x58] sm:$0xff] }
  0xe4   :  { %612 = vmatpush2.msra.mxu0 %v473_v18  ;;  %v469_v18 = vld [vmem:[#allocation8 + $0x1c0] sm:$0xff] }
  0xe5   :  { %613 = vmatprep.subr.mxu0 %v471_v19  ;;  %v421_v19 = vld [vmem:[#allocation8 + $0x40] sm:$0xff] }
  0xe6   :  { %614 = vmatpush2.msra.mxu0 %v470_v20  ;;  %v466_v20 = vld [vmem:[#allocation8 + $0x1a8] sm:$0xff] }
  0xe7   :  { %615 = vmatprep.subr.mxu0 %v468_v25  ;;  %v523_v25 = vld [vmem:[#allocation8 + $0x370] sm:$0xff] }
  0xe8   :  { %616 = vmatpush2.msra.mxu0 %v467_v27  ;;  %v517_v27 = vld [vmem:[#allocation8 + $0x340] sm:$0xff] }
  0xe9   :  { %617 = vmatprep.subr.mxu0 %v465_v29  ;;  %v511_v29 = vld [vmem:[#allocation8 + $0x310] sm:$0xff] }
  0xea   :  { %618 = vmatpush2.msra.mxu0 %v464_v31  ;;  %v887_v31 = vld [vmem:[#allocation11 + $0x168] sm:$0xff] }
  0xeb   :  { %619 = vmatprep.subr.mxu0 %v462_v33  ;;  %v884_v33 = vld [vmem:[#allocation11 + $0x150] sm:$0xff] }
  0xec   :  { %620 = vmatpush2.msra.mxu0 %v461_v35  ;;  %v881_v35 = vld [vmem:[#allocation11 + $0x138] sm:$0xff] }
 0x15d   :  { %v338_v47 = vpop.f32.mrf.mxu0 }
 0x15e   :  { %v4545_v50 = vadd.f32 %v338_v47, %v246_v46  ;;  %v867_v46 = vld [vmem:[#allocation11 + $0xc8] sm:$0xff]  ;;  %v866_v47 = vld [vmem:[#allocation11 + $0xc0] sm:$0xff] }
 0x15f   :  { %v340_v48 = vpop.f32.mrf.mxu0 }
 0x160   :  { %v341_v49 = vadd.f32 %v340_v48, %v250_v45  ;;  %v869_v45 = vld [vmem:[#allocation11 + $0xd8] sm:$0xff]  ;;  %v864_v48 = vld [vmem:[#allocation11 + $0xb0] sm:$0xff] }
 0x162   :  { %621 = vmatprep.mubr.f32.mxu0 %v341_v49 }
 0x163   :  { %622 = vmatmul.mubr.f32.vlgmr.msra.gmra.mxu0 %v4545_v50 }
 0x164   :  { %1120 = vmatprep.mubr.f32.mxu0 %v4320_v0 }
 0x16d   :  { %v409_v53 = vpop.f32.mrf.mxu0 }
 0x16e   :  { %v4552_v54 = vadd.f32 %v409_v53, %v254_v52  ;;  %v860_v52 = vld [vmem:[#allocation11 + $0x90] sm:$0xff]  ;;  %v858_v53 = vld [vmem:[#allocation11 + $0x80] sm:$0xff] }
 0x16f   :  { %v3895_v56 = vpop.f32.mrf.mxu0 }
 0x170   :  { %3656 = vmatmul.mubr.msk.f32.vlgmr.msra.gmra.mxu1 %vm544_vm3, %v4552_v54  ;;  %v854_v56 = vld [vmem:[#allocation11 + $0x60] sm:$0xff] }
 0x171   :  { %3752 = vmatpush3.msra.mxu1 %v460_v55  ;;  %763 = vmatprep.mubr.f32.mxu1 %v341_v49  ;;  %v863_v49 = vld [vmem:[#allocation11 + $0xa8] sm:$0xff] }
 0x172   :  { %3753 = vmatprep.subr.mxu1 %v505_v57  ;;  %v855_v55 = vld [vmem:[#allocation11 + $0x68] sm:$0xff]  ;;  %v852_v57 = vld [vmem:[#allocation11 + $0x50] sm:$0xff] }
 0x173   :  { %3754 = vmatpush3.msra.mxu1 %v457_v58  ;;  %v851_v58 = vld [vmem:[#allocation11 + $0x48] sm:$0xff] }
 0x174   :  { %3755 = vmatprep.subr.mxu1 %v502_v59  ;;  %v849_v59 = vld [vmem:[#allocation11 + $0x38] sm:$0xff] }
 0x175   :  { %3756 = vmatpush3.msra.mxu1 %v454_v60  ;;  %v848_v60 = vld [vmem:[#allocation11 + $0x30] sm:$0xff] }
 0x176   :  { %3757 = vmatprep.subr.mxu1 %v499_v61  ;;  %v846_v61 = vld [vmem:[#allocation11 + $0x20] sm:$0xff] }
 0x177   :  { %3758 = vmatpush3.msra.mxu1 %v451_v62  ;;  %v845_v62 = vld [vmem:[#allocation11 + $0x18] sm:$0xff] }
 0x178   :  { %3759 = vmatprep.subr.mxu1 %v496_v63  ;;  %v843_v63 = vld [vmem:[#allocation11 + $0x8] sm:$0xff] }
 0x179   :  { %3760 = vmatpush3.msra.mxu1 %v448_v1  ;;  %v842_v1 = vld [vmem:[#allocation11] sm:$0xff] }
 0x17a   :  { %3761 = vmatprep.subr.mxu1 %v493_v2  ;;  %v936_v2 = vld [vmem:[#allocation11 + $0x2f0] sm:$0xff] }
 0x17b   :  { %3762 = vmatpush3.msra.mxu1 %v445_v3  ;;  %v935_v3 = vld [vmem:[#allocation11 + $0x2e8] sm:$0xff] }
 0x17c   :  { %3763 = vmatprep.subr.mxu1 %v490_v4  ;;  %v933_v4 = vld [vmem:[#allocation11 + $0x2d8] sm:$0xff] }
 0x17d   :  { %3764 = vmatpush3.msra.mxu1 %v442_v5  ;;  %v932_v5 = vld [vmem:[#allocation11 + $0x2d0] sm:$0xff] }
 0x17e   :  { %3765 = vmatprep.subr.mxu1 %v487_v6  ;;  %v930_v6 = vld [vmem:[#allocation11 + $0x2c0] sm:$0xff] }
 0x17f   :  { %3766 = vmatpush3.msra.mxu1 %v439_v7  ;;  %v929_v7 = vld [vmem:[#allocation11 + $0x2b8] sm:$0xff] }
 0x180   :  { %3767 = vmatprep.subr.mxu1 %v484_v8  ;;  %v927_v8 = vld [vmem:[#allocation11 + $0x2a8] sm:$0xff] }
 0x181   :  { %3768 = vmatpush3.msra.mxu1 %v436_v9  ;;  %v926_v9 = vld [vmem:[#allocation11 + $0x2a0] sm:$0xff] }
 0x182   :  { %3769 = vmatprep.subr.mxu1 %v481_v10  ;;  %v924_v10 = vld [vmem:[#allocation11 + $0x290] sm:$0xff] }
 0x183   :  { %3770 = vmatpush3.msra.mxu1 %v433_v11  ;;  %v923_v11 = vld [vmem:[#allocation11 + $0x288] sm:$0xff] }
 0x184   :  { %3771 = vmatprep.subr.mxu1 %v478_v12  ;;  %v921_v12 = vld [vmem:[#allocation11 + $0x278] sm:$0xff] }
 0x185   :  { %3772 = vmatpush3.msra.mxu1 %v430_v13  ;;  %v920_v13 = vld [vmem:[#allocation11 + $0x270] sm:$0xff] }
 0x186   :  { %3773 = vmatprep.subr.mxu1 %v475_v14  ;;  %v918_v14 = vld [vmem:[#allocation11 + $0x260] sm:$0xff] }
 0x187   :  { %3774 = vmatpush3.msra.mxu1 %v427_v15  ;;  %v917_v15 = vld [vmem:[#allocation11 + $0x258] sm:$0xff] }
 0x188   :  { %3775 = vmatprep.subr.mxu1 %v472_v16  ;;  %v915_v16 = vld [vmem:[#allocation11 + $0x248] sm:$0xff] }
 0x189   :  { %3776 = vmatpush3.msra.mxu1 %v424_v17  ;;  %v914_v17 = vld [vmem:[#allocation11 + $0x240] sm:$0xff] }
 0x18a   :  { %3777 = vmatprep.subr.mxu1 %v469_v18  ;;  %v912_v18 = vld [vmem:[#allocation11 + $0x230] sm:$0xff] }
 0x18b   :  { %3778 = vmatpush3.msra.mxu1 %v421_v19  ;;  %v911_v19 = vld [vmem:[#allocation11 + $0x228] sm:$0xff] }
 0x18c   :  { %3779 = vmatprep.subr.mxu1 %v466_v20  ;;  %v909_v20 = vld [vmem:[#allocation11 + $0x218] sm:$0xff] }
 0x18d   :  { %3780 = vmatpush3.msra.mxu1 %v418_v21  ;;  %v908_v21 = vld [vmem:[#allocation11 + $0x210] sm:$0xff] }
 0x18e   :  { %3781 = vmatprep.subr.mxu1 %v463_v22  ;;  %v906_v22 = vld [vmem:[#allocation11 + $0x200] sm:$0xff] }
 0x18f   :  { %3782 = vmatpush3.msra.mxu1 %v415_v23  ;;  %v905_v23 = vld [vmem:[#allocation11 + $0x1f8] sm:$0xff] }
 0x190   :  { %764 = vmatmul.mubr.f32.vlgmr.msra.gmra.mxu1 %v4545_v50  ;;  %3896 = vmatprep.subr.mxu1 %v4320_v0  ;;  %v861_v50 = vld [vmem:[#allocation11 + $0x98] sm:$0xff] }
 0x191   :  { %3897 = vmatpush3.msk.msra.mxu1 %vm262_vm0, %v526_v24  ;;  %3908 = vmatprep.mubr.msk.f32.mxu1 %vm4321_vm2, %v4320_v0  ;;  %v903_v24 = vld [vmem:[#allocation11 + $0x1e8] sm:$0xff] }
 0x192   :  { %3898 = vmatprep.subr.mxu1 %v4320_v0 }
 0x193   :  { %3899 = vmatpush3.msra.mxu1 %v523_v25  ;;  %v902_v25 = vld [vmem:[#allocation11 + $0x1e0] sm:$0xff] }
 0x194   :  { %3900 = vmatprep.subr.mxu1 %v4320_v0 }
 0x195   :  { %3901 = vmatpush3.msra.mxu1 %v520_v26  ;;  %v900_v26 = vld [vmem:[#allocation11 + $0x1d0] sm:$0xff] }
 0x196   :  { %3902 = vmatprep.subr.mxu1 %v4320_v0 }
 0x197   :  { %3903 = vmatpush3.msra.mxu1 %v517_v27  ;;  %v899_v27 = vld [vmem:[#allocation11 + $0x1c8] sm:$0xff] }
 0x198   :  { %3904 = vmatprep.subr.mxu1 %v4320_v0 }
 0x199   :  { %3905 = vmatpush3.msra.mxu1 %v514_v28  ;;  %v897_v28 = vld [vmem:[#allocation11 + $0x1b8] sm:$0xff] }
 0x19a   :  { %3906 = vmatprep.subr.mxu1 %v4320_v0 }
 0x19b   :  { %3907 = vmatpush3.msra.mxu1 %v511_v29  ;;  %v954_v29 = vld [vmem:[#allocation11 + $0x380] sm:$0xf] }
 0x19c   :  { %3909 = vmatmul.mubr.msk.f32.vlgmr.msra.gmra.mxu1 %vm544_vm3, %v4552_v54  ;;  %985 = vmatprep.subr.mxu1 %v888_v30  ;;  %v857_v54 = vld [vmem:[#allocation11 + $0x78] sm:$0xff] }
 0x19d   :  { %986 = vmatpush1.msra.mxu1 %v887_v31  ;;  %v953_v30 = vld [vmem:[#allocation11 + $0x378] sm:$0xf]  ;;  %v951_v31 = vld [vmem:[#allocation11 + $0x368] sm:$0xff]  ;;  %3659 = vmatprep.subr.msk.mxu0 %vm262_vm0, %v954_v29  ;;  %v904_v29 = vld [vmem:[#allocation11 + $0x1f0] sm:$0xff] }
 0x19e   :  { %987 = vmatprep.subr.mxu1 %v885_v32  ;;  %v896_v32 = vld [vmem:[#allocation11 + $0x1b0] sm:$0xff]  ;;  %3660 = vmatpush1.msk.msra.mxu0 %vm262_vm0, %v953_v30 }
 0x19f   :  { %988 = vmatpush1.msra.mxu1 %v884_v33  ;;  %v950_v33 = vld [vmem:[#allocation11 + $0x360] sm:$0xff]  ;;  %1078 = vmatprep.subr.mxu0 %v951_v31  ;;  %v856_v30 = vld [vmem:[#allocation11 + $0x70] sm:$0xff]  ;;  %v901_v31 = vld [vmem:[#allocation11 + $0x1d8] sm:$0xff] }
 0x1a0   :  { %989 = vmatprep.subr.mxu1 %v882_v34  ;;  %v894_v34 = vld [vmem:[#allocation11 + $0x1a0] sm:$0xff]  ;;  %1079 = vmatpush1.msra.mxu0 %v950_v33 }
 0x1a1   :  { %990 = vmatpush1.msra.mxu1 %v881_v35  ;;  %v948_v35 = vld [vmem:[#allocation11 + $0x350] sm:$0xff]  ;;  %v898_v33 = vld [vmem:[#allocation11 + $0x1c0] sm:$0xff] }
 0x1a2   :  { %991 = vmatprep.subr.mxu1 %v879_v36  ;;  %v893_v36 = vld [vmem:[#allocation11 + $0x198] sm:$0xff]  ;;  %1080 = vmatprep.subr.mxu0 %v948_v35  ;;  %v895_v35 = vld [vmem:[#allocation11 + $0x1a8] sm:$0xff] }
 0x1a3   :  { %992 = vmatpush1.msra.mxu1 %v878_v37  ;;  %v947_v37 = vld [vmem:[#allocation11 + $0x348] sm:$0xff] }
 0x1a4   :  { %993 = vmatprep.subr.mxu1 %v876_v38  ;;  %v891_v38 = vld [vmem:[#allocation11 + $0x188] sm:$0xff]  ;;  %1081 = vmatpush1.msra.mxu0 %v947_v37  ;;  %v892_v37 = vld [vmem:[#allocation11 + $0x190] sm:$0xff] }
 0x1a5   :  { %994 = vmatpush1.msra.mxu1 %v875_v39  ;;  %v945_v39 = vld [vmem:[#allocation11 + $0x338] sm:$0xff] }
 0x1a6   :  { %995 = vmatprep.subr.mxu1 %v873_v40  ;;  %v890_v40 = vld [vmem:[#allocation11 + $0x180] sm:$0xff]  ;;  %1082 = vmatprep.subr.mxu0 %v945_v39  ;;  %v955_v39 = vld [vmem:[#allocation11 + $0x388] sm:$0xf] }
 0x1a7   :  { %996 = vmatpush1.msra.mxu1 %v872_v41  ;;  %v944_v41 = vld [vmem:[#allocation11 + $0x330] sm:$0xff] }
 0x1a8   :  { %997 = vmatprep.subr.mxu1 %v870_v43  ;;  %1083 = vmatpush1.msra.mxu0 %v944_v41  ;;  %v942_v43 = vld [vmem:[#allocation11 + $0x320] sm:$0xff]  ;;  %v952_v41 = vld [vmem:[#allocation11 + $0x370] sm:$0xff] }
 0x1a9   :  { %998 = vmatpush1.msra.mxu1 %v869_v45  ;;  %1084 = vmatprep.subr.mxu0 %v942_v43  ;;  %v941_v45 = vld [vmem:[#allocation11 + $0x318] sm:$0xff] }
 0x1aa   :  { %999 = vmatprep.subr.mxu1 %v867_v46  ;;  %1085 = vmatpush1.msra.mxu0 %v941_v45  ;;  %v939_v46 = vld [vmem:[#allocation11 + $0x308] sm:$0xff]  ;;  %v949_v43 = vld [vmem:[#allocation11 + $0x358] sm:$0xff]  ;;  %v946_v45 = vld [vmem:[#allocation11 + $0x340] sm:$0xff] }
 0x1ab   :  { %1000 = vmatpush1.msra.mxu1 %v866_v47  ;;  %1086 = vmatprep.subr.mxu0 %v939_v46  ;;  %v938_v47 = vld [vmem:[#allocation11 + $0x300] sm:$0xff]  ;;  %v943_v46 = vld [vmem:[#allocation11 + $0x328] sm:$0xff] }
 0x1ac   :  { %1001 = vmatprep.subr.mxu1 %v864_v48  ;;  %1087 = vmatpush1.msra.mxu0 %v938_v47  ;;  %v937_v48 = vld [vmem:[#allocation11 + $0x2f8] sm:$0xff]  ;;  %v940_v47 = vld [vmem:[#allocation11 + $0x310] sm:$0xff] }
 0x1ad   :  { %1002 = vmatpush1.msra.mxu1 %v863_v49  ;;  %3793 = vmatprep.subr.mxu0 %v937_v48  ;;  %v527_v49 = vld [vmem:[#allocation10] sm:$0x7] }
 0x1ae   :  { %1003 = vmatprep.subr.mxu1 %v861_v50  ;;  %v1301_v48 = vld [vmem:[%s5620_s11 + $0xf8] sm:$0xff] }
 0x1af   :  { %1004 = vmatpush1.msra.mxu1 %v860_v52  ;;  %v532_v52 = vrot.slane %v527_v49, %v4541_v44 }
 0x1b0   :  { %1005 = vmatprep.subr.mxu1 %v858_v53  ;;  %v536_v53 = vrot.slane %v527_v49, %v4539_v42 }
 0x1b1   :  { %1006 = vmatpush1.msra.mxu1 %v857_v54 }
 0x1b2   :  { %1007 = vmatprep.subr.mxu1 %v855_v55 }
 0x1b3   :  { %1008 = vmatpush1.msra.mxu1 %v854_v56 }
 0x1b4   :  { %1009 = vmatprep.subr.mxu1 %v852_v57 }
 0x1b5   :  { %1010 = vmatpush1.msra.mxu1 %v851_v58 }
 0x1b6   :  { %1011 = vmatprep.subr.mxu1 %v849_v59 }
 0x1b7   :  { %1012 = vmatpush1.msra.mxu1 %v848_v60 }
 0x1b8   :  { %1013 = vmatprep.subr.mxu1 %v846_v61 }
 0x1b9   :  { %1014 = vmatpush1.msra.mxu1 %v845_v62 }
 0x1ba   :  { %1015 = vmatprep.subr.mxu1 %v843_v63 }
 0x1bb   :  { %1016 = vmatpush1.msra.mxu1 %v842_v1 }
 0x1bc   :  { %1017 = vmatprep.subr.mxu1 %v936_v2 }
 0x1bd   :  { %1018 = vmatpush2.msra.mxu1 %v935_v3  ;;  %v540_v3 = vrot.slane %v527_v49, %v4549_v51  ;;  %v1285_v49 = vld [vmem:[%s5620_s11 + $0x78] sm:$0xff] }
 0x1be   :  { %1019 = vmatprep.subr.mxu1 %v933_v4 }
 0x1bf   :  { %1020 = vmatpush2.msra.mxu1 %v932_v5 }
 0x1c0   :  { %1021 = vmatprep.subr.mxu1 %v930_v6 }
 0x1c1   :  { %1022 = vmatpush2.msra.mxu1 %v929_v7 }
 0x1c2   :  { %1023 = vmatprep.subr.mxu1 %v927_v8 }
 0x1c3   :  { %1024 = vmatpush2.msra.mxu1 %v926_v9  ;;  %v889_v9 = vld [vmem:[#allocation11 + $0x178] sm:$0xff] }
 0x1c4   :  { %1025 = vmatprep.subr.mxu1 %v924_v10  ;;  %v934_v10 = vld [vmem:[#allocation11 + $0x2e0] sm:$0xff] }
 0x1c5   :  { %1026 = vmatpush2.msra.mxu1 %v923_v11  ;;  %v886_v11 = vld [vmem:[#allocation11 + $0x160] sm:$0xff] }
 0x1c6   :  { %1027 = vmatprep.subr.mxu1 %v921_v12  ;;  %v883_v12 = vld [vmem:[#allocation11 + $0x148] sm:$0xff] }
 0x1c7   :  { %1028 = vmatpush2.msra.mxu1 %v920_v13  ;;  %v928_v13 = vld [vmem:[#allocation11 + $0x2b0] sm:$0xff] }
 0x1c8   :  { %1029 = vmatprep.subr.mxu1 %v918_v14  ;;  %v880_v14 = vld [vmem:[#allocation11 + $0x130] sm:$0xff] }
 0x1c9   :  { %1030 = vmatpush2.msra.mxu1 %v917_v15  ;;  %v925_v15 = vld [vmem:[#allocation11 + $0x298] sm:$0xff] }
 0x1ca   :  { %1031 = vmatprep.subr.mxu1 %v915_v16  ;;  %v877_v16 = vld [vmem:[#allocation11 + $0x118] sm:$0xff] }
 0x1cb   :  { %1032 = vmatpush2.msra.mxu1 %v914_v17  ;;  %v922_v17 = vld [vmem:[#allocation11 + $0x280] sm:$0xff] }
 0x1cc   :  { %1033 = vmatprep.subr.mxu1 %v912_v18  ;;  %v874_v18 = vld [vmem:[#allocation11 + $0x100] sm:$0xff] }
 0x1cd   :  { %1034 = vmatpush2.msra.mxu1 %v911_v19  ;;  %v919_v19 = vld [vmem:[#allocation11 + $0x268] sm:$0xff] }
 0x1ce   :  { %1035 = vmatprep.subr.mxu1 %v909_v20  ;;  %v871_v20 = vld [vmem:[#allocation11 + $0xe8] sm:$0xff] }
 0x1cf   :  { %1036 = vmatpush2.msra.mxu1 %v908_v21  ;;  %v916_v21 = vld [vmem:[#allocation11 + $0x250] sm:$0xff] }
 0x1d0   :  { %1037 = vmatprep.subr.mxu1 %v906_v22  ;;  %v868_v22 = vld [vmem:[#allocation11 + $0xd0] sm:$0xff] }
 0x1d1   :  { %1038 = vmatpush2.msra.mxu1 %v905_v23  ;;  %v913_v23 = vld [vmem:[#allocation11 + $0x238] sm:$0xff] }
 0x1d2   :  { %1039 = vmatprep.subr.mxu1 %v903_v24  ;;  %v865_v24 = vld [vmem:[#allocation11 + $0xb8] sm:$0xff] }
 0x1d3   :  { %1040 = vmatpush2.msra.mxu1 %v902_v25  ;;  %v910_v25 = vld [vmem:[#allocation11 + $0x220] sm:$0xff] }
 0x1d4   :  { %1041 = vmatprep.subr.mxu1 %v900_v26  ;;  %v862_v26 = vld [vmem:[#allocation11 + $0xa0] sm:$0xff] }
 0x1d5   :  { %1042 = vmatpush2.msra.mxu1 %v899_v27  ;;  %v907_v27 = vld [vmem:[#allocation11 + $0x208] sm:$0xff] }
 0x1d6   :  { %1043 = vmatprep.subr.mxu1 %v897_v28  ;;  %v859_v28 = vld [vmem:[#allocation11 + $0x88] sm:$0xff] }
 0x1d7   :  { %1044 = vmatpush2.msra.mxu1 %v896_v32  ;;  %v853_v32 = vld [vmem:[#allocation11 + $0x58] sm:$0xff] }
 0x1d8   :  { %1045 = vmatprep.subr.mxu1 %v894_v34  ;;  %v850_v34 = vld [vmem:[#allocation11 + $0x40] sm:$0xff] }
 0x1d9   :  { %1046 = vmatpush2.msra.mxu1 %v893_v36  ;;  %v847_v36 = vld [vmem:[#allocation11 + $0x28] sm:$0xff] }
 0x1da   :  { %1047 = vmatprep.subr.mxu1 %v891_v38  ;;  %v844_v38 = vld [vmem:[#allocation11 + $0x10] sm:$0xff] }
 0x1db   :  { %1048 = vmatpush2.msra.mxu1 %v890_v40  ;;  %v4589_v40 = vld [vmem:[#allocation2] sm:$0xff] }
 0x1dc   :  { %3926 = vmatprep.subr.mxu1 %v4320_v0  ;;  %201 = vst.msk [vmem:[#allocation2 + $0x28] sm:$0xff] %vm196_vm9, %v4589_v40  ;;  %197 = vst.msk [vmem:[#allocation2 + $0x8] sm:$0xff] %vm196_vm9, %v4589_v40 }
 0x1dd   :  { %199 = vst.msk [vmem:[#allocation2 + $0x18] sm:$0xff] %vm196_vm9, %v4589_v40  ;;  %203 = vst.msk [vmem:[#allocation2 + $0x38] sm:$0xff] %vm196_vm9, %v4589_v40 }
 0x1de   :  { %205 = vst.msk [vmem:[#allocation2 + $0x48] sm:$0xff] %vm196_vm9, %v4589_v40  ;;  %207 = vst.msk [vmem:[#allocation2 + $0x58] sm:$0xff] %vm196_vm9, %v4589_v40 }
 0x1df   :  { %209 = vst.msk [vmem:[#allocation2 + $0x68] sm:$0xff] %vm196_vm9, %v4589_v40  ;;  %211 = vst.msk [vmem:[#allocation2 + $0x78] sm:$0xff] %vm196_vm9, %v4589_v40 }
 0x1e0   :  { %213 = vst.msk [vmem:[#allocation2 + $0x88] sm:$0xff] %vm196_vm9, %v4589_v40  ;;  %215 = vst.msk [vmem:[#allocation2 + $0x98] sm:$0xff] %vm196_vm9, %v4589_v40 }
 0x223   :  { %v623_v50 = vpop.f32.mrf.mxu0 }
 0x224   :  { %v624_v55 = vadd.f32 %v623_v50, %v532_v52  ;;  %v1300_v50 = vld [vmem:[%s5620_s11 + $0xf0] sm:$0xff] }
 0x225   :  { %v625_v54 = vpop.f32.mrf.mxu0  ;;  %v1284_v52 = vld [vmem:[%s5620_s11 + $0x70] sm:$0xff] }
 0x226   :  { %v626_v57 = vadd.f32 %v625_v54, %v536_v53  ;;  %v1299_v53 = vld [vmem:[%s5620_s11 + $0xe8] sm:$0xff] }
 0x227   :  { %v1283_v54 = vld [vmem:[%s5620_s11 + $0x68] sm:$0xff] }
 0x230   :  { %v694_v56 = vpop.f32.mrf.mxu1 }
 0x231   :  { %v4573_v58 = vadd.f32 %v694_v56, %v624_v55  ;;  %v1298_v55 = vld [vmem:[%s5620_s11 + $0xe0] sm:$0xff] }
 0x232   :  { %v696_v59 = vpop.f32.mrf.mxu1  ;;  %v1282_v56 = vld [vmem:[%s5620_s11 + $0x60] sm:$0xff] }
 0x233   :  { %v697_v60 = vadd.f32 %v696_v59, %v626_v57  ;;  %v839_v62 = vmax.f32 %v4573_v58, 0.0  ;;  %v1297_v57 = vld [vmem:[%s5620_s11 + $0xd8] sm:$0xff]  ;;  %v1296_v59 = vld [vmem:[%s5620_s11 + $0xd0] sm:$0xff] }
 0x234   :  { %v1281_v58 = vld [vmem:[%s5620_s11 + $0x58] sm:$0xff] }
 0x235   :  { %v840_v61 = vmax.f32 %v697_v60, 0.0  ;;  %v1280_v60 = vld [vmem:[%s5620_s11 + $0x50] sm:$0xff] }
 0x237   :  { %1049 = vmatprep.mubr.f32.mxu1 %v840_v61 }
 0x238   :  { %1050 = vmatmul.mubr.f32.vlgmr.msra.gmra.mxu1 %v839_v62 }
 0x239   :  { %3938 = vmatprep.mubr.msk.f32.mxu1 %vm4321_vm2, %v4320_v0  ;;  %v931_v0 = vld [vmem:[#allocation11 + $0x2c8] sm:$0xff] }
 0x250   :  { %v3783_v63 = vpop.f32.mrf.mxu1 }
 0x252   :  { %v3784_v1 = vpop.f32.mrf.mxu1 }
 0x253   :  { %v3785_v2 = vadd.f32 %v3784_v1, %v3783_v63  ;;  %v1294_v63 = vld [vmem:[%s5620_s11 + $0xc0] sm:$0xff] }
 0x254   :  { %v1278_v1 = vld [vmem:[%s5620_s11 + $0x40] sm:$0xff] }
 0x255   :  { %v766_v4 = vadd.f32 %v3785_v2, %v540_v3  ;;  %v1293_v2 = vld [vmem:[%s5620_s11 + $0xb8] sm:$0xff] }
 0x256   :  { %v1277_v3 = vld [vmem:[%s5620_s11 + $0x38] sm:$0xff] }
 0x25c   :  { %v835_v5 = vpop.f32.mrf.mxu1 }
 0x25d   :  { %v4581_v6 = vadd.f32 %v835_v5, %v766_v4  ;;  %v1292_v4 = vld [vmem:[%s5620_s11 + $0xb0] sm:$0xff] }
 0x25e   :  { %v3910_v7 = vpop.f32.mrf.mxu1  ;;  %v1276_v5 = vld [vmem:[%s5620_s11 + $0x30] sm:$0xff] }
 0x25f   :  { %v841_v8 = vmax.f32 %v4581_v6, 0.0  ;;  %v1291_v6 = vld [vmem:[%s5620_s11 + $0xa8] sm:$0xff] }
 0x260   :  { %v1275_v7 = vld [vmem:[%s5620_s11 + $0x28] sm:$0xff] }
 0x261   :  { %3661 = vmatmul.mubr.msk.f32.vlgmr.msra.gmra.mxu0 %vm544_vm3, %v841_v8 }
 0x262   :  { %3794 = vmatpush3.msra.mxu0 %v889_v9  ;;  %1191 = vmatprep.mubr.f32.mxu0 %v840_v61  ;;  %v1295_v61 = vld [vmem:[%s5620_s11 + $0xc8] sm:$0xff]  ;;  %v1274_v9 = vld [vmem:[%s5620_s11 + $0x20] sm:$0xff] }
 0x263   :  { %3795 = vmatprep.subr.mxu0 %v934_v10  ;;  %v1289_v10 = vld [vmem:[%s5620_s11 + $0x98] sm:$0xff] }
 0x264   :  { %3796 = vmatpush3.msra.mxu0 %v886_v11  ;;  %v1273_v11 = vld [vmem:[%s5620_s11 + $0x18] sm:$0xff] }
 0x265   :  { %3797 = vmatprep.subr.mxu0 %v931_v0  ;;  %v1288_v0 = vld [vmem:[%s5620_s11 + $0x90] sm:$0xff] }
 0x266   :  { %3798 = vmatpush3.msra.mxu0 %v883_v12  ;;  %v1272_v12 = vld [vmem:[%s5620_s11 + $0x10] sm:$0xff] }
 0x267   :  { %3799 = vmatprep.subr.mxu0 %v928_v13  ;;  %v1287_v13 = vld [vmem:[%s5620_s11 + $0x88] sm:$0xff] }
 0x268   :  { %3800 = vmatpush3.msra.mxu0 %v880_v14  ;;  %v1271_v14 = vld [vmem:[%s5620_s11 + $0x8] sm:$0xff] }
 0x269   :  { %3801 = vmatprep.subr.mxu0 %v925_v15  ;;  %v1286_v15 = vld [vmem:[%s5620_s11 + $0x80] sm:$0xff] }
 0x26a   :  { %3802 = vmatpush3.msra.mxu0 %v877_v16  ;;  %v1270_v16 = vld [vmem:[%s5620_s11] sm:$0xff] }
 0x26b   :  { %3803 = vmatprep.subr.mxu0 %v922_v17  ;;  %v1307_v17 = vld [vmem:[%s5620_s11 + $0x128] sm:$0xf] }
 0x26c   :  { %3804 = vmatpush3.msra.mxu0 %v874_v18  ;;  %v1306_v18 = vld [vmem:[%s5620_s11 + $0x120] sm:$0xff]  ;;  %3927 = vmatpush3.msk.msra.mxu1 %vm262_vm0, %v1307_v17 }
 0x26d   :  { %3805 = vmatprep.subr.mxu0 %v919_v19  ;;  %3928 = vmatprep.subr.mxu1 %v4589_v40  ;;  %v1305_v19 = vld [vmem:[%s5620_s11 + $0x118] sm:$0xff] }
 0x26e   :  { %3806 = vmatpush3.msra.mxu0 %v871_v20  ;;  %3929 = vmatpush3.msra.mxu1 %v1306_v18  ;;  %v1304_v20 = vld [vmem:[%s5620_s11 + $0x110] sm:$0xff] }
 0x26f   :  { %3807 = vmatprep.subr.mxu0 %v916_v21  ;;  %3930 = vmatprep.subr.mxu1 %v4589_v40  ;;  %v1303_v21 = vld [vmem:[%s5620_s11 + $0x108] sm:$0xff] }
 0x270   :  { %3808 = vmatpush3.msra.mxu0 %v868_v22  ;;  %3931 = vmatpush3.msra.mxu1 %v1305_v19  ;;  %v1302_v22 = vld [vmem:[%s5620_s11 + $0x100] sm:$0xff] }
 0x271   :  { %3809 = vmatprep.subr.mxu0 %v913_v23  ;;  %3932 = vmatprep.subr.mxu1 %v4589_v40  ;;  %v3670_v23 = vld.sshfl [vmem:[%s5637_s28] sm:$0x3 pattern:$0x76325410] }
 0x272   :  { %3810 = vmatpush3.msra.mxu0 %v865_v24  ;;  %3933 = vmatpush3.msra.mxu1 %v1304_v20  ;;  %v956_v24 = vld [vmem:[#allocation13] sm:$0x7] }
 0x273   :  { %3811 = vmatprep.subr.mxu0 %v910_v25  ;;  %3934 = vmatprep.subr.mxu1 %v4589_v40 }
 0x274   :  { %3812 = vmatpush3.msra.mxu0 %v862_v26  ;;  %3935 = vmatpush3.msra.mxu1 %v1303_v21  ;;  %v961_v26 = vrot.slane %v956_v24, %v4541_v44  ;;  %v1825_v21 = vld [vmem:[%s5614_s5 + $0x38] sm:$0x3f] }
 0x275   :  { %3813 = vmatprep.subr.mxu0 %v907_v27  ;;  %3936 = vmatprep.subr.mxu1 %v4589_v40  ;;  %v965_v27 = vrot.slane %v956_v24, %v4539_v42 }
 0x276   :  { %3814 = vmatpush3.msra.mxu0 %v859_v28  ;;  %3937 = vmatpush3.msra.mxu1 %v1302_v22  ;;  %v1824_v22 = vld [vmem:[%s5614_s5 + $0x30] sm:$0x3f] }
 0x277   :  { %3815 = vmatprep.subr.mxu0 %v904_v29  ;;  %1614 = vrot.lane.b32.xlu0 %v3670_v23, %s4322_s6  ;;  %s4340_s6 = smov 92  }
 0x278   :  { %3816 = vmatpush3.msra.mxu0 %v856_v30  ;;  %1846 = vrot.lane.b32.xlu1 %v3670_v23, %s4324_s0  ;;  %s4331_s0 = smov 20  }
 0x279   :  { %3817 = vmatprep.subr.mxu0 %v901_v31 }
 0x27a   :  { %3818 = vmatpush3.msra.mxu0 %v853_v32 }
 0x27b   :  { %3819 = vmatprep.subr.mxu0 %v898_v33  ;;  %1730 = vrot.lane.b32.xlu0 %v3670_v23, %s4323_s4 }
 0x27c   :  { %3820 = vmatpush3.msra.mxu0 %v850_v34 }
 0x27d   :  { %3821 = vmatprep.subr.mxu0 %v895_v35 }
 0x27e   :  { %3822 = vmatpush3.msra.mxu0 %v847_v36 }
 0x27f   :  { %3823 = vmatprep.subr.mxu0 %v892_v37 }
 0x280   :  { %3824 = vmatpush3.msra.mxu0 %v844_v38 }
 0x281   :  { %1192 = vmatmul.mubr.f32.vlgmr.msra.gmra.mxu0 %v839_v62  ;;  %3911 = vmatprep.subr.mxu0 %v4589_v40  ;;  %v1279_v62 = vld [vmem:[%s5620_s11 + $0x48] sm:$0xff] }
 0x282   :  { %3912 = vmatpush3.msk.msra.mxu0 %vm262_vm0, %v955_v39  ;;  %3923 = vmatprep.mubr.msk.f32.mxu0 %vm4321_vm2, %v4589_v40  ;;  %vm3469_vm0 = vcmask 287936   ;;  %vm3517_vm2 = vcmask 484736  }
 0x283   :  { %3913 = vmatprep.subr.mxu0 %v4589_v40 }
 0x284   :  { %3914 = vmatpush3.msra.mxu0 %v952_v41  ;;  %v969_v41 = vrot.slane %v956_v24, %v4549_v51  ;;  %v1481_v51 = vld [vmem:[%s5614_s5 + $0x38] sm:$0x3f] }
 0x285   :  { %3915 = vmatprep.subr.mxu0 %v4589_v40  ;;  %3667 = vmatprep.subr.msk.mxu1 %vm1498_vm4, %v1481_v51  ;;  %v2178_v24 = vld [vmem:[%s5614_s5 + $0x38] sm:$0x3f] }
 0x286   :  { %3916 = vmatpush3.msra.mxu0 %v949_v43 }
 0x287   :  { %3917 = vmatprep.subr.mxu0 %v4589_v40 }
 0x288   :  { %3918 = vmatpush3.msra.mxu0 %v946_v45 }
 0x289   :  { %3919 = vmatprep.subr.mxu0 %v4589_v40 }
 0x28a   :  { %3920 = vmatpush3.msra.mxu0 %v943_v46 }
 0x28b   :  { %3921 = vmatprep.subr.mxu0 %v4589_v40 }
 0x28c   :  { %3922 = vmatpush3.msra.mxu0 %v940_v47 }
 0x28d   :  { %3924 = vmatmul.mubr.msk.f32.vlgmr.msra.gmra.mxu0 %vm544_vm3, %v841_v8  ;;  %3835 = vmatprep.subr.mxu0 %v1301_v48  ;;  %v1290_v8 = vld [vmem:[%s5620_s11 + $0xa0] sm:$0xff]  ;;  %s4360_s11 = smov 60  }
 0x28e   :  { %3836 = vmatpush3.msra.mxu0 %v1285_v49  ;;  %v3682_v49 = vld.sshfl [vmem:[%s5637_s28] sm:$0x33 pattern:$0x76325410] }
 0x28f   :  { %3837 = vmatprep.subr.mxu0 %v1300_v50  ;;  %v1962_v50 = vcombine.high %v3682_v49, %v3682_v49  ;;  %1963 = vrot.lane.b32.xlu1 %v3682_v49, %s4325_s30 }
 0x290   :  { %3838 = vmatpush3.msra.mxu0 %v1284_v52  ;;  %v1480_v52 = vld [vmem:[%s5614_s5 + $0x30] sm:$0x3f] }
 0x291   :  { %3839 = vmatprep.subr.mxu0 %v1299_v53  ;;  %1965 = vrot.lane.b32.xlu0 %v1962_v50, %s4325_s30  ;;  %v4745_v53 = vld [vmem:[%s5614_s5 + $0x28] sm:$0xff]  ;;  %s4326_s30 = smov 106  }
 0x292   :  { %3840 = vmatpush3.msra.mxu0 %v1283_v54  ;;  %v4751_v54 = vld [vmem:[%s5614_s5 + $0x20] sm:$0xff] }
 0x293   :  { %3841 = vmatprep.subr.mxu0 %v1298_v55  ;;  %v4757_v55 = vld [vmem:[%s5614_s5 + $0x18] sm:$0xff] }
 0x294   :  { %3842 = vmatpush3.msra.mxu0 %v1282_v56  ;;  %v4763_v56 = vld [vmem:[%s5614_s5 + $0x10] sm:$0xff] }
 0x295   :  { %3843 = vmatprep.subr.mxu0 %v1297_v57  ;;  %v4769_v57 = vld [vmem:[%s5614_s5 + $0x8] sm:$0xff] }
 0x296   :  { %3844 = vmatpush3.msra.mxu0 %v1281_v58  ;;  %v4775_v58 = vld [vmem:[%s5614_s5] sm:$0xff] }
 0x297   :  { %3845 = vmatprep.subr.mxu0 %v1296_v59  ;;  %v3686_v59 = vld.sshfl [vmem:[%s5637_s28 + $0x2] sm:$0x3 pattern:$0x76325410] }
 0x298   :  { %3846 = vmatpush3.msra.mxu0 %v1280_v60  ;;  %v1593_v60 = vld [vmem:[%s5614_s5 + $0x38] sm:$0x3f]  ;;  %2083 = vrot.lane.b32.xlu1 %v3686_v59, %s4326_s30  ;;  %s4332_s30 = smov 22  }
 0x299   :  { %3847 = vmatprep.subr.mxu0 %v1295_v61  ;;  %v1473_v61 = vld [vmem:[%s5637_s28] sm:$0x3] }
 0x29a   :  { %3848 = vmatpush3.msra.mxu0 %v1279_v62  ;;  %v1592_v62 = vld [vmem:[%s5614_s5 + $0x30] sm:$0x3f] }
 0x29b   :  { %3849 = vmatprep.subr.mxu0 %v1294_v63 }
 0x29c   :  { %3850 = vmatpush3.msra.mxu0 %v1278_v1  ;;  %2199 = vrot.lane.b32.xlu1 %v3686_v59, %s4327_s21  ;;  %v1709_v1 = vld [vmem:[%s5614_s5 + $0x38] sm:$0x3f]  ;;  %s4336_s21 = smov 18  }
 0x29d   :  { %3851 = vmatprep.subr.mxu0 %v1293_v2  ;;  %v1708_v2 = vld [vmem:[%s5614_s5 + $0x30] sm:$0x3f] }
 0x29e   :  { %3852 = vmatpush3.msra.mxu0 %v1277_v3  ;;  %v3698_v3 = vld.sshfl [vmem:[%s5637_s28 + $0x2] sm:$0x33 pattern:$0x76325410] }
 0x29f   :  { %3853 = vmatprep.subr.mxu0 %v1292_v4  ;;  %v2431_v4 = vcombine.high %v3698_v3, %v3698_v3 }
 0x2a0   :  { %3854 = vmatpush3.msra.mxu0 %v1276_v5  ;;  %2315 = vrot.lane.b32.xlu1 %v3686_v59, %s4328_s7  ;;  %v1941_v5 = vld [vmem:[%s5614_s5 + $0x38] sm:$0x3f] }
 0x2a1   :  { %3855 = vmatprep.subr.mxu0 %v1291_v6  ;;  %v3702_v6 = vld.sshfl [vmem:[%s5637_s28 + $0x4] sm:$0x3 pattern:$0x76325410]  ;;  %s4357_s28 = smov 12  }
 0x2a2   :  { %3856 = vmatpush3.msra.mxu0 %v1275_v7  ;;  %v1940_v7 = vld [vmem:[%s5614_s5 + $0x30] sm:$0x3f] }
 0x2a3   :  { %3857 = vmatprep.subr.mxu0 %v1290_v8 }
 0x2a4   :  { %3858 = vmatpush3.msra.mxu0 %v1274_v9  ;;  %2432 = vrot.lane.b32.xlu1 %v3698_v3, %s4329_s18  ;;  %v1942_v3 = vld [vmem:[#allocation7] sm:$0x3] }
 0x2a5   :  { %3859 = vmatprep.subr.mxu0 %v1289_v10 }
 0x2a6   :  { %3860 = vmatpush3.msra.mxu0 %v1273_v11 }
 0x2a7   :  { %3861 = vmatprep.subr.mxu0 %v1288_v0 }
 0x2a8   :  { %3862 = vmatpush3.msra.mxu0 %v1272_v12  ;;  %2434 = vrot.lane.b32.xlu1 %v2431_v4, %s4329_s18 }
 0x2a9   :  { %3863 = vmatprep.subr.mxu0 %v1287_v13 }
 0x2aa   :  { %3864 = vmatpush3.msra.mxu0 %v1271_v14 }
 0x2ab   :  { %3865 = vmatprep.subr.mxu0 %v1286_v15  ;;  %v3664_v15 = vld [vmem:[#allocation14] ss:$0 sm:$0xff] }
 0x2ac   :  { %3866 = vmatpush3.msra.mxu0 %v1270_v16  ;;  %2552 = vrot.lane.b32.xlu1 %v3702_v6, %s4330_s26  ;;  %v1951_v6 = vrot.slane %v1942_v3, %v4539_v42 }
 0x2ad   :  { %3679 = vmatprep.subr.msk.mxu0 %vm1498_vm4, %v1825_v21  ;;  %v2681_v21 = vld [vmem:[%s5622_s13 + $0xb0] sm:$0xff] }
 0x2e9   :  { %v1615_v63 = vpop.permute.xlu0 %1614 }
 0x2ea   :  { %v1847_v9 = vpop.permute.xlu1 %1846 }
 0x2ed   :  { %v1731_v8 = vpop.permute.xlu0 %1730 }
 0x2f8   :  { %v1051_v25 = vpop.f32.mrf.mxu1 }
 0x2f9   :  { %v1052_v29 = vadd.f32 %v1051_v25, %v961_v26  ;;  %v2177_v25 = vld [vmem:[%s5614_s5 + $0x30] sm:$0x3f] }
 0x2fa   :  { %v1053_v28 = vpop.f32.mrf.mxu1 }
 0x2fb   :  { %v1054_v31 = vadd.f32 %v1053_v28, %v965_v27  ;;  %v2062_v27 = vld [vmem:[%s5614_s5 + $0x38] sm:$0x3f]  ;;  %v2061_v28 = vld [vmem:[%s5614_s5 + $0x30] sm:$0x3f] }
 0x301   :  { %v1964_v10 = vpop.permute.xlu1 %1963 }
 0x303   :  { %v1966_v11 = vpop.permute.xlu0 %1965 }
 0x304   :  { %v1968_v0 = vsel %vm1967_vm6, %v1964_v10, %v1966_v11  ;;  %vm3613_vm6 = vcmask 878336  }
 0x30a   :  { %v2084_v23 = vpop.permute.xlu1 %2083 }
 0x30e   :  { %v2200_v26 = vpop.permute.xlu1 %2199 }
 0x321   :  { %v1122_v30 = vpop.f32.mrf.mxu0 }
 0x322   :  { %v1123_v32 = vadd.f32 %v1122_v30, %v1052_v29  ;;  %v2316_v29 = vpop.permute.xlu1 %2315  ;;  %v2410_v30 = vld [vmem:[%s5614_s5 + $0x38] sm:$0x3f] }
 0x323   :  { %v1124_v33 = vpop.f32.mrf.mxu0 }
 0x324   :  { %v1125_v34 = vadd.f32 %v1124_v33, %v1054_v31  ;;  %v1267_v36 = vmax.f32 %v1123_v32, 0.0  ;;  %v2409_v31 = vld [vmem:[%s5614_s5 + $0x30] sm:$0x3f]  ;;  %v2294_v33 = vld [vmem:[%s5614_s5 + $0x38] sm:$0x3f] }
 0x326   :  { %v1268_v35 = vmax.f32 %v1125_v34, 0.0  ;;  %v2433_v32 = vpop.permute.xlu1 %2432  ;;  %v2293_v34 = vld [vmem:[%s5614_s5 + $0x30] sm:$0x3f] }
 0x328   :  { %1385 = vmatprep.mubr.f32.mxu0 %v1268_v35 }
 0x329   :  { %1386 = vmatmul.mubr.f32.vlgmr.msra.gmra.mxu0 %v1267_v36 }
 0x32a   :  { %1920 = vmatprep.mubr.f32.mxu0 %v4589_v40  ;;  %3680 = vmatpush1.msk.msra.mxu0 %vm1498_vm4, %v1824_v22  ;;  %v2435_v35 = vpop.permute.xlu1 %2434  ;;  %v2680_v22 = vld [vmem:[%s5622_s13 + $0xa8] sm:$0xff] }
 0x32b   :  { %1882 = vmatprep.subr.mxu0 %v4745_v53  ;;  %v2437_v36 = vsel %vm2436_vm8, %v2433_v32, %v2435_v35  ;;  %v2179_v32 = vld [vmem:[#allocation7] sm:$0x3] }
 0x32c   :  { %1883 = vmatpush1.msra.mxu0 %v4751_v54 }
 0x32d   :  { %1884 = vmatprep.subr.mxu0 %v4757_v55 }
 0x32e   :  { %1885 = vmatpush1.msra.mxu0 %v4763_v56 }
 0x32f   :  { %1886 = vmatprep.subr.mxu0 %v4769_v57 }
 0x330   :  { %1887 = vmatpush1.msra.mxu0 %v4775_v58 }
 0x331   :  { %3681 = vmatmul.mubr.msk.f32.vlgmr.msra.gmra.mxu0 %vm1494_vm5, %v1847_v9  ;;  %3687 = vmatprep.subr.msk.mxu0 %vm1498_vm4, %v2062_v27  ;;  %v1826_v27 = vld [vmem:[#allocation7] sm:$0x3] }
 0x332   :  { %3688 = vmatpush1.msk.msra.mxu0 %vm1498_vm4, %v2061_v28  ;;  %2157 = vmatprep.mubr.f32.mxu0 %v4589_v40  ;;  %v2675_v28 = vld [vmem:[%s5622_s13 + $0x80] sm:$0xff]  ;;  %v1835_v35 = vrot.slane %v1826_v27, %v4539_v42 }
 0x333   :  { %2119 = vmatprep.subr.mxu0 %v4745_v53 }
 0x334   :  { %2120 = vmatpush1.msra.mxu0 %v4751_v54 }
 0x335   :  { %2121 = vmatprep.subr.mxu0 %v4757_v55 }
 0x336   :  { %2122 = vmatpush1.msra.mxu0 %v4763_v56 }
 0x337   :  { %2123 = vmatprep.subr.mxu0 %v4769_v57 }
 0x338   :  { %2124 = vmatpush1.msra.mxu0 %v4775_v58 }
 0x339   :  { %3689 = vmatmul.mubr.msk.f32.vlgmr.msra.gmra.mxu0 %vm1494_vm5, %v2084_v23  ;;  %3695 = vmatprep.subr.msk.mxu0 %vm1498_vm4, %v2294_v33  ;;  %v2679_v23 = vld [vmem:[%s5622_s13 + $0xa0] sm:$0xff]  ;;  %v2672_v33 = vld [vmem:[%s5622_s13 + $0x68] sm:$0xff] }
 0x33a   :  { %3696 = vmatpush1.msk.msra.mxu0 %vm1498_vm4, %v2293_v34  ;;  %2389 = vmatprep.mubr.f32.mxu0 %v4589_v40  ;;  %v2671_v34 = vld [vmem:[%s5622_s13 + $0x60] sm:$0xff] }
 0x33b   :  { %2351 = vmatprep.subr.mxu0 %v4745_v53 }
 0x33c   :  { %2352 = vmatpush1.msra.mxu0 %v4751_v54 }
 0x33d   :  { %2353 = vmatprep.subr.mxu0 %v4757_v55 }
 0x33e   :  { %2354 = vmatpush1.msra.mxu0 %v4763_v56 }
 0x33f   :  { %2355 = vmatprep.subr.mxu0 %v4769_v57 }
 0x340   :  { %2356 = vmatpush1.msra.mxu0 %v4775_v58 }
 0x341   :  { %v3825_v37 = vpop.f32.mrf.mxu0  ;;  %3697 = vmatmul.mubr.msk.f32.vlgmr.msra.gmra.mxu0 %vm1494_vm5, %v2316_v29  ;;  %v2674_v29 = vld [vmem:[%s5622_s13 + $0x78] sm:$0xff] }
 0x342   :  { %2626 = vmatprep.mubr.f32.mxu0 %v4589_v40 }
 0x343   :  { %v3826_v38 = vpop.f32.mrf.mxu0 }
 0x344   :  { %v3827_v39 = vadd.f32 %v3826_v38, %v3825_v37  ;;  %v2531_v37 = vld [vmem:[%s5614_s5 + $0x38] sm:$0x3f]  ;;  %v2530_v38 = vld [vmem:[%s5614_s5 + $0x30] sm:$0x3f]  ;;  %s5638_s5 = sld [smem:[#allocation28_spill]] }
 0x345   :  { %3703 = vmatprep.subr.msk.mxu0 %vm1498_vm4, %v2531_v37 }
 0x346   :  { %v1194_v43 = vadd.f32 %v3827_v39, %v969_v41  ;;  %3704 = vmatpush1.msk.msra.mxu0 %vm1498_vm4, %v2530_v38  ;;  %v2553_v39 = vpop.permute.xlu1 %2552  ;;  %v1482_v41 = vld [vmem:[#allocation7] sm:$0x3]  ;;  %v2184_v38 = vrot.slane %v2179_v32, %v4541_v44 }
 0x347   :  { %2588 = vmatprep.subr.mxu0 %v4745_v53 }
 0x348   :  { %2589 = vmatpush1.msra.mxu0 %v4751_v54 }
 0x349   :  { %2590 = vmatprep.subr.mxu0 %v4757_v55 }
 0x34a   :  { %2591 = vmatpush1.msra.mxu0 %v4763_v56 }
 0x34b   :  { %2592 = vmatprep.subr.mxu0 %v4769_v57 }
 0x34c   :  { %2593 = vmatpush1.msra.mxu0 %v4775_v58 }
 0x34d   :  { %v1263_v45 = vpop.f32.mrf.mxu0  ;;  %3705 = vmatmul.mubr.msk.f32.vlgmr.msra.gmra.mxu0 %vm1494_vm5, %v2553_v39  ;;  %v2669_v39 = vld [vmem:[%s5622_s13 + $0x50] sm:$0xff] }
 0x34e   :  { %v1264_v46 = vadd.f32 %v1263_v45, %v1194_v43  ;;  %v1487_v43 = vrot.slane %v1482_v41, %v4541_v44 }
 0x34f   :  { %v3925_v47 = vpop.f32.mrf.mxu0 }
 0x350   :  { %v1269_v48 = vmax.f32 %v1264_v46, 0.0  ;;  %v1594_v47 = vld [vmem:[#allocation7] sm:$0x3] }
 0x351   :  { %v1599_v49 = vrot.slane %v1594_v47, %v4541_v44 }
 0x352   :  { %3939 = vmatmul.mubr.msk.f32.vlgmr.msra.gmra.mxu1 %vm544_vm3, %v1269_v48  ;;  %vm3541_vm3 = vcmask 583136  }
 0x353   :  { %1569 = vmatprep.mubr.f32.mxu1 %v4589_v40  ;;  %3668 = vmatpush1.msk.msra.mxu1 %vm1498_vm4, %v1480_v52  ;;  %v1710_v52 = vld [vmem:[#allocation7] sm:$0x3] }
 0x354   :  { %1531 = vmatprep.subr.mxu1 %v4745_v53 }
 0x355   :  { %1532 = vmatpush1.msra.mxu1 %v4751_v54 }
 0x356   :  { %1533 = vmatprep.subr.mxu1 %v4757_v55 }
 0x357   :  { %1534 = vmatpush1.msra.mxu1 %v4763_v56 }
 0x358   :  { %1535 = vmatprep.subr.mxu1 %v4769_v57 }
 0x359   :  { %1536 = vmatpush1.msra.mxu1 %v4775_v58 }
 0x35a   :  { %3671 = vmatprep.subr.msk.mxu1 %vm1498_vm4, %v1593_v60  ;;  %3669 = vmatmul.mubr.msk.f32.vlgmr.msra.gmra.mxu1 %vm1494_vm5, %v1473_v61 }
 0x35b   :  { %3672 = vmatpush1.msk.msra.mxu1 %vm1498_vm4, %v1592_v62  ;;  %1688 = vmatprep.mubr.f32.mxu1 %v4589_v40 }
 0x35c   :  { %1650 = vmatprep.subr.mxu1 %v4745_v53 }
 0x35d   :  { %1651 = vmatpush1.msra.mxu1 %v4751_v54 }
 0x35e   :  { %1652 = vmatprep.subr.mxu1 %v4757_v55 }
 0x35f   :  { %1653 = vmatpush1.msra.mxu1 %v4763_v56 }
 0x360   :  { %1654 = vmatprep.subr.mxu1 %v4769_v57 }
 0x361   :  { %1655 = vmatpush1.msra.mxu1 %v4775_v58 }
 0x362   :  { %3675 = vmatprep.subr.msk.mxu1 %vm1498_vm4, %v1709_v1  ;;  %3673 = vmatmul.mubr.msk.f32.vlgmr.msra.gmra.mxu1 %vm1494_vm5, %v1615_v63 }
 0x363   :  { %3676 = vmatpush1.msk.msra.mxu1 %vm1498_vm4, %v1708_v2  ;;  %1804 = vmatprep.mubr.f32.mxu1 %v4589_v40 }
 0x364   :  { %1766 = vmatprep.subr.mxu1 %v4745_v53 }
 0x365   :  { %1767 = vmatpush1.msra.mxu1 %v4751_v54 }
 0x366   :  { %1768 = vmatprep.subr.mxu1 %v4757_v55 }
 0x367   :  { %1769 = vmatpush1.msra.mxu1 %v4763_v56 }
 0x368   :  { %1770 = vmatprep.subr.mxu1 %v4769_v57 }
 0x369   :  { %1771 = vmatpush1.msra.mxu1 %v4775_v58 }
 0x36a   :  { %3683 = vmatprep.subr.msk.mxu1 %vm1498_vm4, %v1941_v5  ;;  %3677 = vmatmul.mubr.msk.f32.vlgmr.msra.gmra.mxu1 %vm1494_vm5, %v1731_v8  ;;  %v1947_v5 = vrot.slane %v1942_v3, %v4541_v44 }
 0x36b   :  { %3684 = vmatpush1.msk.msra.mxu1 %vm1498_vm4, %v1940_v7  ;;  %2041 = vmatprep.mubr.f32.mxu1 %v4589_v40 }
 0x36c   :  { %2003 = vmatprep.subr.mxu1 %v4745_v53 }
 0x36d   :  { %2004 = vmatpush1.msra.mxu1 %v4751_v54 }
 0x36e   :  { %2005 = vmatprep.subr.mxu1 %v4757_v55 }
 0x36f   :  { %2006 = vmatpush1.msra.mxu1 %v4763_v56 }
 0x370   :  { %2007 = vmatprep.subr.mxu1 %v4769_v57 }
 0x371   :  { %2008 = vmatpush1.msra.mxu1 %v4775_v58 }
 0x372   :  { %3685 = vmatmul.mubr.msk.f32.vlgmr.msra.gmra.mxu1 %vm1494_vm5, %v1968_v0  ;;  %3691 = vmatprep.subr.msk.mxu1 %vm1498_vm4, %v2178_v24  ;;  %v2678_v24 = vld [vmem:[%s5622_s13 + $0x98] sm:$0xff] }
 0x373   :  { %2273 = vmatprep.mubr.f32.mxu1 %v4589_v40  ;;  %3692 = vmatpush1.msk.msra.mxu1 %vm1498_vm4, %v2177_v25  ;;  %v2677_v25 = vld [vmem:[%s5622_s13 + $0x90] sm:$0xff] }
 0x374   :  { %2235 = vmatprep.subr.mxu1 %v4745_v53 }
 0x375   :  { %2236 = vmatpush1.msra.mxu1 %v4751_v54 }
 0x376   :  { %2237 = vmatprep.subr.mxu1 %v4757_v55 }
 0x377   :  { %2238 = vmatpush1.msra.mxu1 %v4763_v56 }
 0x378   :  { %2239 = vmatprep.subr.mxu1 %v4769_v57 }
 0x379   :  { %2240 = vmatpush1.msra.mxu1 %v4775_v58 }
 0x37a   :  { %3693 = vmatmul.mubr.msk.f32.vlgmr.msra.gmra.mxu1 %vm1494_vm5, %v2200_v26  ;;  %3699 = vmatprep.subr.msk.mxu1 %vm1498_vm4, %v2410_v30  ;;  %v2676_v26 = vld [vmem:[%s5622_s13 + $0x88] sm:$0xff]  ;;  %v2673_v30 = vld [vmem:[%s5622_s13 + $0x70] sm:$0xff] }
 0x37b   :  { %3700 = vmatpush1.msk.msra.mxu1 %vm1498_vm4, %v2409_v31  ;;  %2510 = vmatprep.mubr.f32.mxu1 %v4589_v40  ;;  %v1831_v31 = vrot.slane %v1826_v27, %v4541_v44  ;;  %vm3565_vm4 = vcmask 681536  }
 0x37c   :  { %2472 = vmatprep.subr.mxu1 %v4745_v53 }
 0x37d   :  { %2473 = vmatpush1.msra.mxu1 %v4751_v54  ;;  %v1491_v54 = vrot.slane %v1482_v41, %v4539_v42 }
 0x37e   :  { %2474 = vmatprep.subr.mxu1 %v4757_v55  ;;  %v1603_v55 = vrot.slane %v1594_v47, %v4539_v42  ;;  %v2188_v47 = vrot.slane %v2179_v32, %v4539_v42  ;;  %v2691_v32 = vld [vmem:[%s5622_s13 + $0x100] sm:$0xff] }
 0x37f   :  { %2475 = vmatpush1.msra.mxu1 %v4763_v56  ;;  %v1715_v56 = vrot.slane %v1710_v52, %v4541_v44 }
 0x380   :  { %2476 = vmatprep.subr.mxu1 %v4769_v57 }
 0x381   :  { %2477 = vmatpush1.msra.mxu1 %v4775_v58  ;;  %v1719_v58 = vrot.slane %v1710_v52, %v4539_v42 }
 0x382   :  { %3701 = vmatmul.mubr.msk.f32.vlgmr.msra.gmra.mxu1 %vm1494_vm5, %v2437_v36  ;;  %v2670_v36 = vld [vmem:[%s5622_s13 + $0x58] sm:$0xff]  ;;  %vm3589_vm5 = vcmask 779936  }
 0x3e9   :  { %v3867_v12 = vpop.f32.mrf.mxu0 }
 0x3eb   :  { %v3868_v13 = vpop.f32.mrf.mxu0 }
 0x3ec   :  { %v3869_v14 = vadd.f32 %v3868_v13, %v3867_v12  ;;  %v2690_v12 = vld [vmem:[%s5622_s13 + $0xf8] sm:$0xff]  ;;  %v2689_v13 = vld [vmem:[%s5622_s13 + $0xf0] sm:$0xff] }
 0x3ed   :  { %2746 = vmatprep.subr.mxu1 %v2690_v12 }
 0x3ee   :  { %v1388_v16 = vadd.f32 %v3869_v14, %v3664_v15  ;;  %v2688_v14 = vld [vmem:[%s5622_s13 + $0xe8] sm:$0xff]  ;;  %v2687_v15 = vld [vmem:[%s5622_s13 + $0xe0] sm:$0xff]  ;;  %2747 = vmatpush1.msra.mxu1 %v2689_v13 }
 0x3ef   :  { %2748 = vmatprep.subr.mxu1 %v2688_v14 }
 0x3f0   :  { %2749 = vmatpush1.msra.mxu1 %v2687_v15 }
 0x3f1   :  { %v1922_v37 = vpop.f32.mrf.mxu0 }
 0x3f2   :  { %v1923_v41 = vadd.f32 %v1922_v37, %v1831_v31  ;;  %v2692_v31 = vld [vmem:[%s5622_s13 + $0x108] sm:$0xff]  ;;  %v2919_v37 = vld [vmem:[%s5624_s15 + $0xe0] sm:$0xff] }
 0x3f4   :  { %1927 = vst [vmem:[#allocation2 + $0x30] sm:$0x3] %v1923_v41  ;;  %v2916_v41 = vld [vmem:[%s5624_s15 + $0xc8] sm:$0xff] }
 0x412   :  { %v1457_v17 = vpop.f32.mrf.mxu1 }
 0x413   :  { %v4844_v18 = vadd.f32 %v1457_v17, %v1388_v16  ;;  %v2686_v16 = vld [vmem:[%s5622_s13 + $0xd8] sm:$0xff]  ;;  %v2685_v17 = vld [vmem:[%s5622_s13 + $0xd0] sm:$0xff] }
 0x414   :  { %v3940_v19 = vpop.f32.mrf.mxu1  ;;  %2750 = vmatprep.subr.mxu1 %v2686_v16 }
 0x415   :  { %v1462_v20 = vsel %vm1461_vm7, %v4844_v18, -inf  ;;  %v2683_v19 = vld [vmem:[%s5622_s13 + $0xc0] sm:$0xff]  ;;  %2751 = vmatpush1.msra.mxu1 %v2685_v17  ;;  %v2661_v17 = vld [vmem:[%s5622_s13 + $0x10] sm:$0xff] }
 0x416   :  { %1463 = vmax.xlane.f32.xlu0 %v1462_v20  ;;  %v2682_v20 = vld [vmem:[%s5622_s13 + $0xb8] sm:$0xff] }
 0x41a   :  { %v1571_v45 = vpop.f32.mrf.mxu1 }
 0x41b   :  { %v1572_v46 = vadd.f32 %v1571_v45, %v1487_v43  ;;  %v2668_v43 = vld [vmem:[%s5622_s13 + $0x48] sm:$0xff]  ;;  %v1924_v45 = vpop.f32.mrf.mxu0 }
 0x41c   :  { %v1573_v48 = vpop.f32.mrf.mxu1 }
 0x41d   :  { %1576 = vst [vmem:[#allocation2] sm:$0x3] %v1572_v46  ;;  %v1574_v61 = vadd.f32 %v1573_v48, %v1491_v54  ;;  %v2063_v46 = vld [vmem:[#allocation7] sm:$0x3] }
 0x41e   :  { %v2667_v48 = vld [vmem:[%s5622_s13 + $0x40] sm:$0xff]  ;;  %v2068_v54 = vrot.slane %v2063_v46, %v4541_v44 }
 0x41f   :  { %1578 = vst.msk [vmem:[#allocation2 + $0x8] sm:$0x3] %vm1577_vm10, %v1574_v61  ;;  %v2159_v61 = vpop.f32.mrf.mxu0 }
 0x422   :  { %v1690_v50 = vpop.f32.mrf.mxu1 }
 0x423   :  { %v1691_v51 = vadd.f32 %v1690_v50, %v1599_v49  ;;  %v1925_v49 = vadd.f32 %v1924_v45, %v1835_v35  ;;  %v2921_v35 = vld [vmem:[%s5624_s15 + $0xf0] sm:$0xff]  ;;  %v2914_v45 = vld [vmem:[%s5624_s15 + $0xb8] sm:$0xff] }
 0x424   :  { %v1692_v53 = vpop.f32.mrf.mxu1 }
 0x425   :  { %1695 = vst [vmem:[#allocation2 + $0x10] sm:$0x3] %v1691_v51  ;;  %v1693_v62 = vadd.f32 %v1692_v53, %v1603_v55  ;;  %v2666_v51 = vld [vmem:[%s5622_s13 + $0x38] sm:$0xff]  ;;  %v2665_v53 = vld [vmem:[%s5622_s13 + $0x30] sm:$0xff]  ;;  %1928 = vst.msk [vmem:[#allocation2 + $0x38] sm:$0x3] %vm1577_vm10, %v1925_v49 }
 0x426   :  { %v2910_v49 = vld [vmem:[%s5624_s15 + $0x98] sm:$0xff] }
 0x427   :  { %1696 = vst.msk [vmem:[#allocation2 + $0x18] sm:$0x3] %vm1577_vm10, %v1693_v62  ;;  %v2160_v62 = vadd.f32 %v2159_v61, %v2068_v54  ;;  %v2905_v54 = vld [vmem:[%s5624_s15 + $0x70] sm:$0xff]  ;;  %v2898_v61 = vld [vmem:[%s5624_s15 + $0x38] sm:$0xff] }
 0x429   :  { %2164 = vst [vmem:[#allocation2 + $0x50] sm:$0x3] %v2160_v62  ;;  %v2897_v62 = vld [vmem:[%s5624_s15 + $0x30] sm:$0xff] }
 0x42a   :  { %v1806_v60 = vpop.f32.mrf.mxu1 }
 0x42b   :  { %v1807_v63 = vadd.f32 %v1806_v60, %v1715_v56  ;;  %v2664_v56 = vld [vmem:[%s5622_s13 + $0x28] sm:$0xff]  ;;  %v2662_v60 = vld [vmem:[%s5622_s13 + $0x18] sm:$0xff] }
 0x42c   :  { %v1808_v2 = vpop.f32.mrf.mxu1 }
 0x42d   :  { %1811 = vst [vmem:[#allocation2 + $0x20] sm:$0x3] %v1807_v63  ;;  %v1809_v4 = vadd.f32 %v1808_v2, %v1719_v58  ;;  %v2663_v58 = vld [vmem:[%s5622_s13 + $0x20] sm:$0xff] }
 0x42e   :  { %v2411_v63 = vld [vmem:[#allocation7] sm:$0x3] }
 0x42f   :  { %1812 = vst.msk [vmem:[#allocation2 + $0x28] sm:$0x3] %vm1577_vm10, %v1809_v4  ;;  %v2295_v2 = vld [vmem:[#allocation7] sm:$0x3]  ;;  %v2416_v4 = vrot.slane %v2411_v63, %v4541_v44 }
 0x432   :  { %v2043_v7 = vpop.f32.mrf.mxu1 }
 0x433   :  { %v2044_v8 = vadd.f32 %v2043_v7, %v1947_v5  ;;  %v2300_v5 = vrot.slane %v2295_v2, %v4541_v44  ;;  %v2304_v7 = vrot.slane %v2295_v2, %v4539_v42  ;;  %v2894_v2 = vld [vmem:[%s5624_s15 + $0x18] sm:$0xff] }
 0x434   :  { %v2045_v9 = vpop.f32.mrf.mxu1 }
 0x435   :  { %2048 = vst [vmem:[#allocation2 + $0x40] sm:$0x3] %v2044_v8  ;;  %v2046_v10 = vadd.f32 %v2045_v9, %v1951_v6  ;;  %v2420_v6 = vrot.slane %v2411_v63, %v4539_v42  ;;  %v2896_v63 = vld [vmem:[%s5624_s15 + $0x28] sm:$0xff] }
 0x437   :  { %2049 = vst.msk [vmem:[#allocation2 + $0x48] sm:$0x3] %vm1577_vm10, %v2046_v10 }
 0x43a   :  { %v2275_v50 = vpop.f32.mrf.mxu1 }
 0x43b   :  { %v2276_v52 = vadd.f32 %v2275_v50, %v2184_v38  ;;  %v2918_v38 = vld [vmem:[%s5624_s15 + $0xd8] sm:$0xff]  ;;  %v2909_v50 = vld [vmem:[%s5624_s15 + $0x90] sm:$0xff] }
 0x43c   :  { %v2277_v55 = vpop.f32.mrf.mxu1 }
 0x43d   :  { %2280 = vst [vmem:[#allocation2 + $0x60] sm:$0x3] %v2276_v52  ;;  %v2907_v52 = vld [vmem:[%s5624_s15 + $0x80] sm:$0xff] }
 0x442   :  { %v2512_v8 = vpop.f32.mrf.mxu1 }
 0x443   :  { %v2513_v10 = vadd.f32 %v2512_v8, %v2416_v4 }
 0x444   :  { %v2514_v12 = vpop.f32.mrf.mxu1 }
 0x445   :  { %2517 = vst [vmem:[#allocation2 + $0x80] sm:$0x3] %v2513_v10  ;;  %v2515_v14 = vadd.f32 %v2514_v12, %v2420_v6  ;;  %v2639_v10 = vld [vmem:[#allocation2] sm:$0xff] }
 0x447   :  { %2518 = vst.msk [vmem:[#allocation2 + $0x88] sm:$0x3] %vm1577_vm10, %v2515_v14 }
 0x49f   :  { %v1464_v57 = vpop.xlane.xlu0 %1463 }
 0x4a0   :  { %v1465_v59 = vsub.f32 %v4844_v18, %v1464_v57  ;;  %v2684_v18 = vld [vmem:[%s5622_s13 + $0xc8] sm:$0xff]  ;;  %v2278_v57 = vadd.f32 %v2277_v55, %v2188_v47 }
 0x4a1   :  { %2752 = vmatprep.subr.mxu1 %v2684_v18  ;;  %v2532_v18 = vld [vmem:[#allocation7] sm:$0x3]  ;;  %v2912_v47 = vld [vmem:[%s5624_s15 + $0xa8] sm:$0xff] }
 0x4a2   :  { %v1466_v1 = vmul.f32 1.442695, %v1465_v59  ;;  %2753 = vmatpush1.msra.mxu1 %v2683_v19  ;;  %v2072_v59 = vrot.slane %v2063_v46, %v4539_v42  ;;  %2281 = vst.msk [vmem:[#allocation2 + $0x68] sm:$0x3] %vm1577_vm10, %v2278_v57  ;;  %v2913_v46 = vld [vmem:[%s5624_s15 + $0xb0] sm:$0xff]  ;;  %v2904_v55 = vld [vmem:[%s5624_s15 + $0x68] sm:$0xff] }
 0x4a3   :  { %2754 = vmatprep.subr.mxu1 %v2682_v20  ;;  %v2660_v20 = vld [vmem:[%s5622_s13 + $0x8] sm:$0xff]  ;;  %v2902_v57 = vld [vmem:[%s5624_s15 + $0x58] sm:$0xff] }
 0x4a4   :  { %4010 = vpow2.f32 %v1466_v1  ;;  %2755 = vmatpush1.msra.mxu1 %v2681_v21  ;;  %v2161_v1 = vpop.f32.mrf.mxu0  ;;  %v2659_v21 = vld [vmem:[%s5622_s13] sm:$0xff] }
 0x4a5   :  { %2756 = vmatprep.subr.mxu1 %v2680_v22  ;;  %v2162_v3 = vadd.f32 %v2161_v1, %v2072_v59  ;;  %v2537_v22 = vrot.slane %v2532_v18, %v4541_v44  ;;  %v2900_v59 = vld [vmem:[%s5624_s15 + $0x48] sm:$0xff]  ;;  %v2895_v1 = vld [vmem:[%s5624_s15 + $0x20] sm:$0xff] }
 0x4a6   :  { %2757 = vmatpush1.msra.mxu1 %v2679_v23  ;;  %v2391_v9 = vpop.f32.mrf.mxu0  ;;  %v2541_v23 = vrot.slane %v2532_v18, %v4539_v42 }
 0x4a7   :  { %2758 = vmatprep.subr.mxu1 %v2678_v24  ;;  %2165 = vst.msk [vmem:[#allocation2 + $0x58] sm:$0x3] %vm1577_vm10, %v2162_v3  ;;  %v2696_v24 = vld [vmem:[%s5622_s13 + $0x128] sm:$0x7f]  ;;  %v2893_v3 = vld [vmem:[%s5624_s15 + $0x10] sm:$0xff] }
 0x4a8   :  { %2759 = vmatpush1.msra.mxu1 %v2677_v25  ;;  %v2393_v13 = vpop.f32.mrf.mxu0 }
 0x4a9   :  { %2760 = vmatprep.subr.mxu1 %v2676_v26  ;;  %v2394_v15 = vadd.f32 %v2393_v13, %v2304_v7  ;;  %v2641_v13 = vld [vmem:[#allocation2 + $0x10] sm:$0xff] }
 0x4aa   :  { %2761 = vmatpush1.msra.mxu1 %v2675_v28  ;;  %v2628_v19 = vpop.f32.mrf.mxu0  ;;  %v2695_v28 = vld [vmem:[%s5622_s13 + $0x120] sm:$0x7f] }
 0x4ab   :  { %2762 = vmatprep.subr.mxu1 %v2674_v29  ;;  %2397 = vst.msk [vmem:[#allocation2 + $0x78] sm:$0x3] %vm1577_vm10, %v2394_v15  ;;  %v2629_v26 = vadd.f32 %v2628_v19, %v2537_v22  ;;  %v2694_v29 = vld [vmem:[%s5622_s13 + $0x118] sm:$0xff]  ;;  %v2645_v19 = vld [vmem:[#allocation2 + $0x30] sm:$0xff]  ;;  %v2647_v22 = vld [vmem:[#allocation2 + $0x40] sm:$0xff] }
 0x4ac   :  { %2763 = vmatpush1.msra.mxu1 %v2673_v30  ;;  %v2630_v25 = vpop.f32.mrf.mxu0  ;;  %v2693_v30 = vld [vmem:[%s5622_s13 + $0x110] sm:$0xff]  ;;  %s4335_s13 = smov 19  }
 0x4ad   :  { %2764 = vmatprep.subr.mxu1 %v2672_v33  ;;  %v2631_v27 = vadd.f32 %v2630_v25, %v2541_v23  ;;  %2633 = vst [vmem:[#allocation2 + $0x90] sm:$0x3] %v2629_v26  ;;  %v2649_v25 = vld [vmem:[#allocation2 + $0x50] sm:$0xff] }
 0x4ae   :  { %2765 = vmatpush1.msra.mxu1 %v2671_v34 }
 0x4af   :  { %2766 = vmatprep.subr.mxu1 %v2670_v36  ;;  %2634 = vst.msk [vmem:[#allocation2 + $0x98] sm:$0x3] %vm1577_vm10, %v2631_v27  ;;  %v2920_v36 = vld [vmem:[%s5624_s15 + $0xe8] sm:$0xff]  ;;  %v2651_v27 = vld [vmem:[#allocation2 + $0x60] sm:$0xff] }
 0x4b0   :  { %2767 = vmatpush1.msra.mxu1 %v2669_v39  ;;  %v2917_v39 = vld [vmem:[%s5624_s15 + $0xd0] sm:$0xff] }
 0x4b1   :  { %v4975_v11 = vpop.eup %4010  ;;  %2768 = vmatprep.subr.mxu1 %v2668_v43  ;;  %v2915_v43 = vld [vmem:[%s5624_s15 + $0xc0] sm:$0xff] }
 0x4b2   :  { %v1468_v0 = vsel %vm1461_vm7, %v4975_v11, 0.0  ;;  %2769 = vmatpush1.msra.mxu1 %v2667_v48  ;;  %v2911_v48 = vld [vmem:[%s5624_s15 + $0xa0] sm:$0xff]  ;;  %vm3637_vm7 = vcmask 976736  }
 0x4b3   :  { %1469 = vadd.xlane.f32.xlu1 %v1468_v0  ;;  %2770 = vmatprep.subr.mxu1 %v2666_v51  ;;  %v2392_v0 = vadd.f32 %v2391_v9, %v2300_v5  ;;  %v2908_v51 = vld [vmem:[%s5624_s15 + $0x88] sm:$0xff] }
 0x4b4   :  { %2771 = vmatpush1.msra.mxu1 %v2665_v53  ;;  %v2906_v53 = vld [vmem:[%s5624_s15 + $0x78] sm:$0xff] }
 0x4b5   :  { %2772 = vmatprep.subr.mxu1 %v2664_v56  ;;  %2396 = vst [vmem:[#allocation2 + $0x70] sm:$0x3] %v2392_v0  ;;  %v2903_v56 = vld [vmem:[%s5624_s15 + $0x60] sm:$0xff] }
 0x4b6   :  { %2773 = vmatpush1.msra.mxu1 %v2663_v58  ;;  %v2901_v58 = vld [vmem:[%s5624_s15 + $0x50] sm:$0xff] }
 0x4b7   :  { %2774 = vmatprep.subr.mxu1 %v2662_v60  ;;  %v2899_v60 = vld [vmem:[%s5624_s15 + $0x40] sm:$0xff] }
 0x4b8   :  { %2775 = vmatpush1.msra.mxu1 %v2661_v17 }
 0x4b9   :  { %2776 = vmatprep.subr.mxu1 %v2660_v20 }
 0x4ba   :  { %2777 = vmatpush1.msra.mxu1 %v2659_v21 }
 0x4bb   :  { %3706 = vmatprep.subr.msk.mxu1 %vm2739_vm11, %v2696_v24 }
 0x4bc   :  { %3707 = vmatpush2.msk.msra.mxu1 %vm2739_vm11, %v2695_v28 }
 0x4bd   :  { %2806 = vmatprep.subr.mxu1 %v2694_v29  ;;  %v2653_v29 = vld [vmem:[#allocation2 + $0x70] sm:$0xff] }
 0x4be   :  { %2807 = vmatpush2.msra.mxu1 %v2693_v30 }
 0x4bf   :  { %2808 = vmatprep.subr.mxu1 %v2692_v31  ;;  %v2655_v31 = vld [vmem:[#allocation2 + $0x80] sm:$0xff] }
 0x4c0   :  { %2809 = vmatpush2.msra.mxu1 %v2691_v32 }
 0x4c1   :  { %3181 = vmatprep.subr.mxu1 %v4589_v40 }
 0x53c   :  { %v1470_v16 = vpop.xlane.xlu1 %1469 }
 0x53d   :  { %4012 = vrcp.f32 %v1470_v16  ;;  %v2643_v16 = vld [vmem:[#allocation2 + $0x20] sm:$0xff] }
 0x54a   :  { %v4013_v33 = vpop.eup %4012 }
 0x54b   :  { %v5115_v34 = vmul.f32 %v4013_v33, %v4975_v11  ;;  %v2922_v11 = vld [vmem:[%s5624_s15 + $0xf8] sm:$0xff]  ;;  %v2657_v33 = vld [vmem:[#allocation2 + $0x90] sm:$0xff] }
 0x54c   :  { %2977 = vmatprep.subr.mxu0 %v2922_v11  ;;  %v2892_v11 = vld [vmem:[%s5624_s15 + $0x8] sm:$0xff] }
 0x54d   :  { %1813 = vrot.lane.b32.xlu1 %v5115_v34, %s4331_s0  ;;  %1580 = vrot.lane.b32.xlu0 %v5115_v34, %s4332_s30  ;;  %s4341_s30 = smov 116  }
 0x54e   :  { %2978 = vmatpush1.msra.mxu0 %v2921_v35  ;;  %v2891_v35 = vld [vmem:[%s5624_s15] sm:$0xff] }
 0x54f   :  { %2979 = vmatprep.subr.mxu0 %v2920_v36  ;;  %v2928_v36 = vld [vmem:[%s5624_s15 + $0x128] sm:$0x7f] }
 0x550   :  { %2980 = vmatpush1.msra.mxu0 %v2919_v37  ;;  %v2927_v37 = vld [vmem:[%s5624_s15 + $0x120] sm:$0x7f] }
 0x551   :  { %2519 = vrot.lane.b32.xlu1 %v5115_v34, %s4333_s12  ;;  %1697 = vrot.lane.b32.xlu0 %v5115_v34, %s4334_s20 }
 0x552   :  { %2981 = vmatprep.subr.mxu0 %v2918_v38  ;;  %v2926_v38 = vld [vmem:[%s5624_s15 + $0x118] sm:$0xff] }
 0x553   :  { %2982 = vmatpush1.msra.mxu0 %v2917_v39  ;;  %v2925_v39 = vld [vmem:[%s5624_s15 + $0x110] sm:$0xff] }
 0x554   :  { %2983 = vmatprep.subr.mxu0 %v2916_v41  ;;  %v2924_v41 = vld [vmem:[%s5624_s15 + $0x108] sm:$0xff] }
 0x555   :  { %1929 = vrot.lane.b32.xlu0 %v5115_v34, %s4335_s13  ;;  %2984 = vmatpush1.msra.mxu0 %v2915_v43  ;;  %v2923_v43 = vld [vmem:[%s5624_s15 + $0x100] sm:$0xff]  ;;  %s4342_s13 = smov 104  }
 0x556   :  { %2985 = vmatprep.subr.mxu0 %v2914_v45  ;;  %v3137_v45 = vld [vmem:[%s5626_s17 + $0x78] sm:$0xff] }
 0x557   :  { %2986 = vmatpush1.msra.mxu0 %v2913_v46  ;;  %v3136_v46 = vld [vmem:[%s5626_s17 + $0x70] sm:$0xff] }
 0x558   :  { %2987 = vmatprep.subr.mxu0 %v2912_v47  ;;  %v3135_v47 = vld [vmem:[%s5626_s17 + $0x68] sm:$0xff] }
 0x559   :  { %2050 = vrot.lane.b32.xlu0 %v5115_v34, %s4336_s21  ;;  %2988 = vmatpush1.msra.mxu0 %v2911_v48  ;;  %v3134_v48 = vld [vmem:[%s5626_s17 + $0x60] sm:$0xff] }
 0x55a   :  { %2989 = vmatprep.subr.mxu0 %v2910_v49  ;;  %v3133_v49 = vld [vmem:[%s5626_s17 + $0x58] sm:$0xff] }
 0x55b   :  { %2990 = vmatpush1.msra.mxu0 %v2909_v50  ;;  %v3132_v50 = vld [vmem:[%s5626_s17 + $0x50] sm:$0xff] }
 0x55c   :  { %2991 = vmatprep.subr.mxu0 %v2908_v51  ;;  %v3131_v51 = vld [vmem:[%s5626_s17 + $0x48] sm:$0xff] }
 0x55d   :  { %2166 = vrot.lane.b32.xlu0 %v5115_v34, %s4337_s8  ;;  %2992 = vmatpush1.msra.mxu0 %v2907_v52  ;;  %v3130_v52 = vld [vmem:[%s5626_s17 + $0x40] sm:$0xff] }
 0x55e   :  { %2993 = vmatprep.subr.mxu0 %v2906_v53  ;;  %v3129_v53 = vld [vmem:[%s5626_s17 + $0x38] sm:$0xff] }
 0x55f   :  { %2994 = vmatpush1.msra.mxu0 %v2905_v54  ;;  %v3128_v54 = vld [vmem:[%s5626_s17 + $0x30] sm:$0xff] }
 0x560   :  { %2995 = vmatprep.subr.mxu0 %v2904_v55  ;;  %v3127_v55 = vld [vmem:[%s5626_s17 + $0x28] sm:$0xff] }
 0x561   :  { %2282 = vrot.lane.b32.xlu0 %v5115_v34, %s4329_s18  ;;  %2996 = vmatpush1.msra.mxu0 %v2903_v56  ;;  %v3126_v56 = vld [vmem:[%s5626_s17 + $0x20] sm:$0xff] }
 0x562   :  { %2997 = vmatprep.subr.mxu0 %v2902_v57  ;;  %v3125_v57 = vld [vmem:[%s5626_s17 + $0x18] sm:$0xff] }
 0x563   :  { %2998 = vmatpush1.msra.mxu0 %v2901_v58  ;;  %v3124_v58 = vld [vmem:[%s5626_s17 + $0x10] sm:$0xff] }
 0x564   :  { %2999 = vmatprep.subr.mxu0 %v2900_v59  ;;  %v3123_v59 = vld [vmem:[%s5626_s17 + $0x8] sm:$0xff] }
 0x565   :  { %2398 = vrot.lane.b32.xlu0 %v5115_v34, %s4338_s16  ;;  %3000 = vmatpush1.msra.mxu0 %v2899_v60  ;;  %v2697_v60 = vld [vmem:[#allocation16] sm:$0x3] }
 0x566   :  { %3001 = vmatprep.subr.mxu0 %v2898_v61  ;;  %v5326_v61 = vrot.slane %v2697_v60, %v4541_v44 }
 0x567   :  { %3002 = vmatpush1.msra.mxu0 %v2897_v62  ;;  %v5329_v62 = vrot.slane %v2697_v60, %v4539_v42 }
 0x568   :  { %3003 = vmatprep.subr.mxu0 %v2896_v63 }
 0x569   :  { %2635 = vrot.lane.b32.xlu0 %v5115_v34, %s4339_s1  ;;  %3004 = vmatpush1.msra.mxu0 %v2895_v1 }
 0x56a   :  { %3005 = vmatprep.subr.mxu0 %v2894_v2 }
 0x56b   :  { %3006 = vmatpush1.msra.mxu0 %v2893_v3 }
 0x56c   :  { %3007 = vmatprep.subr.mxu0 %v2892_v11 }
 0x56d   :  { %3008 = vmatpush1.msra.mxu0 %v2891_v35 }
 0x56e   :  { %3718 = vmatprep.subr.msk.mxu0 %vm2739_vm11, %v2928_v36 }
 0x56f   :  { %3719 = vmatpush2.msk.msra.mxu0 %vm2739_vm11, %v2927_v37 }
 0x570   :  { %3037 = vmatprep.subr.mxu0 %v2926_v38 }
 0x571   :  { %3038 = vmatpush2.msra.mxu0 %v2925_v39 }
 0x572   :  { %3039 = vmatprep.subr.mxu0 %v2924_v41 }
 0x573   :  { %3040 = vmatpush2.msra.mxu0 %v2923_v43 }
 0x5bf   :  { %v1814_v4 = vpop.permute.xlu1 %1813  ;;  %v1581_v5 = vpop.permute.xlu0 %1580 }
 0x5c0   :  { %1816 = vst.msk [vmem:[#allocation2 + $0x28] sm:$0x3] %vm1583_vm12, %v1814_v4  ;;  %1584 = vst.msk [vmem:[#allocation2 + $0x8] sm:$0x3] %vm1583_vm12, %v1581_v5 }
 0x5c3   :  { %v2520_v6 = vpop.permute.xlu1 %2519  ;;  %v1698_v7 = vpop.permute.xlu0 %1697 }
 0x5c4   :  { %2522 = vst.msk [vmem:[#allocation2 + $0x88] sm:$0x3] %vm1583_vm12, %v2520_v6  ;;  %1700 = vst.msk [vmem:[#allocation2 + $0x18] sm:$0x3] %vm1583_vm12, %v1698_v7 }
 0x5c7   :  { %v1930_v8 = vpop.permute.xlu0 %1929  ;;  %v2640_v9 = vld [vmem:[#allocation2 + $0x8] sm:$0xff] }
 0x5c8   :  { %1932 = vst.msk [vmem:[#allocation2 + $0x38] sm:$0x3] %vm1583_vm12, %v1930_v8  ;;  %3708 = vmatprep.mubr.msk.f32.mxu1 %vm196_vm9, %v2640_v9  ;;  %v2644_v14 = vld [vmem:[#allocation2 + $0x28] sm:$0xff] }
 0x5c9   :  { %2811 = vmatmul.mubr.f32.vlgmr.msra.gmra.mxu1 %v2639_v10 }
 0x5ca   :  { %3182 = vmatpush1.msra.mxu1 %v3137_v45 }
 0x5cb   :  { %v2051_v0 = vpop.permute.xlu0 %2050  ;;  %v2642_v12 = vld [vmem:[#allocation2 + $0x18] sm:$0xff]  ;;  %v2656_v30 = vld [vmem:[#allocation2 + $0x88] sm:$0xff]  ;;  %3183 = vmatprep.subr.mxu1 %v4589_v40 }
 0x5cc   :  { %2053 = vst.msk [vmem:[#allocation2 + $0x48] sm:$0x3] %vm1583_vm12, %v2051_v0  ;;  %3709 = vmatprep.mubr.msk.f32.mxu1 %vm196_vm9, %v2642_v12  ;;  %3184 = vmatpush1.msra.mxu1 %v3136_v46 }
 0x5cd   :  { %2817 = vmatmul.mubr.f32.gmra.mxu1 %v2641_v13  ;;  %3185 = vmatprep.subr.mxu1 %v4589_v40 }
 0x5ce   :  { %3710 = vmatprep.mubr.msk.f32.mxu1 %vm196_vm9, %v2644_v14  ;;  %3186 = vmatpush1.msra.mxu1 %v3135_v47 }
 0x5cf   :  { %v2167_v15 = vpop.permute.xlu0 %2166  ;;  %v2646_v17 = vld [vmem:[#allocation2 + $0x38] sm:$0xff]  ;;  %3187 = vmatprep.subr.mxu1 %v4589_v40 }
 0x5d0   :  { %2169 = vst.msk [vmem:[#allocation2 + $0x58] sm:$0x3] %vm1583_vm12, %v2167_v15  ;;  %3188 = vmatpush1.msra.mxu1 %v3134_v48 }
 0x5d1   :  { %2823 = vmatmul.mubr.f32.gmra.mxu1 %v2643_v16  ;;  %3189 = vmatprep.subr.mxu1 %v4589_v40 }
 0x5d2   :  { %3711 = vmatprep.mubr.msk.f32.mxu1 %vm196_vm9, %v2646_v17  ;;  %3190 = vmatpush1.msra.mxu1 %v3133_v49 }
 0x5d3   :  { %v2283_v18 = vpop.permute.xlu0 %2282  ;;  %v2648_v20 = vld [vmem:[#allocation2 + $0x48] sm:$0xff]  ;;  %3191 = vmatprep.subr.mxu1 %v4589_v40 }
 0x5d4   :  { %2285 = vst.msk [vmem:[#allocation2 + $0x68] sm:$0x3] %vm1583_vm12, %v2283_v18  ;;  %3192 = vmatpush1.msra.mxu1 %v3132_v50 }
 0x5d5   :  { %2829 = vmatmul.mubr.f32.gmra.mxu1 %v2645_v19  ;;  %3193 = vmatprep.subr.mxu1 %v4589_v40 }
 0x5d6   :  { %3712 = vmatprep.mubr.msk.f32.mxu1 %vm196_vm9, %v2648_v20  ;;  %3194 = vmatpush1.msra.mxu1 %v3131_v51 }
 0x5d7   :  { %v2399_v21 = vpop.permute.xlu0 %2398  ;;  %v2650_v23 = vld [vmem:[#allocation2 + $0x58] sm:$0xff]  ;;  %3195 = vmatprep.subr.mxu1 %v4589_v40 }
 0x5d8   :  { %2401 = vst.msk [vmem:[#allocation2 + $0x78] sm:$0x3] %vm1583_vm12, %v2399_v21  ;;  %3196 = vmatpush1.msra.mxu1 %v3130_v52 }
 0x5d9   :  { %2835 = vmatmul.mubr.f32.gmra.mxu1 %v2647_v22  ;;  %3197 = vmatprep.subr.mxu1 %v4589_v40 }
 0x5da   :  { %3713 = vmatprep.mubr.msk.f32.mxu1 %vm196_vm9, %v2650_v23  ;;  %3198 = vmatpush1.msra.mxu1 %v3129_v53 }
 0x5db   :  { %v2636_v24 = vpop.permute.xlu0 %2635  ;;  %v2652_v26 = vld [vmem:[#allocation2 + $0x68] sm:$0xff]  ;;  %3199 = vmatprep.subr.mxu1 %v4589_v40 }
 0x5dc   :  { %2638 = vst.msk [vmem:[#allocation2 + $0x98] sm:$0x3] %vm1583_vm12, %v2636_v24  ;;  %3200 = vmatpush1.msra.mxu1 %v3128_v54 }
 0x5dd   :  { %2841 = vmatmul.mubr.f32.gmra.mxu1 %v2649_v25  ;;  %3201 = vmatprep.subr.mxu1 %v4589_v40 }
 0x5de   :  { %3714 = vmatprep.mubr.msk.f32.mxu1 %vm196_vm9, %v2652_v26  ;;  %3202 = vmatpush1.msra.mxu1 %v3127_v55 }
 0x5df   :  { %v2654_v28 = vld [vmem:[#allocation2 + $0x78] sm:$0xff]  ;;  %3203 = vmatprep.subr.mxu1 %v4589_v40 }
 0x5e0   :  { %3204 = vmatpush1.msra.mxu1 %v3126_v56 }
 0x5e1   :  { %2847 = vmatmul.mubr.f32.gmra.mxu1 %v2651_v27  ;;  %3205 = vmatprep.subr.mxu1 %v4589_v40 }
 0x5e2   :  { %3715 = vmatprep.mubr.msk.f32.mxu1 %vm196_vm9, %v2654_v28  ;;  %3206 = vmatpush1.msra.mxu1 %v3125_v57 }
 0x5e3   :  { %v2658_v32 = vld [vmem:[#allocation2 + $0x98] sm:$0xff]  ;;  %3207 = vmatprep.subr.mxu1 %v4589_v40 }
 0x5e4   :  { %3208 = vmatpush1.msra.mxu1 %v3124_v58 }
 0x5e5   :  { %2853 = vmatmul.mubr.f32.gmra.mxu1 %v2653_v29  ;;  %3209 = vmatprep.subr.mxu1 %v4589_v40 }
 0x5e6   :  { %3716 = vmatprep.mubr.msk.f32.mxu1 %vm196_vm9, %v2656_v30  ;;  %3210 = vmatpush1.msra.mxu1 %v3123_v59 }
 0x5e7   :  { %3211 = vmatprep.subr.mxu1 %v4589_v40 }
 0x5e9   :  { %2859 = vmatmul.mubr.f32.gmra.mxu1 %v2655_v31 }
 0x5ea   :  { %3717 = vmatprep.mubr.msk.f32.mxu1 %vm196_vm9, %v2658_v32 }
 0x5ed   :  { %2865 = vmatmul.mubr.f32.gmra.mxu1 %v2657_v33 }
 0x689   :  { %v2812_v63 = vpop.f32.mrf.mxu1 }
 0x68a   :  { %v2813_v1 = vadd.f32 %v2812_v63, %v5326_v61 }
 0x68b   :  { %v2814_v2 = vpop.f32.mrf.mxu1 }
 0x68c   :  { %v2815_v3 = vadd.f32 %v2814_v2, %v5329_v62  ;;  %v2871_v6 = vmax.f32 %v2813_v1, 0.0  ;;  %v3122_v2 = vld [vmem:[%s5626_s17] sm:$0xff] }
 0x68d   :  { %v2818_v4 = vpop.f32.mrf.mxu1  ;;  %3212 = vmatpush1.msra.mxu1 %v3122_v2 }
 0x68e   :  { %v2872_v5 = vmax.f32 %v2815_v3, 0.0  ;;  %v2819_v7 = vadd.f32 %v2818_v4, %v5326_v61  ;;  %3239 = vmatprep.subr.mxu1 %v4589_v40  ;;  %v3138_v3 = vld [vmem:[%s5626_s17 + $0x80] sm:$0xff]  ;;  %v2929_v4 = vld [vmem:[#allocation17] sm:$0x3] }
 0x68f   :  { %v2820_v8 = vpop.f32.mrf.mxu1 }
 0x690   :  { %v2821_v9 = vadd.f32 %v2820_v8, %v5329_v62  ;;  %3720 = vmatprep.mubr.msk.f32.mxu0 %vm196_vm9, %v2872_v5  ;;  %v2873_v12 = vmax.f32 %v2819_v7, 0.0  ;;  %v5378_v5 = vrot.slane %v2929_v4, %v4541_v44 }
 0x691   :  { %v2824_v10 = vpop.f32.mrf.mxu1  ;;  %3042 = vmatmul.mubr.f32.vlgmr.msra.gmra.mxu0 %v2871_v6  ;;  %v5381_v6 = vrot.slane %v2929_v4, %v4539_v42  ;;  %v3730_v4 = vld [vmem:[#allocation19] ss:$0 sm:$0xff] }
 0x692   :  { %v2874_v0 = vmax.f32 %v2821_v9, 0.0  ;;  %v2825_v13 = vadd.f32 %v2824_v10, %v5326_v61 }
 0x693   :  { %v2826_v14 = vpop.f32.mrf.mxu1 }
 0x694   :  { %v2827_v15 = vadd.f32 %v2826_v14, %v5329_v62  ;;  %3721 = vmatprep.mubr.msk.f32.mxu0 %vm196_vm9, %v2874_v0  ;;  %v2875_v18 = vmax.f32 %v2825_v13, 0.0 }
 0x695   :  { %v2830_v16 = vpop.f32.mrf.mxu1  ;;  %3048 = vmatmul.mubr.f32.gmra.mxu0 %v2873_v12 }
 0x696   :  { %v2876_v17 = vmax.f32 %v2827_v15, 0.0  ;;  %v2831_v19 = vadd.f32 %v2830_v16, %v5326_v61 }
 0x697   :  { %v2832_v20 = vpop.f32.mrf.mxu1 }
 0x698   :  { %v2833_v21 = vadd.f32 %v2832_v20, %v5329_v62  ;;  %3722 = vmatprep.mubr.msk.f32.mxu0 %vm196_vm9, %v2876_v17  ;;  %v2877_v24 = vmax.f32 %v2831_v19, 0.0 }
 0x699   :  { %v2836_v22 = vpop.f32.mrf.mxu1  ;;  %3054 = vmatmul.mubr.f32.gmra.mxu0 %v2875_v18 }
 0x69a   :  { %v2878_v23 = vmax.f32 %v2833_v21, 0.0  ;;  %v2837_v25 = vadd.f32 %v2836_v22, %v5326_v61 }
 0x69b   :  { %v2838_v26 = vpop.f32.mrf.mxu1 }
 0x69c   :  { %v2839_v27 = vadd.f32 %v2838_v26, %v5329_v62  ;;  %3723 = vmatprep.mubr.msk.f32.mxu0 %vm196_vm9, %v2878_v23  ;;  %v2879_v30 = vmax.f32 %v2837_v25, 0.0 }
 0x69d   :  { %v2842_v28 = vpop.f32.mrf.mxu1  ;;  %3060 = vmatmul.mubr.f32.gmra.mxu0 %v2877_v24 }
 0x69e   :  { %v2880_v29 = vmax.f32 %v2839_v27, 0.0  ;;  %v2843_v31 = vadd.f32 %v2842_v28, %v5326_v61 }
 0x69f   :  { %v2844_v32 = vpop.f32.mrf.mxu1 }
 0x6a0   :  { %v2845_v33 = vadd.f32 %v2844_v32, %v5329_v62  ;;  %3724 = vmatprep.mubr.msk.f32.mxu0 %vm196_vm9, %v2880_v29  ;;  %v2881_v36 = vmax.f32 %v2843_v31, 0.0 }
 0x6a1   :  { %v2848_v11 = vpop.f32.mrf.mxu1  ;;  %3066 = vmatmul.mubr.f32.gmra.mxu0 %v2879_v30 }
 0x6a2   :  { %v2882_v35 = vmax.f32 %v2845_v33, 0.0  ;;  %v2849_v37 = vadd.f32 %v2848_v11, %v5326_v61 }
 0x6a3   :  { %v2850_v38 = vpop.f32.mrf.mxu1 }
 0x6a4   :  { %v2851_v39 = vadd.f32 %v2850_v38, %v5329_v62  ;;  %3725 = vmatprep.mubr.msk.f32.mxu0 %vm196_vm9, %v2882_v35  ;;  %v2883_v45 = vmax.f32 %v2849_v37, 0.0 }
 0x6a5   :  { %v2854_v41 = vpop.f32.mrf.mxu1  ;;  %3072 = vmatmul.mubr.f32.gmra.mxu0 %v2881_v36 }
 0x6a6   :  { %v2884_v43 = vmax.f32 %v2851_v39, 0.0  ;;  %v2855_v46 = vadd.f32 %v2854_v41, %v5326_v61 }
 0x6a7   :  { %v2856_v47 = vpop.f32.mrf.mxu1 }
 0x6a8   :  { %v2857_v48 = vadd.f32 %v2856_v47, %v5329_v62  ;;  %3726 = vmatprep.mubr.msk.f32.mxu0 %vm196_vm9, %v2884_v43  ;;  %v2885_v51 = vmax.f32 %v2855_v46, 0.0 }
 0x6a9   :  { %v2860_v49 = vpop.f32.mrf.mxu1  ;;  %3078 = vmatmul.mubr.f32.gmra.mxu0 %v2883_v45 }
 0x6aa   :  { %v2886_v50 = vmax.f32 %v2857_v48, 0.0  ;;  %v2861_v52 = vadd.f32 %v2860_v49, %v5326_v61 }
 0x6ab   :  { %v2862_v53 = vpop.f32.mrf.mxu1 }
 0x6ac   :  { %v2863_v54 = vadd.f32 %v2862_v53, %v5329_v62  ;;  %3727 = vmatprep.mubr.msk.f32.mxu0 %vm196_vm9, %v2886_v50  ;;  %v2887_v57 = vmax.f32 %v2861_v52, 0.0 }
 0x6ad   :  { %v2866_v55 = vpop.f32.mrf.mxu1  ;;  %3084 = vmatmul.mubr.f32.gmra.mxu0 %v2885_v51 }
 0x6ae   :  { %v2888_v56 = vmax.f32 %v2863_v54, 0.0  ;;  %v2867_v58 = vadd.f32 %v2866_v55, %v5326_v61  ;;  %v3140_v61 = vld [vmem:[%s5626_s17 + $0x90] sm:$0x7f] }
 0x6af   :  { %v2868_v59 = vpop.f32.mrf.mxu1  ;;  %3731 = vmatpush2.msk.msra.mxu1 %vm2739_vm11, %v3140_v61 }
 0x6b0   :  { %v2869_v60 = vadd.f32 %v2868_v59, %v5329_v62  ;;  %3728 = vmatprep.mubr.msk.f32.mxu0 %vm196_vm9, %v2888_v56  ;;  %v2889_v1 = vmax.f32 %v2867_v58, 0.0  ;;  %3241 = vmatprep.subr.mxu1 %v4589_v40  ;;  %v3139_v62 = vld [vmem:[%s5626_s17 + $0x88] sm:$0xff] }
 0x6b1   :  { %3090 = vmatmul.mubr.f32.gmra.mxu0 %v2887_v57  ;;  %3242 = vmatpush2.msra.mxu1 %v3139_v62 }
 0x6b2   :  { %v2890_v63 = vmax.f32 %v2869_v60, 0.0  ;;  %3243 = vmatprep.subr.mxu1 %v4589_v40 }
 0x6b3   :  { %3244 = vmatpush2.msra.mxu1 %v3138_v3 }
 0x6b4   :  { %3729 = vmatprep.mubr.msk.f32.mxu0 %vm196_vm9, %v2890_v63 }
 0x6b5   :  { %3096 = vmatmul.mubr.f32.gmra.mxu0 %v2889_v1 }
 0x751   :  { %v3043_v7 = vpop.f32.mrf.mxu0 }
 0x752   :  { %v3044_v8 = vadd.f32 %v3043_v7, %v5378_v5 }
 0x753   :  { %v3045_v9 = vpop.f32.mrf.mxu0 }
 0x754   :  { %v3046_v10 = vadd.f32 %v3045_v9, %v5381_v6  ;;  %v3102_v12 = vmax.f32 %v3044_v8, 0.0 }
 0x755   :  { %v3049_v0 = vpop.f32.mrf.mxu0 }
 0x756   :  { %v3103_v40 = vmax.f32 %v3046_v10, 0.0  ;;  %v3050_v13 = vadd.f32 %v3049_v0, %v5378_v5 }
 0x757   :  { %v3051_v14 = vpop.f32.mrf.mxu0 }
 0x758   :  { %v3052_v15 = vadd.f32 %v3051_v14, %v5381_v6  ;;  %3732 = vmatprep.mubr.msk.f32.mxu1 %vm196_vm9, %v3103_v40  ;;  %v3104_v16 = vmax.f32 %v3050_v13, 0.0 }
 0x759   :  { %v3055_v44 = vpop.f32.mrf.mxu0  ;;  %3246 = vmatmul.mubr.f32.vlgmr.msra.gmra.mxu1 %v3102_v12 }
 0x75a   :  { %v3105_v42 = vmax.f32 %v3052_v15, 0.0  ;;  %v3056_v17 = vadd.f32 %v3055_v44, %v5378_v5 }
 0x75b   :  { %v3057_v18 = vpop.f32.mrf.mxu0 }
 0x75c   :  { %v3058_v19 = vadd.f32 %v3057_v18, %v5381_v6  ;;  %3733 = vmatprep.mubr.msk.f32.mxu1 %vm196_vm9, %v3105_v42  ;;  %v3106_v22 = vmax.f32 %v3056_v17, 0.0 }
 0x75d   :  { %v3061_v20 = vpop.f32.mrf.mxu0  ;;  %3251 = vmatmul.mubr.f32.gmra.mxu1 %v3104_v16 }
 0x75e   :  { %v3107_v21 = vmax.f32 %v3058_v19, 0.0  ;;  %v3062_v23 = vadd.f32 %v3061_v20, %v5378_v5 }
 0x75f   :  { %v3063_v24 = vpop.f32.mrf.mxu0 }
 0x760   :  { %v3064_v25 = vadd.f32 %v3063_v24, %v5381_v6  ;;  %3734 = vmatprep.mubr.msk.f32.mxu1 %vm196_vm9, %v3107_v21  ;;  %v3108_v28 = vmax.f32 %v3062_v23, 0.0 }
 0x761   :  { %v3067_v26 = vpop.f32.mrf.mxu0  ;;  %3256 = vmatmul.mubr.f32.gmra.mxu1 %v3106_v22 }
 0x762   :  { %v3109_v27 = vmax.f32 %v3064_v25, 0.0  ;;  %v3068_v29 = vadd.f32 %v3067_v26, %v5378_v5 }
 0x763   :  { %v3069_v30 = vpop.f32.mrf.mxu0 }
 0x764   :  { %v3070_v31 = vadd.f32 %v3069_v30, %v5381_v6  ;;  %3735 = vmatprep.mubr.msk.f32.mxu1 %vm196_vm9, %v3109_v27  ;;  %v3110_v11 = vmax.f32 %v3068_v29, 0.0 }
 0x765   :  { %v3073_v32 = vpop.f32.mrf.mxu0  ;;  %3261 = vmatmul.mubr.f32.gmra.mxu1 %v3108_v28 }
 0x766   :  { %v3111_v33 = vmax.f32 %v3070_v31, 0.0  ;;  %v3074_v35 = vadd.f32 %v3073_v32, %v5378_v5 }
 0x767   :  { %v3075_v36 = vpop.f32.mrf.mxu0 }
 0x768   :  { %v3076_v37 = vadd.f32 %v3075_v36, %v5381_v6  ;;  %3736 = vmatprep.mubr.msk.f32.mxu1 %vm196_vm9, %v3111_v33  ;;  %v3112_v41 = vmax.f32 %v3074_v35, 0.0 }
 0x769   :  { %v3079_v38 = vpop.f32.mrf.mxu0  ;;  %3266 = vmatmul.mubr.f32.gmra.mxu1 %v3110_v11 }
 0x76a   :  { %v3113_v39 = vmax.f32 %v3076_v37, 0.0  ;;  %v3080_v43 = vadd.f32 %v3079_v38, %v5378_v5 }
 0x76b   :  { %v3081_v45 = vpop.f32.mrf.mxu0 }
 0x76c   :  { %v3082_v46 = vadd.f32 %v3081_v45, %v5381_v6  ;;  %3737 = vmatprep.mubr.msk.f32.mxu1 %vm196_vm9, %v3113_v39  ;;  %v3114_v49 = vmax.f32 %v3080_v43, 0.0  ;;  %v3423_v43 = vld [vmem:[%s5638_s5] sm:$0x3] }
 0x76d   :  { %v3085_v47 = vpop.f32.mrf.mxu0  ;;  %3271 = vmatmul.mubr.f32.gmra.mxu1 %v3112_v41  ;;  %v3471_v41 = vld [vmem:[%s5638_s5] sm:$0x3] }
 0x76e   :  { %v3115_v48 = vmax.f32 %v3082_v46, 0.0  ;;  %v3086_v50 = vadd.f32 %v3085_v47, %v5378_v5  ;;  %v3447_v45 = vld [vmem:[%s5638_s5] sm:$0x3] }
 0x76f   :  { %v3087_v51 = vpop.f32.mrf.mxu0 }
 0x770   :  { %v3088_v52 = vadd.f32 %v3087_v51, %v5381_v6  ;;  %3738 = vmatprep.mubr.msk.f32.mxu1 %vm196_vm9, %v3115_v48  ;;  %v3116_v55 = vmax.f32 %v3086_v50, 0.0 }
 0x771   :  { %v3091_v53 = vpop.f32.mrf.mxu0  ;;  %3276 = vmatmul.mubr.f32.gmra.mxu1 %v3114_v49 }
 0x772   :  { %v3117_v54 = vmax.f32 %v3088_v52, 0.0  ;;  %v3092_v56 = vadd.f32 %v3091_v53, %v5378_v5 }
 0x773   :  { %v3093_v57 = vpop.f32.mrf.mxu0 }
 0x774   :  { %v3094_v58 = vadd.f32 %v3093_v57, %v5381_v6  ;;  %3739 = vmatprep.mubr.msk.f32.mxu1 %vm196_vm9, %v3117_v54  ;;  %v3118_v63 = vmax.f32 %v3092_v56, 0.0 }
 0x775   :  { %v3097_v59 = vpop.f32.mrf.mxu0  ;;  %3281 = vmatmul.mubr.f32.gmra.mxu1 %v3116_v55 }
 0x776   :  { %v3119_v60 = vmax.f32 %v3094_v58, 0.0  ;;  %v3098_v1 = vadd.f32 %v3097_v59, %v5378_v5 }
 0x777   :  { %v3099_v2 = vpop.f32.mrf.mxu0 }
 0x778   :  { %v3100_v61 = vadd.f32 %v3099_v2, %v5381_v6  ;;  %3740 = vmatprep.mubr.msk.f32.mxu1 %vm196_vm9, %v3119_v60  ;;  %v3120_v3 = vmax.f32 %v3098_v1, 0.0 }
 0x779   :  { %3286 = vmatmul.mubr.f32.gmra.mxu1 %v3118_v63 }
 0x77a   :  { %v3121_v62 = vmax.f32 %v3100_v61, 0.0 }
 0x77c   :  { %3741 = vmatprep.mubr.msk.f32.mxu1 %vm196_vm9, %v3121_v62 }
 0x77d   :  { %3291 = vmatmul.mubr.f32.gmra.mxu1 %v3120_v3 }
 0x819   :  { %v3247_v7 = vpop.f32.mrf.mxu1 }
 0x81a   :  { %v3248_v8 = vadd.f32 %v3730_v4, %v3247_v7 }
 0x81b   :  { %v3249_v9 = vpop.f32.mrf.mxu1 }
 0x81c   :  { %v3297_v10 = vsel %vm3296_vm13, %v3248_v8, -inf }
 0x81d   :  { %v3252_v0 = vpop.f32.mrf.mxu1  ;;  %3298 = vmax.xlane.f32.xlu1 %v3297_v10 }
 0x81e   :  { %v3253_v5 = vadd.f32 %v3730_v4, %v3252_v0 }
 0x81f   :  { %v3254_v40 = vpop.f32.mrf.mxu1 }
 0x820   :  { %v3300_v6 = vsel %vm3296_vm13, %v3253_v5, -inf }
 0x821   :  { %v3257_v12 = vpop.f32.mrf.mxu1  ;;  %3301 = vmax.xlane.f32.xlu0 %v3300_v6 }
 0x822   :  { %v3258_v13 = vadd.f32 %v3730_v4, %v3257_v12 }
 0x823   :  { %v3259_v14 = vpop.f32.mrf.mxu1 }
 0x824   :  { %v3303_v15 = vsel %vm3296_vm13, %v3258_v13, -inf }
 0x825   :  { %v3262_v44 = vpop.f32.mrf.mxu1  ;;  %3304 = vmax.xlane.f32.xlu0 %v3303_v15 }
 0x826   :  { %v3263_v42 = vadd.f32 %v3730_v4, %v3262_v44 }
 0x827   :  { %v3264_v16 = vpop.f32.mrf.mxu1 }
 0x828   :  { %v3306_v17 = vsel %vm3296_vm13, %v3263_v42, -inf }
 0x829   :  { %v3267_v18 = vpop.f32.mrf.mxu1  ;;  %3307 = vmax.xlane.f32.xlu1 %v3306_v17 }
 0x82a   :  { %v3268_v19 = vadd.f32 %v3730_v4, %v3267_v18 }
 0x82b   :  { %v3269_v20 = vpop.f32.mrf.mxu1 }
 0x82c   :  { %v3309_v21 = vsel %vm3296_vm13, %v3268_v19, -inf }
 0x82d   :  { %v3272_v22 = vpop.f32.mrf.mxu1  ;;  %3310 = vmax.xlane.f32.xlu0 %v3309_v21 }
 0x82e   :  { %v3273_v23 = vadd.f32 %v3730_v4, %v3272_v22 }
 0x82f   :  { %v3274_v24 = vpop.f32.mrf.mxu1 }
 0x830   :  { %v3312_v25 = vsel %vm3296_vm13, %v3273_v23, -inf }
 0x831   :  { %v3277_v26 = vpop.f32.mrf.mxu1  ;;  %3313 = vmax.xlane.f32.xlu1 %v3312_v25 }
 0x832   :  { %v3278_v27 = vadd.f32 %v3730_v4, %v3277_v26 }
 0x833   :  { %v3279_v28 = vpop.f32.mrf.mxu1 }
 0x834   :  { %v3315_v29 = vsel %vm3296_vm13, %v3278_v27, -inf  ;;  %v3543_v28 = vld [vmem:[%s5638_s5] sm:$0x3] }
 0x835   :  { %v3282_v30 = vpop.f32.mrf.mxu1  ;;  %3316 = vmax.xlane.f32.xlu0 %v3315_v29  ;;  %v3567_v29 = vld [vmem:[%s5638_s5] sm:$0x3] }
 0x836   :  { %v5420_v31 = vadd.f32 %v3730_v4, %v3282_v30  ;;  %v3495_v30 = vld [vmem:[%s5638_s5] sm:$0x3] }
 0x837   :  { %v3284_v32 = vpop.f32.mrf.mxu1 }
 0x838   :  { %v3318_v33 = vsel %vm3296_vm13, %v5420_v31, -inf }
 0x839   :  { %v3287_v11 = vpop.f32.mrf.mxu1  ;;  %3319 = vmax.xlane.f32.xlu1 %v3318_v33 }
 0x83a   :  { %v5424_v35 = vadd.f32 %v3730_v4, %v3287_v11 }
 0x83b   :  { %v3289_v36 = vpop.f32.mrf.mxu1 }
 0x83c   :  { %v3321_v37 = vsel %vm3296_vm13, %v5424_v35, -inf }
 0x83d   :  { %v3292_v38 = vpop.f32.mrf.mxu1  ;;  %3322 = vmax.xlane.f32.xlu0 %v3321_v37 }
 0x83e   :  { %v5437_v46 = vadd.f32 %v3730_v4, %v3292_v38  ;;  %v3615_v38 = vld [vmem:[%s5638_s5] sm:$0x3] }
 0x83f   :  { %v3294_v39 = vpop.f32.mrf.mxu1 }
 0x840   :  { %v3324_v47 = vsel %vm3296_vm13, %v5437_v46, -inf }
 0x84a   :  { %3473 = vrot.lane.b32.xlu1 %v3471_v41, %s4340_s6  ;;  %s4359_s6 = smov 48  }
 0x853   :  { %3425 = vrot.lane.b32.xlu0 %v3423_v43, %s4341_s30  ;;  %s4363_s30 = smov 96  }
 0x857   :  { %3449 = vrot.lane.b32.xlu0 %v3447_v45, %s4342_s13 }
 0x86e   :  { %3325 = vmax.xlane.f32.xlu1 %v3324_v47 }
 0x8a6   :  { %v3299_v48 = vpop.xlane.xlu1 %3298 }
 0x8a7   :  { %v3327_v49 = vsub.f32 %v3248_v8, %v3299_v48 }
 0x8a9   :  { %v3337_v50 = vmul.f32 1.442695, %v3327_v49  ;;  %v3407_v49 = vld [vmem:[%s5638_s5] sm:$0x3] }
 0x8aa   :  { %v3302_v51 = vpop.xlane.xlu0 %3301 }
 0x8ab   :  { %4014 = vpow2.f32 %v3337_v50  ;;  %v3328_v52 = vsub.f32 %v3253_v5, %v3302_v51 }
 0x8ad   :  { %v3339_v53 = vmul.f32 1.442695, %v3328_v52 }
 0x8ae   :  { %v3305_v54 = vpop.xlane.xlu0 %3304 }
 0x8af   :  { %4016 = vpow2.f32 %v3339_v53  ;;  %v3329_v55 = vsub.f32 %v3258_v13, %v3305_v54 }
 0x8b1   :  { %v3341_v56 = vmul.f32 1.442695, %v3329_v55 }
 0x8b2   :  { %v3308_v57 = vpop.xlane.xlu1 %3307 }
 0x8b3   :  { %4018 = vpow2.f32 %v3341_v56  ;;  %v3330_v58 = vsub.f32 %v3263_v42, %v3308_v57 }
 0x8b5   :  { %v3343_v59 = vmul.f32 1.442695, %v3330_v58 }
 0x8b6   :  { %v3311_v60 = vpop.xlane.xlu0 %3310 }
 0x8b7   :  { %4020 = vpow2.f32 %v3343_v59  ;;  %v3331_v63 = vsub.f32 %v3268_v19, %v3311_v60 }
 0x8b8   :  { %v5441_v1 = vpop.eup %4014 }
 0x8b9   :  { %v3345_v2 = vmul.f32 1.442695, %v3331_v63  ;;  %v3357_v61 = vsel %vm3296_vm13, %v5441_v1, 0.0 }
 0x8ba   :  { %3358 = vadd.xlane.f32.xlu0 %v3357_v61  ;;  %v3314_v62 = vpop.xlane.xlu1 %3313 }
 0x8bb   :  { %4022 = vpow2.f32 %v3345_v2  ;;  %v3332_v3 = vsub.f32 %v3273_v23, %v3314_v62 }
 0x8bc   :  { %v5445_v4 = vpop.eup %4016 }
 0x8bd   :  { %v3347_v7 = vmul.f32 1.442695, %v3332_v3  ;;  %v3360_v8 = vsel %vm3296_vm13, %v5445_v4, 0.0 }
 0x8be   :  { %v3317_v9 = vpop.xlane.xlu0 %3316  ;;  %3361 = vadd.xlane.f32.xlu1 %v3360_v8 }
 0x8bf   :  { %4024 = vpow2.f32 %v3347_v7  ;;  %v3333_v10 = vsub.f32 %v3278_v27, %v3317_v9  ;;  %v3519_v27 = vld [vmem:[%s5638_s5] sm:$0x3] }
 0x8c0   :  { %v5449_v0 = vpop.eup %4018 }
 0x8c1   :  { %v3349_v5 = vmul.f32 1.442695, %v3333_v10  ;;  %v3363_v40 = vsel %vm3296_vm13, %v5449_v0, 0.0 }
 0x8c2   :  { %3364 = vadd.xlane.f32.xlu0 %v3363_v40  ;;  %v3320_v6 = vpop.xlane.xlu1 %3319 }
 0x8c3   :  { %4026 = vpow2.f32 %v3349_v5  ;;  %v3334_v12 = vsub.f32 %v5420_v31, %v3320_v6  ;;  %v3591_v31 = vld [vmem:[%s5638_s5] sm:$0x3]  ;;  %s4358_s5 = smov 36  }
 0x8c4   :  { %v5454_v13 = vpop.eup %4020 }
 0x8c5   :  { %v3351_v14 = vmul.f32 1.442695, %v3334_v12  ;;  %v3366_v15 = vsel %vm3296_vm13, %v5454_v13, 0.0 }
 0x8c6   :  { %v3323_v44 = vpop.xlane.xlu0 %3322  ;;  %3367 = vadd.xlane.f32.xlu1 %v3366_v15  ;;  %v3474_v32 = vpop.permute.xlu1 %3473 }
 0x8c7   :  { %4028 = vpow2.f32 %v3351_v14  ;;  %v3335_v42 = vsub.f32 %v5424_v35, %v3323_v44 }
 0x8c8   :  { %v5459_v16 = vpop.eup %4022 }
 0x8c9   :  { %v3353_v17 = vmul.f32 1.442695, %v3335_v42  ;;  %v3369_v18 = vsel %vm3296_vm13, %v5459_v16, 0.0 }
 0x8ca   :  { %3370 = vadd.xlane.f32.xlu0 %v3369_v18  ;;  %v3426_v39 = vpop.permute.xlu0 %3425 }
 0x8cb   :  { %4030 = vpow2.f32 %v3353_v17 }
 0x8cc   :  { %v5463_v19 = vpop.eup %4024 }
 0x8cd   :  { %v3372_v20 = vsel %vm3296_vm13, %v5463_v19, 0.0 }
 0x8ce   :  { %3373 = vadd.xlane.f32.xlu1 %v3372_v20  ;;  %v3450_v41 = vpop.permute.xlu0 %3449 }
 0x8d0   :  { %v5467_v21 = vpop.eup %4026 }
 0x8d1   :  { %v3375_v22 = vsel %vm3296_vm13, %v5467_v21, 0.0 }
 0x8d2   :  { %3376 = vadd.xlane.f32.xlu0 %v3375_v22 }
 0x8d4   :  { %v5471_v23 = vpop.eup %4028 }
 0x8d5   :  { %v3378_v24 = vsel %vm3296_vm13, %v5471_v23, 0.0 }
 0x8d6   :  { %3379 = vadd.xlane.f32.xlu1 %v3378_v24 }
 0x8d8   :  { %v5475_v25 = vpop.eup %4030 }
 0x8d9   :  { %v3381_v26 = vsel %vm3296_vm13, %v5475_v25, 0.0 }
 0x8da   :  { %3382 = vadd.xlane.f32.xlu0 %v3381_v26  ;;  %v4347_v26 = vmov 0  }
 0x8db   :  { %3999 = vset.pattern.permute.xlu1 %v4347_v26  ;;  %v4355_v26 = vmov 9  }
 0x8e7   :  { %3521 = vrot.lane.b32.xlu1 %v3519_v27, %s4323_s4  ;;  %s4345_s4 = smov 80  }
 0x8eb   :  { %3545 = vrot.lane.b32.xlu1 %v3543_v28, %s4343_s10 }
 0x8ef   :  { %3569 = vrot.lane.b32.xlu1 %v3567_v29, %s4344_s23 }
 0x8f0   :  { %3497 = vrot.lane.b32.xlu0 %v3495_v30, %s4345_s4 }
 0x8f3   :  { %3593 = vrot.lane.b32.xlu1 %v3591_v31, %s4346_s24  ;;  %s4364_s24 = smov 108  }
 0x8f7   :  { %v3326_v33 = vpop.xlane.xlu1 %3325 }
 0x8f8   :  { %v3336_v11 = vsub.f32 %v5437_v46, %v3326_v33 }
 0x8fa   :  { %v3355_v35 = vmul.f32 1.442695, %v3336_v11 }
 0x8fc   :  { %4032 = vpow2.f32 %v3355_v35 }
 0x909   :  { %v5496_v36 = vpop.eup %4032 }
 0x90a   :  { %v3384_v37 = vsel %vm3296_vm13, %v5496_v36, 0.0 }
 0x917   :  { %3385 = vadd.xlane.f32.xlu1 %v3384_v37 }
 0x928   :  { %3617 = vrot.lane.b32.xlu1 %v3615_v38, %s4331_s0 }
 0x943   :  { %v3359_v43 = vpop.xlane.xlu0 %3358 }
 0x944   :  { %4034 = vrcp.f32 %v3359_v43 }
 0x947   :  { %v3362_v45 = vpop.xlane.xlu1 %3361 }
 0x948   :  { %4036 = vrcp.f32 %v3362_v45 }
 0x94b   :  { %v3365_v46 = vpop.xlane.xlu0 %3364 }
 0x94c   :  { %4038 = vrcp.f32 %v3365_v46 }
 0x94f   :  { %v3368_v47 = vpop.xlane.xlu1 %3367 }
 0x950   :  { %4040 = vrcp.f32 %v3368_v47 }
 0x951   :  { %v4035_v48 = vpop.eup %4034 }
 0x952   :  { %v3388_v50 = vmul.f32 %v4035_v48, %v5441_v1 }
 0x953   :  { %v3371_v51 = vpop.xlane.xlu0 %3370 }
 0x954   :  { %v5508_v52 = vmul.f32 %v3407_v49, %v3388_v50  ;;  %4042 = vrcp.f32 %v3371_v51 }
 0x955   :  { %v4037_v53 = vpop.eup %4036 }
 0x956   :  { %v3410_v54 = vsel %vm3409_vm14, %v5508_v52, 0.0  ;;  %v3390_v55 = vmul.f32 %v4037_v53, %v5445_v4 }
 0x957   :  { %3411 = vadd.xlane.f32.xlu0 %v3410_v54  ;;  %v3374_v56 = vpop.xlane.xlu1 %3373 }
 0x958   :  { %4044 = vrcp.f32 %v3374_v56  ;;  %v5513_v57 = vmul.f32 %v3426_v39, %v3390_v55 }
 0x959   :  { %v4039_v58 = vpop.eup %4038 }
 0x95a   :  { %v3429_v59 = vsel %vm3409_vm14, %v5513_v57, 0.0  ;;  %v3392_v60 = vmul.f32 %v4039_v58, %v5449_v0  ;;  %v4349_v58 = vmov 2  }
 0x95b   :  { %v3377_v63 = vpop.xlane.xlu0 %3376  ;;  %3430 = vadd.xlane.f32.xlu1 %v3429_v59 }
 0x95c   :  { %4046 = vrcp.f32 %v3377_v63  ;;  %v5518_v1 = vmul.f32 %v3450_v41, %v3392_v60 }
 0x95d   :  { %v4041_v2 = vpop.eup %4040 }
 0x95e   :  { %v3453_v61 = vsel %vm3409_vm14, %v5518_v1, 0.0  ;;  %v3394_v62 = vmul.f32 %v4041_v2, %v5454_v13 }
 0x95f   :  { %3454 = vadd.xlane.f32.xlu0 %v3453_v61  ;;  %v3380_v3 = vpop.xlane.xlu1 %3379  ;;  %v4350_v61 = vmov 3  }
 0x960   :  { %4048 = vrcp.f32 %v3380_v3  ;;  %v5523_v4 = vmul.f32 %v3474_v32, %v3394_v62 }
 0x961   :  { %v4043_v8 = vpop.eup %4042 }
 0x962   :  { %v3477_v7 = vsel %vm3409_vm14, %v5523_v4, 0.0  ;;  %v3396_v5 = vmul.f32 %v4043_v8, %v5459_v16 }
 0x963   :  { %v3383_v9 = vpop.xlane.xlu0 %3382  ;;  %3478 = vadd.xlane.f32.xlu1 %v3477_v7  ;;  %v3522_v10 = vpop.permute.xlu1 %3521 }
 0x964   :  { %4050 = vrcp.f32 %v3383_v9  ;;  %v4351_v9 = vmov 5  }
 0x965   :  { %v4045_v0 = vpop.eup %4044 }
 0x966   :  { %v3398_v40 = vmul.f32 %v4045_v0, %v5463_v19 }
 0x967   :  { %v3498_v6 = vpop.permute.xlu0 %3497  ;;  %v3546_v12 = vpop.permute.xlu1 %3545 }
 0x968   :  { %v5529_v13 = vmul.f32 %v3498_v6, %v3396_v5  ;;  %v5531_v14 = vmul.f32 %v3522_v10, %v3398_v40  ;;  %v4352_v5 = vmov 4  }
 0x969   :  { %v4047_v15 = vpop.eup %4046 }
 0x96a   :  { %v3501_v44 = vsel %vm3409_vm14, %v5529_v13, 0.0  ;;  %v3525_v42 = vsel %vm3409_vm14, %v5531_v14, 0.0  ;;  %v3400_v17 = vmul.f32 %v4047_v15, %v5467_v21 }
 0x96b   :  { %3502 = vadd.xlane.f32.xlu0 %v3501_v44  ;;  %3526 = vadd.xlane.f32.xlu1 %v3525_v42  ;;  %v3570_v16 = vpop.permute.xlu1 %3569 }
 0x96c   :  { %v5538_v18 = vmul.f32 %v3546_v12, %v3400_v17  ;;  %v4353_v17 = vmov 6  }
 0x96d   :  { %v4049_v19 = vpop.eup %4048 }
 0x96e   :  { %v3549_v20 = vsel %vm3409_vm14, %v5538_v18, 0.0  ;;  %v3402_v22 = vmul.f32 %v4049_v19, %v5471_v23  ;;  %v4348_v23 = vmov 1  }
 0x96f   :  { %3550 = vadd.xlane.f32.xlu1 %v3549_v20  ;;  %v3594_v28 = vpop.permute.xlu1 %3593  ;;  %4000 = vset.pattern.permute.xlu0 %v4348_v23  ;;  %v4354_v20 = vmov 7  }
 0x970   :  { %v5543_v24 = vmul.f32 %v3570_v16, %v3402_v22 }
 0x971   :  { %v4051_v27 = vpop.eup %4050 }
 0x972   :  { %v3573_v21 = vsel %vm3409_vm14, %v5543_v24, 0.0  ;;  %v3404_v29 = vmul.f32 %v4051_v27, %v5475_v25 }
 0x973   :  { %3574 = vadd.xlane.f32.xlu0 %v3573_v21 }
 0x974   :  { %v5548_v30 = vmul.f32 %v3594_v28, %v3404_v29  ;;  %v4356_v28 = vmov 8  }
 0x976   :  { %v3597_v31 = vsel %vm3409_vm14, %v5548_v30, 0.0 }
 0x977   :  { %3598 = vadd.xlane.f32.xlu1 %v3597_v31 }
 0x9a0   :  { %v3386_v32 = vpop.xlane.xlu1 %3385 }
 0x9a1   :  { %4052 = vrcp.f32 %v3386_v32 }
 0x9a4   :  { %v3618_v11 = vpop.permute.xlu1 %3617 }
 0x9ae   :  { %v4053_v33 = vpop.eup %4052 }
 0x9af   :  { %v3406_v35 = vmul.f32 %v4053_v33, %v5496_v36 }
 0x9b1   :  { %v5553_v37 = vmul.f32 %v3618_v11, %v3406_v35 }
 0x9b3   :  { %v3621_v25 = vsel %vm3409_vm14, %v5553_v37, 0.0 }
 0x9b4   :  { %3622 = vadd.xlane.f32.xlu0 %v3621_v25 }
 0x9e0   :  { %v3412_v38 = vpop.xlane.xlu0 %3411 }
 0x9e1   :  { %v3413_v39 = vadd.f32 1e-07, %v3412_v38 }
 0x9e3   :  { %4054 = vrcp.f32 %v3413_v39 }
 0x9e4   :  { %v3431_v41 = vpop.xlane.xlu1 %3430 }
 0x9e5   :  { %v3432_v43 = vadd.f32 1e-07, %v3431_v41 }
 0x9e7   :  { %4056 = vrcp.f32 %v3432_v43 }
 0x9e8   :  { %v3455_v45 = vpop.xlane.xlu0 %3454 }
 0x9e9   :  { %v3456_v46 = vadd.f32 1e-07, %v3455_v45 }
 0x9eb   :  { %4058 = vrcp.f32 %v3456_v46 }
 0x9ec   :  { %v3479_v47 = vpop.xlane.xlu1 %3478 }
 0x9ed   :  { %v3480_v48 = vadd.f32 1e-07, %v3479_v47 }
 0x9ef   :  { %4060 = vrcp.f32 %v3480_v48 }
 0x9f0   :  { %v4055_v49 = vpop.eup %4054 }
 0x9f1   :  { %v3415_v36 = vmul.f32 %v4055_v49, %v5115_v34 }
 0x9f3   :  { %3418 = vperm.xlu1 %3999, %v3415_v36  }
 0x9f4   :  { %v4057_v50 = vpop.eup %4056  ;;  %v3503_v51 = vpop.xlane.xlu0 %3502 }
 0x9f5   :  { %v3527_v53 = vpop.xlane.xlu1 %3526  ;;  %v3504_v54 = vadd.f32 1e-07, %v3503_v51  ;;  %v3434_v56 = vmul.f32 %v4057_v50, %v5115_v34 }
 0x9f6   :  { %v3528_v55 = vadd.f32 1e-07, %v3527_v53 }
 0x9f7   :  { %4062 = vrcp.f32 %v3504_v54  ;;  %3437 = vperm.xlu0 %4000, %v3434_v56   ;;  %4001 = vset.pattern.permute.xlu1 %v4349_v58 }
 0x9f8   :  { %v4059_v59 = vpop.eup %4058  ;;  %4064 = vrcp.f32 %v3528_v55 }
 0x9f9   :  { %v3551_v60 = vpop.xlane.xlu1 %3550  ;;  %v3458_v2 = vmul.f32 %v4059_v59, %v5115_v34 }
 0x9fa   :  { %v3552_v63 = vadd.f32 1e-07, %v3551_v60 }
 0x9fb   :  { %3461 = vperm.xlu1 %4001, %v3458_v2   ;;  %4002 = vset.pattern.permute.xlu0 %v4350_v61 }
 0x9fc   :  { %4066 = vrcp.f32 %v3552_v63  ;;  %v4061_v62 = vpop.eup %4060  ;;  %v3575_v3 = vpop.xlane.xlu0 %3574 }
 0x9fd   :  { %v3576_v7 = vadd.f32 1e-07, %v3575_v3  ;;  %v3482_v8 = vmul.f32 %v4061_v62, %v5115_v34 }
 0x9ff   :  { %3485 = vperm.xlu0 %4002, %v3482_v8   ;;  %4004 = vset.pattern.permute.xlu1 %v4351_v9  ;;  %4068 = vrcp.f32 %v3576_v7 }
 0xa00   :  { %v3599_v10 = vpop.xlane.xlu1 %3598 }
 0xa01   :  { %v3600_v0 = vadd.f32 1e-07, %v3599_v10 }
 0xa03   :  { %4003 = vset.pattern.permute.xlu0 %v4352_v5  ;;  %4070 = vrcp.f32 %v3600_v0 }
 0xa04   :  { %v4063_v40 = vpop.eup %4062 }
 0xa05   :  { %v4065_v6 = vpop.eup %4064  ;;  %v3506_v12 = vmul.f32 %v4063_v40, %v5115_v34 }
 0xa06   :  { %v3530_v15 = vmul.f32 %v4065_v6, %v5115_v34 }
 0xa07   :  { %3509 = vperm.xlu0 %4003, %v3506_v12  }
 0xa08   :  { %3533 = vperm.xlu1 %4004, %v3530_v15  }
 0xa09   :  { %v4067_v44 = vpop.eup %4066 }
 0xa0a   :  { %v3554_v42 = vmul.f32 %v4067_v44, %v5115_v34 }
 0xa0b   :  { %4009 = vset.pattern.permute.xlu0 %v4355_v26 }
 0xa0c   :  { %4005 = vset.pattern.permute.xlu1 %v4353_v17  ;;  %v4069_v16 = vpop.eup %4068 }
 0xa0d   :  { %3557 = vperm.xlu1 %4005, %v3554_v42   ;;  %v3578_v19 = vmul.f32 %v4069_v16, %v5115_v34 }
 0xa10   :  { %v4071_v22 = vpop.eup %4070 }
 0xa11   :  { %4006 = vset.pattern.permute.xlu1 %v4354_v20  ;;  %v3602_v27 = vmul.f32 %v4071_v22, %v5115_v34 }
 0xa12   :  { %3581 = vperm.xlu1 %4006, %v3578_v19  }
 0xa16   :  { %4007 = vset.pattern.permute.xlu1 %v4356_v28 }
 0xa17   :  { %3605 = vperm.xlu1 %4007, %v3602_v27  }
 0xa1b   :  { %4008 = vset.pattern.permute.xlu1 %v4355_v26 }
 0xa3d   :  { %v3623_v21 = vpop.xlane.xlu0 %3622 }
 0xa6e   :  { %v3419_v29 = vpop.permute.xlu1 %3418 }
 0xa6f   :  { %v3421_v31 = vmul.f32 %v3419_v29, %v5508_v52  ;;  %v3624_v52 = vadd.f32 1e-07, %v3623_v21 }
 0xa71   :  { %3422 = vst.msk [vmem:[%s5628_s19] sm:$0x3] %vm3409_vm14, %v3421_v31  ;;  %4072 = vrcp.f32 %v3624_v52 }
 0xa72   :  { %v3438_v23 = vpop.permute.xlu0 %3437 }
 0xa73   :  { %v3440_v32 = vmul.f32 %v3438_v23, %v5513_v57 }
 0xa75   :  { %3442 = vrot.lane.b32.xlu0 %v3440_v32, %s4357_s28 }
 0xa76   :  { %v3462_v33 = vpop.permute.xlu1 %3461 }
 0xa77   :  { %v3464_v11 = vmul.f32 %v3462_v33, %v5518_v1 }
 0xa79   :  { %3466 = vrot.lane.b32.xlu0 %v3464_v11, %s4311_s27  ;;  %s4361_s27 = smov 72  }
 0xa7a   :  { %v3486_v35 = vpop.permute.xlu0 %3485 }
 0xa7b   :  { %v3488_v25 = vmul.f32 %v3486_v35, %v5523_v4 }
 0xa7d   :  { %3490 = vrot.lane.b32.xlu1 %v3488_v25, %s4358_s5 }
 0xa7e   :  { %v4073_v46 = vpop.eup %4072 }
 0xa7f   :  { %v3626_v48 = vmul.f32 %v4073_v46, %v5115_v34 }
 0xa82   :  { %v3510_v38 = vpop.permute.xlu0 %3509 }
 0xa83   :  { %v3512_v39 = vmul.f32 %v3510_v38, %v5529_v13  ;;  %v3534_v41 = vpop.permute.xlu1 %3533 }
 0xa84   :  { %v3536_v57 = vmul.f32 %v3534_v41, %v5531_v14 }
 0xa85   :  { %3514 = vrot.lane.b32.xlu1 %v3512_v39, %s4359_s6 }
 0xa88   :  { %v3558_v43 = vpop.permute.xlu1 %3557 }
 0xa89   :  { %3538 = vrot.lane.b32.xlu1 %v3536_v57, %s4360_s11  ;;  %v3560_v1 = vmul.f32 %v3558_v43, %v5538_v18 }
 0xa8d   :  { %v3582_v45 = vpop.permute.xlu1 %3581  ;;  %3562 = vrot.lane.b32.xlu1 %v3560_v1, %s4361_s27 }
 0xa8e   :  { %v3584_v4 = vmul.f32 %v3582_v45, %v5543_v24 }
 0xa91   :  { %3586 = vrot.lane.b32.xlu1 %v3584_v4, %s4362_s29 }
 0xa92   :  { %v3606_v47 = vpop.permute.xlu1 %3605 }
 0xa93   :  { %v3608_v13 = vmul.f32 %v3606_v47, %v5548_v30 }
 0xa95   :  { %3610 = vrot.lane.b32.xlu0 %v3608_v13, %s4363_s30  ;;  %3629 = vperm.xlu1 %4008, %v3626_v48  }
 0xae7   :  { %v3443_v14 = vpop.permute.xlu0 %3442 }
 0xae8   :  { %3446 = vst.msk [vmem:[%s5628_s19] sm:$0x3] %vm3445_vm15, %v3443_v14 }
 0xaeb   :  { %v3467_v18 = vpop.permute.xlu0 %3466 }
 0xaec   :  { %3470 = vst.msk [vmem:[%s5628_s19] sm:$0x3] %vm3469_vm0, %v3467_v18 }
 0xaef   :  { %v3491_v24 = vpop.permute.xlu1 %3490 }
 0xaf0   :  { %3494 = vst.msk [vmem:[%s5628_s19] sm:$0x3] %vm3493_vm1, %v3491_v24 }
 0xaf7   :  { %v3515_v34 = vpop.permute.xlu1 %3514 }
 0xaf8   :  { %3518 = vst.msk [vmem:[%s5628_s19] sm:$0x3] %vm3517_vm2, %v3515_v34 }
 0xafb   :  { %v3539_v30 = vpop.permute.xlu1 %3538 }
 0xafc   :  { %3542 = vst.msk [vmem:[%s5628_s19] sm:$0x3] %vm3541_vm3, %v3539_v30 }
 0xaff   :  { %v3563_v49 = vpop.permute.xlu1 %3562 }
 0xb00   :  { %3566 = vst.msk [vmem:[%s5628_s19] sm:$0x3] %vm3565_vm4, %v3563_v49 }
 0xb03   :  { %v3587_v36 = vpop.permute.xlu1 %3586 }
 0xb04   :  { %3590 = vst.msk [vmem:[%s5628_s19] sm:$0x3] %vm3589_vm5, %v3587_v36 }
 0xb07   :  { %v3611_v50 = vpop.permute.xlu0 %3610 }
 0xb08   :  { %3614 = vst.msk [vmem:[%s5628_s19] sm:$0x3] %vm3613_vm6, %v3611_v50 }
 0xb10   :  { %v3630_v51 = vpop.permute.xlu1 %3629 }
 0xb11   :  { %v3632_v53 = vmul.f32 %v3630_v51, %v5553_v37 }
 0xb13   :  { %3634 = vrot.lane.b32.xlu0 %v3632_v53, %s4364_s24 }
 0xb85   :  { %v3635_v54 = vpop.permute.xlu0 %3634 }
 0xb86   :  { %3638 = vst.msk [vmem:[%s5628_s19] sm:$0x3] %vm3637_vm7, %v3635_v54 }
 0xb87   :  { %3643 = vsyncpa [#allocation4], 1 }
 0xb88   :  { %3644 = vsyncpa [#allocation6], 1 }
 0xb89   :  { %3645 = vsyncpa [#allocation9], 1 }
 0xb8a   :  { %3646 = vsyncpa [#allocation12], 1 }
 0xb8b   :  { %3647 = vsyncpa [#allocation15], 1 }
 0xb8c   :  { %3648 = vsyncpa [#allocation18], 1 }

</bundles_post_ra>
